<compile_context>
chip_gen: v5e
topology: v5e:2x2
jax: 0.10.0
libtpu: 0.0.40
codegen_flags: <defaults>
</compile_context>

<pallas_src>
import functools

import jax
import jax.numpy as jnp
from jax.experimental import pallas as pl
from jax.experimental.pallas import tpu as pltpu


def _round_up(x, m):
    return ((x + m - 1) // m) * m


def _cdiv(a, b):
    return (a + b - 1) // b


def _conv_bn_act_kernel(x_ref, w_ref, scale_ref, shift_ref, o_ref,
                        buf_ref, acc_ref, sem,
                        *, offs, center_off, tm, tn, n_j,
                        residual, leaky, negative_slope):
    """grid = (cout tiles j [outer], M tiles i [inner]); every step is self-contained."""
    i = pl.program_id(1)
    win = buf_ref.shape[0]

    # Fetch this M tile's input window (tm rows + halo) from HBM into VMEM.
    start = pl.multiple_of(i * tm, 8)
    cp = pltpu.make_async_copy(x_ref.at[pl.ds(start, win)], buf_ref, sem)
    cp.start()
    acc_ref[...] = jnp.zeros_like(acc_ref)          # overlaps with the DMA
    cp.wait()

    # Fused im2col: kh*kw shifted-slice GEMMs out of the resident window.
    for p, off in enumerate(offs):                  # static, unrolled
        acc_ref[...] += jnp.dot(buf_ref[pl.ds(off, tm), :], w_ref[p],
                                preferred_element_type=jnp.float32)

    # Epilogue: BN (fp32 scale/shift), optional residual, activation, cast.
    y = acc_ref[...] * scale_ref[...] + shift_ref[...]
    if residual:
        if n_j == 1:
            res = buf_ref[pl.ds(center_off, tm), :]
        else:
            col = pl.multiple_of(pl.program_id(0) * tn, 128)
            res = buf_ref[pl.ds(center_off, tm), pl.ds(col, tn)]
        y = y + res.astype(jnp.float32)
    if leaky:
        y = jnp.where(y > 0, y, negative_slope * y)
    else:
        y = jnp.maximum(y, 0.0)
    o_ref[...] = y.astype(o_ref.dtype)


def conv2d_block(x, weight, bias, gamma, beta, running_mean, running_var, *,
                 stride, padding, residual=False, leakyReLU=False, eps=1e-5,
                 tm=512, tn_max=512, out_dtype=jnp.bfloat16, nhwc_out=False):
    """Forward of the PyTorch Conv2d block (BatchNorm in eval mode)."""
    N, cin, H, W = x.shape
    cout, cin_w, kh, kw = weight.shape
    assert cin == cin_w
    Hp, Wp = H + 2 * padding, W + 2 * padding
    OH = (Hp - kh) // stride + 1
    OW = (Wp - kw) // stride + 1
    if residual:
        assert cin == cout and stride == 1 and (OH, OW) == (H, W), \
            "residual requires matching input/output shapes"

    # ---- cout / channel padding (lane-dense output) ---------------------------
    coutp = _round_up(cout, 128)
    tn = 128
    for cand in range(128, min(tn_max, coutp) + 1, 128):
        if coutp % cand == 0:
            tn = cand                     # largest 128-multiple divisor of coutp <= tn_max
    grid_j = coutp // tn
    # Residual is sliced back out of the input window, so its channel dim must line
    # up with the output columns; otherwise keep cin (sublane aligned).
    cin_p = coutp if residual else _round_up(cin, 8)

    # ---- M tiling over the dense (stride-1) padded output grid ----------------
    M = N * Hp * Wp
    if M <= 2 * tm:
        tm = max(16, _round_up(_cdiv(M, 2), 16))   # >= 2 M tiles -> both TCs get work
    grid_i = _cdiv(M, tm)
    Mp = grid_i * tm
    halo = (kh - 1) * Wp + (kw - 1)
    win = _round_up(tm + halo, 8)

    # ---- input: zero-padded NHWC, flattened to (rows, cin_p), bf16 ------------
    xp = jnp.transpose(x, (0, 2, 3, 1)).astype(jnp.bfloat16)
    xp = jnp.pad(xp, ((0, 0), (padding, padding), (padding, padding), (0, cin_p - cin)))
    rows = Mp + win - tm                           # every window stays in bounds
    x_flat = jnp.pad(xp.reshape(M, cin_p), ((0, rows - M), (0, 0)))

    # ---- weights: (cout, cin, kh, kw) -> (kh*kw, cin_p, coutp) bf16 ------------
    w = jnp.transpose(weight, (2, 3, 1, 0)).reshape(kh * kw, cin, cout)
    w = jnp.pad(w, ((0, 0), (0, cin_p - cin), (0, coutp - cout))).astype(jnp.bfloat16)

    # ---- BN (eval) folded into an fp32 epilogue scale/shift --------------------
    inv_std = jax.lax.rsqrt(running_var.astype(jnp.float32) + eps)
    scale = gamma.astype(jnp.float32) * inv_std
    shift = beta.astype(jnp.float32) + (bias.astype(jnp.float32)
                                        - running_mean.astype(jnp.float32)) * scale
    scale = jnp.pad(scale, (0, coutp - cout)).reshape(1, coutp)
    shift = jnp.pad(shift, (0, coutp - cout)).reshape(1, coutp)

    offs = tuple(di * Wp + dj for di in range(kh) for dj in range(kw))
    center_off = padding * Wp + padding

    kernel = functools.partial(
        _conv_bn_act_kernel, offs=offs, center_off=center_off, tm=tm, tn=tn,
        n_j=grid_j, residual=residual, leaky=leakyReLU, negative_slope=0.02)

    # ---- VMEM budget / limit ----------------------------------------------------
    out_bytes = jnp.dtype(out_dtype).itemsize
    vmem_need = (win * cin_p * 2                      # input window (single buffer)
                 + tm * tn * 4                        # fp32 accumulator
                 + 2 * kh * kw * cin_p * tn * 2       # weights (double buffered)
                 + 2 * tm * tn * out_bytes            # output (double buffered)
                 + 2 * 2 * tn * 4)                    # scale / shift
    try:
        vmem_cap = pltpu.get_tpu_info().vmem_capacity_bytes
    except Exception:
        vmem_cap = 64 * 1024 * 1024
    vmem_limit = int(min(vmem_cap - 16 * 1024 * 1024,
                         max(32 * 1024 * 1024, 2 * vmem_need)))

    out = pl.pallas_call(
        kernel,
        out_shape=jax.ShapeDtypeStruct((Mp, coutp), out_dtype),
        grid_spec=pltpu.PrefetchScalarGridSpec(
            num_scalar_prefetch=0,
            grid=(grid_j, grid_i),                    # j outer -> each weight block DMA'd once
            in_specs=[
                pl.BlockSpec(memory_space=pl.ANY),                          # flat input stays in HBM
                pl.BlockSpec((kh * kw, cin_p, tn), lambda j, i: (0, 0, j)),  # weights
                pl.BlockSpec((1, tn), lambda j, i: (0, j)),                  # BN scale
                pl.BlockSpec((1, tn), lambda j, i: (0, j)),                  # BN shift
            ],
            out_specs=pl.BlockSpec((tm, tn), lambda j, i: (i, j)),
            scratch_shapes=[
                pltpu.VMEM((win, cin_p), jnp.bfloat16),   # input window
                pltpu.VMEM((tm, tn), jnp.float32),        # accumulator
                pltpu.SemaphoreType.DMA(()),
            ]),
        compiler_params=pltpu.CompilerParams(
            dimension_semantics=("parallel", "parallel"),
            vmem_limit_bytes=vmem_limit),
    )(x_flat, w, scale, shift)

    # dense padded grid -> valid (strided) output positions
    out = out[:M, :cout].reshape(N, Hp, Wp, cout)
    out = out[:, ::stride, ::stride, :][:, :OH, :OW, :]
    if nhwc_out:
        return out
    return jnp.transpose(out, (0, 3, 1, 2))       # NCHW for module parity


def _reference(x, weight, bias, gamma, beta, mean, var, *, stride, padding,
               residual, leakyReLU, eps=1e-5):
    y = jax.lax.conv_general_dilated(
        x, weight, window_strides=(stride, stride),
        padding=[(padding, padding), (padding, padding)],
        dimension_numbers=("NCHW", "OIHW", "NCHW"))
    y = y + bias[None, :, None, None]
    y = (y - mean[None, :, None, None]) / jnp.sqrt(var[None, :, None, None] + eps)
    y = y * gamma[None, :, None, None] + beta[None, :, None, None]
    if residual:
        y = y + x
    if leakyReLU:
        return jnp.where(y > 0, y, 0.02 * y)
    return jnp.maximum(y, 0.0)


if __name__ == "__main__":
    N, cin, H, W = 2, 4, 16, 16
    cout, ksize, stride, padding = 4, 3, 1, 1

    key = jax.random.PRNGKey(0)
    kx, kw_, kb, kg, kbt, km, kv = jax.random.split(key, 7)

    x = jax.random.normal(kx, (N, cin, H, W), dtype=jnp.float32)
    weight = 0.1 * jax.random.normal(kw_, (cout, cin, ksize, ksize), dtype=jnp.float32)
    bias = 0.1 * jax.random.normal(kb, (cout,), dtype=jnp.float32)
    gamma = 1.0 + 0.1 * jax.random.normal(kg, (cout,), dtype=jnp.float32)
    beta = 0.1 * jax.random.normal(kbt, (cout,), dtype=jnp.float32)
    running_mean = 0.1 * jax.random.normal(km, (cout,), dtype=jnp.float32)
    running_var = jnp.abs(1.0 + 0.1 * jax.random.normal(kv, (cout,), dtype=jnp.float32))

    def check(out, ref):
        err = float(jnp.max(jnp.abs(out.astype(jnp.float32) - ref)))
        assert jnp.allclose(out.astype(jnp.float32), ref, atol=5e-2, rtol=5e-2), err

    # residual + ReLU
    f1 = jax.jit(functools.partial(conv2d_block, stride=stride, padding=padding,
                                   residual=True, leakyReLU=False))
    out1 = jax.block_until_ready(f1(x, weight, bias, gamma, beta,
                                    running_mean, running_var))
    assert out1.shape == (N, cout, H, W), out1.shape
    check(out1, _reference(x, weight, bias, gamma, beta, running_mean, running_var,
                           stride=stride, padding=padding, residual=True, leakyReLU=False))

    # non-residual + LeakyReLU(0.02)
    f2 = jax.jit(functools.partial(conv2d_block, stride=stride, padding=padding,
                                   residual=False, leakyReLU=True))
    out2 = jax.block_until_ready(f2(x, weight, bias, gamma, beta,
                                    running_mean, running_var))
    check(out2, _reference(x, weight, bias, gamma, beta, running_mean, running_var,
                           stride=stride, padding=padding, residual=False, leakyReLU=True))

    # strided conv, cout != cin, plain ReLU
    cout2 = 8
    k2 = jax.random.split(kv, 6)
    weight2 = 0.1 * jax.random.normal(k2[0], (cout2, cin, ksize, ksize), jnp.float32)
    bias2 = 0.1 * jax.random.normal(k2[1], (cout2,), jnp.float32)
    gamma2 = 1.0 + 0.1 * jax.random.normal(k2[2], (cout2,), jnp.float32)
    beta2 = 0.1 * jax.random.normal(k2[3], (cout2,), jnp.float32)
    mean2 = 0.1 * jax.random.normal(k2[4], (cout2,), jnp.float32)
    var2 = jnp.abs(1.0 + 0.1 * jax.random.normal(k2[5], (cout2,), jnp.float32))
    f3 = jax.jit(functools.partial(conv2d_block, stride=2, padding=1,
                                   residual=False, leakyReLU=False))
    out3 = jax.block_until_ready(f3(x, weight2, bias2, gamma2, beta2, mean2, var2))
    assert out3.shape == (N, cout2, 8, 8), out3.shape
    check(out3, _reference(x, weight2, bias2, gamma2, beta2, mean2, var2,
                           stride=2, padding=1, residual=False, leakyReLU=False))

    print("KERNEL_OK")
</pallas_src>

<mosaic_0001>
module attributes {stable_mosaic.version = 11 : i64} {
  func.func @_conv_bn_act_kernel(%arg0: i32, %arg1: i32, %arg2: memref<712x128xbf16, #tpu.memory_space<any>>, %arg3: memref<9x128x128xbf16, #tpu.memory_space<vmem>>, %arg4: memref<1x128xf32, #tpu.memory_space<vmem>>, %arg5: memref<1x128xf32, #tpu.memory_space<vmem>>, %arg6: memref<336x128xbf16, #tpu.memory_space<vmem>>, %arg7: memref<376x128xbf16, #tpu.memory_space<vmem>>, %arg8: memref<336x128xf32, #tpu.memory_space<vmem>>, %arg9: memref<!tpu.dma_semaphore, #tpu.memory_space<semaphore_mem>>) attributes {dimension_semantics = [#tpu.dimension_semantics<parallel>, #tpu.dimension_semantics<parallel>], iteration_bounds = array<i64: 1, 2>, scalar_prefetch = 0 : i64, scratch_operands = 3 : i64, tpu.core_type = #tpu.core_type<tc>, window_params = [{}, {transform_indices = @transform_1, window_bounds = array<i64: 9, 128, 128>}, {transform_indices = @transform_2, window_bounds = array<i64: 1, 128>}, {transform_indices = @transform_3, window_bounds = array<i64: 1, 128>}, {transform_indices = @transform_4, window_bounds = array<i64: 336, 128>}]} {
    %c336_i32 = arith.constant 336 : i32
    %0 = arith.muli %arg1, %c336_i32 : i32
    %1 = tpu.assume_multiple %0, 8 : i32
    %c0_i32 = arith.constant 0 : i32
    %2 = tpu.memref_slice %arg2[%1, %c0_i32] : memref<712x128xbf16, #tpu.memory_space<any>> -> memref<376x128xbf16, #tpu.memory_space<any>>
    tpu.enqueue_dma source(%2 : memref<376x128xbf16, #tpu.memory_space<any>>) target(%arg7 : memref<376x128xbf16, #tpu.memory_space<vmem>>) target_semaphore(%arg9 : memref<!tpu.dma_semaphore, #tpu.memory_space<semaphore_mem>>)
    %cst = arith.constant 0.000000e+00 : f32
    %3 = vector.broadcast %cst : f32 to vector<336x128xf32>
    %c0 = arith.constant 0 : index
    %c0_0 = arith.constant 0 : index
    %4 = vector.load %arg8[%c0, %c0_0] : memref<336x128xf32, #tpu.memory_space<vmem>>, vector<336x128xf32>
    tpu.vector_store %arg8[%c0, %c0_0], %3 {strides = array<i32>} : memref<336x128xf32, #tpu.memory_space<vmem>>, vector<336x128xf32>,
    %c0_i32_1 = arith.constant 0 : i32
    %5 = tpu.memref_slice %arg2[%1, %c0_i32_1] : memref<712x128xbf16, #tpu.memory_space<any>> -> memref<376x128xbf16, #tpu.memory_space<any>>
    tpu.wait_dma2 semaphore(%arg9 : memref<!tpu.dma_semaphore, #tpu.memory_space<semaphore_mem>>) src(%5 : memref<376x128xbf16, #tpu.memory_space<any>>) dst(%arg7 : memref<376x128xbf16, #tpu.memory_space<vmem>>)
    %c0_2 = arith.constant 0 : index
    %c0_3 = arith.constant 0 : index
    %6 = vector.load %arg8[%c0_2, %c0_3] : memref<336x128xf32, #tpu.memory_space<vmem>>, vector<336x128xf32>
    %c0_4 = arith.constant 0 : index
    %c0_5 = arith.constant 0 : index
    %7 = vector.load %arg7[%c0_4, %c0_5] : memref<376x128xbf16, #tpu.memory_space<vmem>>, vector<336x128xbf16>
    %c0_6 = arith.constant 0 : index
    %c0_7 = arith.constant 0 : index
    %c0_8 = arith.constant 0 : index
    %8 = vector.load %arg3[%c0_6, %c0_7, %c0_8] : memref<9x128x128xbf16, #tpu.memory_space<vmem>>, vector<1x128x128xbf16>
    %9 = vector.shape_cast %8 : vector<1x128x128xbf16> to vector<128x128xbf16>
    %cst_9 = arith.constant dense<0.000000e+00> : vector<336x128xf32>
    %10 = tpu.matmul %7, %9, %cst_9 {dimension_numbers = #tpu.dot_dimension_numbers<[1], [0], [0], [1], [0, 0, 1, 1], [], []>} : vector<336x128xbf16>, vector<128x128xbf16>, vector<336x128xf32> -> vector<336x128xf32>
    %11 = arith.addf %6, %10 : vector<336x128xf32>
    %c0_10 = arith.constant 0 : index
    %c0_11 = arith.constant 0 : index
    %12 = vector.load %arg8[%c0_10, %c0_11] : memref<336x128xf32, #tpu.memory_space<vmem>>, vector<336x128xf32>
    tpu.vector_store %arg8[%c0_10, %c0_11], %11 {strides = array<i32>} : memref<336x128xf32, #tpu.memory_space<vmem>>, vector<336x128xf32>,
    %c0_12 = arith.constant 0 : index
    %c0_13 = arith.constant 0 : index
    %13 = vector.load %arg8[%c0_12, %c0_13] : memref<336x128xf32, #tpu.memory_space<vmem>>, vector<336x128xf32>
    %c1 = arith.constant 1 : index
    %c0_14 = arith.constant 0 : index
    %14 = vector.load %arg7[%c1, %c0_14] : memref<376x128xbf16, #tpu.memory_space<vmem>>, vector<336x128xbf16>
    %c1_15 = arith.constant 1 : index
    %c0_16 = arith.constant 0 : index
    %c0_17 = arith.constant 0 : index
    %15 = vector.load %arg3[%c1_15, %c0_16, %c0_17] : memref<9x128x128xbf16, #tpu.memory_space<vmem>>, vector<1x128x128xbf16>
    %16 = vector.shape_cast %15 : vector<1x128x128xbf16> to vector<128x128xbf16>
    %cst_18 = arith.constant dense<0.000000e+00> : vector<336x128xf32>
    %17 = tpu.matmul %14, %16, %cst_18 {dimension_numbers = #tpu.dot_dimension_numbers<[1], [0], [0], [1], [0, 0, 1, 1], [], []>} : vector<336x128xbf16>, vector<128x128xbf16>, vector<336x128xf32> -> vector<336x128xf32>
    %18 = arith.addf %13, %17 : vector<336x128xf32>
    %c0_19 = arith.constant 0 : index
    %c0_20 = arith.constant 0 : index
    %19 = vector.load %arg8[%c0_19, %c0_20] : memref<336x128xf32, #tpu.memory_space<vmem>>, vector<336x128xf32>
    tpu.vector_store %arg8[%c0_19, %c0_20], %18 {strides = array<i32>} : memref<336x128xf32, #tpu.memory_space<vmem>>, vector<336x128xf32>,
    %c0_21 = arith.constant 0 : index
    %c0_22 = arith.constant 0 : index
    %20 = vector.load %arg8[%c0_21, %c0_22] : memref<336x128xf32, #tpu.memory_space<vmem>>, vector<336x128xf32>
    %c2 = arith.constant 2 : index
    %c0_23 = arith.constant 0 : index
    %21 = vector.load %arg7[%c2, %c0_23] : memref<376x128xbf16, #tpu.memory_space<vmem>>, vector<336x128xbf16>
    %c2_24 = arith.constant 2 : index
    %c0_25 = arith.constant 0 : index
    %c0_26 = arith.constant 0 : index
    %22 = vector.load %arg3[%c2_24, %c0_25, %c0_26] : memref<9x128x128xbf16, #tpu.memory_space<vmem>>, vector<1x128x128xbf16>
    %23 = vector.shape_cast %22 : vector<1x128x128xbf16> to vector<128x128xbf16>
    %cst_27 = arith.constant dense<0.000000e+00> : vector<336x128xf32>
    %24 = tpu.matmul %21, %23, %cst_27 {dimension_numbers = #tpu.dot_dimension_numbers<[1], [0], [0], [1], [0, 0, 1, 1], [], []>} : vector<336x128xbf16>, vector<128x128xbf16>, vector<336x128xf32> -> vector<336x128xf32>
    %25 = arith.addf %20, %24 : vector<336x128xf32>
    %c0_28 = arith.constant 0 : index
    %c0_29 = arith.constant 0 : index
    %26 = vector.load %arg8[%c0_28, %c0_29] : memref<336x128xf32, #tpu.memory_space<vmem>>, vector<336x128xf32>
    tpu.vector_store %arg8[%c0_28, %c0_29], %25 {strides = array<i32>} : memref<336x128xf32, #tpu.memory_space<vmem>>, vector<336x128xf32>,
    %c0_30 = arith.constant 0 : index
    %c0_31 = arith.constant 0 : index
    %27 = vector.load %arg8[%c0_30, %c0_31] : memref<336x128xf32, #tpu.memory_space<vmem>>, vector<336x128xf32>
    %c18 = arith.constant 18 : index
    %c0_32 = arith.constant 0 : index
    %28 = vector.load %arg7[%c18, %c0_32] : memref<376x128xbf16, #tpu.memory_space<vmem>>, vector<336x128xbf16>
    %c3 = arith.constant 3 : index
    %c0_33 = arith.constant 0 : index
    %c0_34 = arith.constant 0 : index
    %29 = vector.load %arg3[%c3, %c0_33, %c0_34] : memref<9x128x128xbf16, #tpu.memory_space<vmem>>, vector<1x128x128xbf16>
    %30 = vector.shape_cast %29 : vector<1x128x128xbf16> to vector<128x128xbf16>
    %cst_35 = arith.constant dense<0.000000e+00> : vector<336x128xf32>
    %31 = tpu.matmul %28, %30, %cst_35 {dimension_numbers = #tpu.dot_dimension_numbers<[1], [0], [0], [1], [0, 0, 1, 1], [], []>} : vector<336x128xbf16>, vector<128x128xbf16>, vector<336x128xf32> -> vector<336x128xf32>
    %32 = arith.addf %27, %31 : vector<336x128xf32>
    %c0_36 = arith.constant 0 : index
    %c0_37 = arith.constant 0 : index
    %33 = vector.load %arg8[%c0_36, %c0_37] : memref<336x128xf32, #tpu.memory_space<vmem>>, vector<336x128xf32>
    tpu.vector_store %arg8[%c0_36, %c0_37], %32 {strides = array<i32>} : memref<336x128xf32, #tpu.memory_space<vmem>>, vector<336x128xf32>,
    %c0_38 = arith.constant 0 : index
    %c0_39 = arith.constant 0 : index
    %34 = vector.load %arg8[%c0_38, %c0_39] : memref<336x128xf32, #tpu.memory_space<vmem>>, vector<336x128xf32>
    %c19 = arith.constant 19 : index
    %c0_40 = arith.constant 0 : index
    %35 = vector.load %arg7[%c19, %c0_40] : memref<376x128xbf16, #tpu.memory_space<vmem>>, vector<336x128xbf16>
    %c4 = arith.constant 4 : index
    %c0_41 = arith.constant 0 : index
    %c0_42 = arith.constant 0 : index
    %36 = vector.load %arg3[%c4, %c0_41, %c0_42] : memref<9x128x128xbf16, #tpu.memory_space<vmem>>, vector<1x128x128xbf16>
    %37 = vector.shape_cast %36 : vector<1x128x128xbf16> to vector<128x128xbf16>
    %cst_43 = arith.constant dense<0.000000e+00> : vector<336x128xf32>
    %38 = tpu.matmul %35, %37, %cst_43 {dimension_numbers = #tpu.dot_dimension_numbers<[1], [0], [0], [1], [0, 0, 1, 1], [], []>} : vector<336x128xbf16>, vector<128x128xbf16>, vector<336x128xf32> -> vector<336x128xf32>
    %39 = arith.addf %34, %38 : vector<336x128xf32>
    %c0_44 = arith.constant 0 : index
    %c0_45 = arith.constant 0 : index
    %40 = vector.load %arg8[%c0_44, %c0_45] : memref<336x128xf32, #tpu.memory_space<vmem>>, vector<336x128xf32>
    tpu.vector_store %arg8[%c0_44, %c0_45], %39 {strides = array<i32>} : memref<336x128xf32, #tpu.memory_space<vmem>>, vector<336x128xf32>,
    %c0_46 = arith.constant 0 : index
    %c0_47 = arith.constant 0 : index
    %41 = vector.load %arg8[%c0_46, %c0_47] : memref<336x128xf32, #tpu.memory_space<vmem>>, vector<336x128xf32>
    %c20 = arith.constant 20 : index
    %c0_48 = arith.constant 0 : index
    %42 = vector.load %arg7[%c20, %c0_48] : memref<376x128xbf16, #tpu.memory_space<vmem>>, vector<336x128xbf16>
    %c5 = arith.constant 5 : index
    %c0_49 = arith.constant 0 : index
    %c0_50 = arith.constant 0 : index
    %43 = vector.load %arg3[%c5, %c0_49, %c0_50] : memref<9x128x128xbf16, #tpu.memory_space<vmem>>, vector<1x128x128xbf16>
    %44 = vector.shape_cast %43 : vector<1x128x128xbf16> to vector<128x128xbf16>
    %cst_51 = arith.constant dense<0.000000e+00> : vector<336x128xf32>
    %45 = tpu.matmul %42, %44, %cst_51 {dimension_numbers = #tpu.dot_dimension_numbers<[1], [0], [0], [1], [0, 0, 1, 1], [], []>} : vector<336x128xbf16>, vector<128x128xbf16>, vector<336x128xf32> -> vector<336x128xf32>
    %46 = arith.addf %41, %45 : vector<336x128xf32>
    %c0_52 = arith.constant 0 : index
    %c0_53 = arith.constant 0 : index
    %47 = vector.load %arg8[%c0_52, %c0_53] : memref<336x128xf32, #tpu.memory_space<vmem>>, vector<336x128xf32>
    tpu.vector_store %arg8[%c0_52, %c0_53], %46 {strides = array<i32>} : memref<336x128xf32, #tpu.memory_space<vmem>>, vector<336x128xf32>,
    %c0_54 = arith.constant 0 : index
    %c0_55 = arith.constant 0 : index
    %48 = vector.load %arg8[%c0_54, %c0_55] : memref<336x128xf32, #tpu.memory_space<vmem>>, vector<336x128xf32>
    %c36 = arith.constant 36 : index
    %c0_56 = arith.constant 0 : index
    %49 = vector.load %arg7[%c36, %c0_56] : memref<376x128xbf16, #tpu.memory_space<vmem>>, vector<336x128xbf16>
    %c6 = arith.constant 6 : index
    %c0_57 = arith.constant 0 : index
    %c0_58 = arith.constant 0 : index
    %50 = vector.load %arg3[%c6, %c0_57, %c0_58] : memref<9x128x128xbf16, #tpu.memory_space<vmem>>, vector<1x128x128xbf16>
    %51 = vector.shape_cast %50 : vector<1x128x128xbf16> to vector<128x128xbf16>
    %cst_59 = arith.constant dense<0.000000e+00> : vector<336x128xf32>
    %52 = tpu.matmul %49, %51, %cst_59 {dimension_numbers = #tpu.dot_dimension_numbers<[1], [0], [0], [1], [0, 0, 1, 1], [], []>} : vector<336x128xbf16>, vector<128x128xbf16>, vector<336x128xf32> -> vector<336x128xf32>
    %53 = arith.addf %48, %52 : vector<336x128xf32>
    %c0_60 = arith.constant 0 : index
    %c0_61 = arith.constant 0 : index
    %54 = vector.load %arg8[%c0_60, %c0_61] : memref<336x128xf32, #tpu.memory_space<vmem>>, vector<336x128xf32>
    tpu.vector_store %arg8[%c0_60, %c0_61], %53 {strides = array<i32>} : memref<336x128xf32, #tpu.memory_space<vmem>>, vector<336x128xf32>,
    %c0_62 = arith.constant 0 : index
    %c0_63 = arith.constant 0 : index
    %55 = vector.load %arg8[%c0_62, %c0_63] : memref<336x128xf32, #tpu.memory_space<vmem>>, vector<336x128xf32>
    %c37 = arith.constant 37 : index
    %c0_64 = arith.constant 0 : index
    %56 = vector.load %arg7[%c37, %c0_64] : memref<376x128xbf16, #tpu.memory_space<vmem>>, vector<336x128xbf16>
    %c7 = arith.constant 7 : index
    %c0_65 = arith.constant 0 : index
    %c0_66 = arith.constant 0 : index
    %57 = vector.load %arg3[%c7, %c0_65, %c0_66] : memref<9x128x128xbf16, #tpu.memory_space<vmem>>, vector<1x128x128xbf16>
    %58 = vector.shape_cast %57 : vector<1x128x128xbf16> to vector<128x128xbf16>
    %cst_67 = arith.constant dense<0.000000e+00> : vector<336x128xf32>
    %59 = tpu.matmul %56, %58, %cst_67 {dimension_numbers = #tpu.dot_dimension_numbers<[1], [0], [0], [1], [0, 0, 1, 1], [], []>} : vector<336x128xbf16>, vector<128x128xbf16>, vector<336x128xf32> -> vector<336x128xf32>
    %60 = arith.addf %55, %59 : vector<336x128xf32>
    %c0_68 = arith.constant 0 : index
    %c0_69 = arith.constant 0 : index
    %61 = vector.load %arg8[%c0_68, %c0_69] : memref<336x128xf32, #tpu.memory_space<vmem>>, vector<336x128xf32>
    tpu.vector_store %arg8[%c0_68, %c0_69], %60 {strides = array<i32>} : memref<336x128xf32, #tpu.memory_space<vmem>>, vector<336x128xf32>,
    %c0_70 = arith.constant 0 : index
    %c0_71 = arith.constant 0 : index
    %62 = vector.load %arg8[%c0_70, %c0_71] : memref<336x128xf32, #tpu.memory_space<vmem>>, vector<336x128xf32>
    %c38 = arith.constant 38 : index
    %c0_72 = arith.constant 0 : index
    %63 = vector.load %arg7[%c38, %c0_72] : memref<376x128xbf16, #tpu.memory_space<vmem>>, vector<336x128xbf16>
    %c8 = arith.constant 8 : index
    %c0_73 = arith.constant 0 : index
    %c0_74 = arith.constant 0 : index
    %64 = vector.load %arg3[%c8, %c0_73, %c0_74] : memref<9x128x128xbf16, #tpu.memory_space<vmem>>, vector<1x128x128xbf16>
    %65 = vector.shape_cast %64 : vector<1x128x128xbf16> to vector<128x128xbf16>
    %cst_75 = arith.constant dense<0.000000e+00> : vector<336x128xf32>
    %66 = tpu.matmul %63, %65, %cst_75 {dimension_numbers = #tpu.dot_dimension_numbers<[1], [0], [0], [1], [0, 0, 1, 1], [], []>} : vector<336x128xbf16>, vector<128x128xbf16>, vector<336x128xf32> -> vector<336x128xf32>
    %67 = arith.addf %62, %66 : vector<336x128xf32>
    %c0_76 = arith.constant 0 : index
    %c0_77 = arith.constant 0 : index
    %68 = vector.load %arg8[%c0_76, %c0_77] : memref<336x128xf32, #tpu.memory_space<vmem>>, vector<336x128xf32>
    tpu.vector_store %arg8[%c0_76, %c0_77], %67 {strides = array<i32>} : memref<336x128xf32, #tpu.memory_space<vmem>>, vector<336x128xf32>,
    %c0_78 = arith.constant 0 : index
    %c0_79 = arith.constant 0 : index
    %69 = vector.load %arg8[%c0_78, %c0_79] : memref<336x128xf32, #tpu.memory_space<vmem>>, vector<336x128xf32>
    %c0_80 = arith.constant 0 : index
    %c0_81 = arith.constant 0 : index
    %70 = vector.load %arg4[%c0_80, %c0_81] : memref<1x128xf32, #tpu.memory_space<vmem>>, vector<1x128xf32>
    %71 = vector.broadcast %70 : vector<1x128xf32> to vector<336x128xf32>
    %72 = arith.mulf %69, %71 : vector<336x128xf32>
    %c0_82 = arith.constant 0 : index
    %c0_83 = arith.constant 0 : index
    %73 = vector.load %arg5[%c0_82, %c0_83] : memref<1x128xf32, #tpu.memory_space<vmem>>, vector<1x128xf32>
    %74 = vector.broadcast %73 : vector<1x128xf32> to vector<336x128xf32>
    %75 = arith.addf %72, %74 : vector<336x128xf32>
    %c19_84 = arith.constant 19 : index
    %c0_85 = arith.constant 0 : index
    %76 = vector.load %arg7[%c19_84, %c0_85] : memref<376x128xbf16, #tpu.memory_space<vmem>>, vector<336x128xbf16>
    %77 = arith.extf %76 : vector<336x128xbf16> to vector<336x128xf32>
    %78 = arith.addf %75, %77 : vector<336x128xf32>
    %cst_86 = arith.constant 0.000000e+00 : f32
    %79 = vector.broadcast %cst_86 : f32 to vector<336x128xf32>
    %80 = arith.maximumf %78, %79 : vector<336x128xf32>
    %81 = arith.truncf %80 : vector<336x128xf32> to vector<336x128xbf16>
    %c0_87 = arith.constant 0 : index
    %c0_88 = arith.constant 0 : index
    %82 = vector.load %arg6[%c0_87, %c0_88] : memref<336x128xbf16, #tpu.memory_space<vmem>>, vector<336x128xbf16>
    tpu.vector_store %arg6[%c0_87, %c0_88], %81 {strides = array<i32>} : memref<336x128xbf16, #tpu.memory_space<vmem>>, vector<336x128xbf16>,
    return
  }
  func.func @transform_1(%arg0: i32, %arg1: i32) -> (i32, i32, i32) {
    %c0_i32 = arith.constant 0 : i32
    %c0_i32_0 = arith.constant 0 : i32
    %c0_i32_1 = arith.constant 0 : i32
    return %c0_i32, %c0_i32_0, %arg0 : i32, i32, i32
  }
  func.func @transform_2(%arg0: i32, %arg1: i32) -> (i32, i32) {
    %c0_i32 = arith.constant 0 : i32
    %c0_i32_0 = arith.constant 0 : i32
    return %c0_i32, %arg0 : i32, i32
  }
  func.func @transform_3(%arg0: i32, %arg1: i32) -> (i32, i32) {
    %c0_i32 = arith.constant 0 : i32
    %c0_i32_0 = arith.constant 0 : i32
    return %c0_i32, %arg0 : i32, i32
  }
  func.func @transform_4(%arg0: i32, %arg1: i32) -> (i32, i32) {
    %c0_i32 = arith.constant 0 : i32
    return %arg1, %arg0 : i32, i32
  }
}

</mosaic_0001>

<bundles_post_ra>
// kernel: conv2d_block.1
= control target key start
LH: loop header
LB: loop body
LE: loop exit
PB: predicated region body
PF: predicated region fallthrough
CT: control target
= control target key end

     0   :  { %s7869_s15 = smov 0   ;;  %s7871_s16 = smov 0   ;;  %s9289_s0 = inlined_call_operand.vmem [shape: bf16[712,128], index: 0, kind: input, shape index: {}]   ;;  %s9290_s1 = inlined_call_operand.vmem [shape: bf16[9,128,128], index: 1, kind: input, shape index: {}]   ;;  %s9291_s2 = inlined_call_operand.vmem [shape: f32[1,128], index: 2, kind: input, shape index: {}]   ;;  %s9292_s3 = inlined_call_operand.vmem [shape: f32[1,128], index: 3, kind: input, shape index: {}]   ;;  %s9293_s4 = inlined_call_operand.vmem [shape: bf16[672,128], index: 4, kind: output, shape index: {}]  }
   0x1   :  { %s7873_s17 = smov 0  }
   0x2 LB: > { %s23_s18 = sadd.s32 1, %s7838_s16  ;;  %p6101_p0 = scmp.ge.s32.totalorder %s7842_s17, 1  ;;  %s7842_s17 = sphi %s7873_s17, %s14_s17   ;;  %s7838_s16 = sphi %s7871_s16, %s9353_s16   ;;  %s7834_s15 = sphi %s7869_s15, %s9352_s15  }
   0x3   : > { %p24_p1 = scmp.ge.s32.totalorder %s23_s18, 2  ;;  %p167_p2 = scmp.lt.s32.totalorder %s7842_s17, 3 }
   0x5   : > { %s9355_s18 = smov (%p24_p1, %s23_s18), 0  ;;  %p168_p3 = pnand %p6101_p0, %p167_p2 }
   0x7   : > { %171 = sbr.rel (%p168_p3) target bundleno = 986 (0x3da), region = 32 }
   0xc   : > { %s209_s19 = smul.u32 42, %s7834_s15 }
   0xd   : > { %s218_s20 = smul.u32 336, %s7834_s15 }
   0xe   : > { %p210_p4 = scmp.lt.s32.totalorder %s209_s19, 83 }
   0xf   : > { %s219_s21 = sshra.s32 %s218_s20, 3 }
  0x10   : > { %s9357_s19 = smov (!%p210_p4, %s209_s19), 83  ;;  %s6103_s22 = sshll.u32 %s219_s21, 2 }
  0x11   : > { %s6102_s23 = sshll.u32 %s9357_s19, 2  ;;  %s7890_s26 = scalar_lea.vmem %s9289_s0, %s6103_s22 }
  0x12   : > { %s7895_s29 = scalar_lea.vmem %s9293_s4, %s6102_s23  ;;  %v235_v0 = vld [vmem:[%s7890_s26] sm:$0xff]  ;;  %v237_v1 = vld [vmem:[%s7890_s26 + $0x8] sm:$0xff]  ;;  %v239_v2 = vld [vmem:[%s7890_s26 + $0x10] sm:$0xff] }
  0x13   : > { %236 = vst [vmem:[#allocation2] sm:$0xff] %v235_v0  ;;  %v241_v3 = vld [vmem:[%s7890_s26 + $0x18] sm:$0xff]  ;;  %v243_v4 = vld [vmem:[%s7890_s26 + $0x20] sm:$0xff]  ;;  %v245_v5 = vld [vmem:[%s7890_s26 + $0x28] sm:$0xff] }
  0x14   : > { %238 = vst [vmem:[#allocation2 + $0x8] sm:$0xff] %v237_v1  ;;  %v247_v6 = vld [vmem:[%s7890_s26 + $0x30] sm:$0xff]  ;;  %v249_v7 = vld [vmem:[%s7890_s26 + $0x38] sm:$0xff]  ;;  %v251_v8 = vld [vmem:[%s7890_s26 + $0x40] sm:$0xff] }
  0x15   : > { %240 = vst [vmem:[#allocation2 + $0x10] sm:$0xff] %v239_v2  ;;  %v253_v9 = vld [vmem:[%s7890_s26 + $0x48] sm:$0xff]  ;;  %v255_v10 = vld [vmem:[%s7890_s26 + $0x50] sm:$0xff]  ;;  %v257_v11 = vld [vmem:[%s7890_s26 + $0x58] sm:$0xff] }
  0x16   : > { %242 = vst [vmem:[#allocation2 + $0x18] sm:$0xff] %v241_v3  ;;  %v259_v12 = vld [vmem:[%s7890_s26 + $0x60] sm:$0xff]  ;;  %v261_v13 = vld [vmem:[%s7890_s26 + $0x68] sm:$0xff]  ;;  %v263_v14 = vld [vmem:[%s7890_s26 + $0x70] sm:$0xff] }
  0x17   : > { %244 = vst [vmem:[#allocation2 + $0x20] sm:$0xff] %v243_v4  ;;  %v265_v15 = vld [vmem:[%s7890_s26 + $0x78] sm:$0xff]  ;;  %v267_v16 = vld [vmem:[%s7890_s26 + $0x80] sm:$0xff]  ;;  %v269_v17 = vld [vmem:[%s7890_s26 + $0x88] sm:$0xff] }
  0x18   : > { %246 = vst [vmem:[#allocation2 + $0x28] sm:$0xff] %v245_v5  ;;  %v271_v18 = vld [vmem:[%s7890_s26 + $0x90] sm:$0xff]  ;;  %v273_v19 = vld [vmem:[%s7890_s26 + $0x98] sm:$0xff]  ;;  %v275_v20 = vld [vmem:[%s7890_s26 + $0xa0] sm:$0xff] }
  0x19   : > { %248 = vst [vmem:[#allocation2 + $0x30] sm:$0xff] %v247_v6  ;;  %v277_v21 = vld [vmem:[%s7890_s26 + $0xa8] sm:$0xff]  ;;  %v279_v22 = vld [vmem:[%s7890_s26 + $0xb0] sm:$0xff]  ;;  %v6104_v23 = vld [vmem:[%s7890_s26 + $0xb8] sm:$0xf] }
  0x1a   : > { %250 = vst [vmem:[#allocation2 + $0x38] sm:$0xff] %v249_v7 }
  0x1b   : > { %252 = vst [vmem:[#allocation2 + $0x40] sm:$0xff] %v251_v8 }
  0x1c   : > { %254 = vst [vmem:[#allocation2 + $0x48] sm:$0xff] %v253_v9 }
  0x1d   : > { %256 = vst [vmem:[#allocation2 + $0x50] sm:$0xff] %v255_v10 }
  0x1e   : > { %258 = vst [vmem:[#allocation2 + $0x58] sm:$0xff] %v257_v11 }
  0x1f   : > { %260 = vst [vmem:[#allocation2 + $0x60] sm:$0xff] %v259_v12 }
  0x20   : > { %262 = vst [vmem:[#allocation2 + $0x68] sm:$0xff] %v261_v13 }
  0x21   : > { %264 = vst [vmem:[#allocation2 + $0x70] sm:$0xff] %v263_v14 }
  0x22   : > { %266 = vst [vmem:[#allocation2 + $0x78] sm:$0xff] %v265_v15 }
  0x23   : > { %268 = vst [vmem:[#allocation2 + $0x80] sm:$0xff] %v267_v16 }
  0x24   : > { %270 = vst [vmem:[#allocation2 + $0x88] sm:$0xff] %v269_v17 }
  0x25   : > { %272 = vst [vmem:[#allocation2 + $0x90] sm:$0xff] %v271_v18 }
  0x26   : > { %274 = vst [vmem:[#allocation2 + $0x98] sm:$0xff] %v273_v19 }
  0x27   : > { %276 = vst [vmem:[#allocation2 + $0xa0] sm:$0xff] %v275_v20 }
  0x28   : > { %278 = vst [vmem:[#allocation2 + $0xa8] sm:$0xff] %v277_v21 }
  0x29   : > { %280 = vst [vmem:[#allocation2 + $0xb0] sm:$0xff] %v279_v22 }
  0x2a   : > { %292 = vst [vmem:[#allocation2 + $0xb8] sm:$0xf] %v6104_v23 }
  0x2b   : > { %296 = vsyncadd [#allocation4], 3008 }
  0x2c   : > { %7830 = dma.done.wait [#allocation4], 3008 }
  0x2d   : > { %7831 = vsyncadd [#allocation4], 4294964288  ;;  %v7308_v24 = vld [vmem:[%s9290_s1 + $0x38] sm:$0xff]  ;;  %v7307_v25 = vld [vmem:[%s9290_s1 + $0x30] sm:$0xff]  ;;  %vm1675_vm0 = vcmask 1046528   ;;  %vm3391_vm4 = vcmask 1045504  }
  0x2e   : > { %7766 = vmatpush.bf16.msra.mxu1 %v7308_v24  ;;  %7767 = vmatpush.bf16.msra.mxu2 %v7308_v24  ;;  %v7306_v26 = vld [vmem:[%s9290_s1 + $0x28] sm:$0xff]  ;;  %v7305_v27 = vld [vmem:[%s9290_s1 + $0x20] sm:$0xff]  ;;  %v7304_v28 = vld [vmem:[%s9290_s1 + $0x18] sm:$0xff]  ;;  %vm1025_vm1 = vsmask.f32 7424  ;;  %vm5107_vm5 = vcmask 1044480  }
  0x2f   : > { %617 = vmatpush.bf16.msra.mxu0 %v7308_v24  ;;  %7768 = vmatpush.bf16.msra.mxu3 %v7308_v24  ;;  %v7303_v29 = vld [vmem:[%s9290_s1 + $0x10] sm:$0xff]  ;;  %v7302_v30 = vld [vmem:[%s9290_s1 + $0x8] sm:$0xff]  ;;  %v7301_v31 = vld [vmem:[%s9290_s1] sm:$0xff]  ;;  %vm2716_vm2 = vsmask.f32 6400 }
  0x30   : > { %v7366_v32 = vld [vmem:[%s9290_s1 + $0xb8] sm:$0xff]  ;;  %v7286_v35 = vld [vmem:[#allocation2 + $0x30] sm:$0xff]  ;;  %v7292_v36 = vld [vmem:[#allocation2 + $0x60] sm:$0xff]  ;;  %vm4432_vm3 = vsmask.f32 5376 }
  0x31   : > { %v7337_v33 = vld [vmem:[%s9290_s1 + $0x78] sm:$0xff]  ;;  %v7280_v37 = vld [vmem:[#allocation2] sm:$0xff]  ;;  %v7365_v38 = vld [vmem:[%s9290_s1 + $0xb0] sm:$0xff] }
  0x32   : > { %7769 = vmatpush.bf16.msra.mxu1 %v7307_v25  ;;  %7770 = vmatpush.bf16.msra.mxu2 %v7307_v25  ;;  %v7424_v34 = vld [vmem:[%s9290_s1 + $0x138] sm:$0xff]  ;;  %v7336_v39 = vld [vmem:[%s9290_s1 + $0x70] sm:$0xff]  ;;  %v7364_v41 = vld [vmem:[%s9290_s1 + $0xa8] sm:$0xff] }
  0x33   : > { %618 = vmatpush.bf16.msra.mxu0 %v7307_v25  ;;  %7771 = vmatpush.bf16.msra.mxu3 %v7307_v25  ;;  %v7423_v40 = vld [vmem:[%s9290_s1 + $0x130] sm:$0xff]  ;;  %v7335_v43 = vld [vmem:[%s9290_s1 + $0x68] sm:$0xff]  ;;  %v7363_v45 = vld [vmem:[%s9290_s1 + $0xa0] sm:$0xff] }
  0x34   : > { %v7298_v42 = vld [vmem:[#allocation2 + $0x90] sm:$0xff]  ;;  %v7422_v44 = vld [vmem:[%s9290_s1 + $0x128] sm:$0xff]  ;;  %v7334_v46 = vld [vmem:[%s9290_s1 + $0x60] sm:$0xff] }
  0x35   : > { %v7421_v47 = vld [vmem:[%s9290_s1 + $0x120] sm:$0xff]  ;;  %v7287_v48 = vld [vmem:[#allocation2 + $0x38] sm:$0xff]  ;;  %v7293_v49 = vld [vmem:[#allocation2 + $0x68] sm:$0xff] }
  0x36   : > { %7772 = vmatpush.bf16.msra.mxu1 %v7306_v26  ;;  %7773 = vmatpush.bf16.msra.mxu2 %v7306_v26  ;;  %v7281_v50 = vld [vmem:[#allocation2 + $0x8] sm:$0xff]  ;;  %v7362_v51 = vld [vmem:[%s9290_s1 + $0x98] sm:$0xff]  ;;  %v7361_v56 = vld [vmem:[%s9290_s1 + $0x90] sm:$0xff] }
  0x37   : > { %619 = vmatpush.bf16.msra.mxu0 %v7306_v26  ;;  %7774 = vmatpush.bf16.msra.mxu3 %v7306_v26  ;;  %v7395_v52 = vld [vmem:[%s9290_s1 + $0xf8] sm:$0xff]  ;;  %v7394_v57 = vld [vmem:[%s9290_s1 + $0xf0] sm:$0xff]  ;;  %v7393_v58 = vld [vmem:[%s9290_s1 + $0xe8] sm:$0xff] }
  0x38   : > { %v7333_v53 = vld [vmem:[%s9290_s1 + $0x58] sm:$0xff]  ;;  %v7288_v59 = vld [vmem:[#allocation2 + $0x40] sm:$0xff]  ;;  %v7294_v60 = vld [vmem:[#allocation2 + $0x70] sm:$0xff] }
  0x39   : > { %v7299_v54 = vld [vmem:[#allocation2 + $0x98] sm:$0xff]  ;;  %v7282_v61 = vld [vmem:[#allocation2 + $0x10] sm:$0xff]  ;;  %v7392_v63 = vld [vmem:[%s9290_s1 + $0xe0] sm:$0xff] }
  0x3a   : > { %7775 = vmatpush.bf16.msra.mxu1 %v7305_v27  ;;  %7776 = vmatpush.bf16.msra.mxu2 %v7305_v27  ;;  %v7420_v55 = vld [vmem:[%s9290_s1 + $0x118] sm:$0xff]  ;;  %v7332_v62 = vld [vmem:[%s9290_s1 + $0x50] sm:$0xff]  ;;  %v7360_v1 = vld [vmem:[%s9290_s1 + $0x88] sm:$0xff] }
  0x3b   : > { %620 = vmatpush.bf16.msra.mxu0 %v7305_v27  ;;  %7777 = vmatpush.bf16.msra.mxu3 %v7305_v27  ;;  %v7419_v0 = vld [vmem:[%s9290_s1 + $0x110] sm:$0xff]  ;;  %v7300_v2 = vld [vmem:[#allocation2 + $0xa0] sm:$0xff]  ;;  %v7331_v3 = vld [vmem:[%s9290_s1 + $0x48] sm:$0xff] }
  0x3c   : > { %v7391_v4 = vld [vmem:[%s9290_s1 + $0xd8] sm:$0xff]  ;;  %v7390_v5 = vld [vmem:[%s9290_s1 + $0xd0] sm:$0xff]  ;;  %v7289_v6 = vld [vmem:[#allocation2 + $0x48] sm:$0xff] }
  0x3d   : > { %v7295_v7 = vld [vmem:[#allocation2 + $0x78] sm:$0xff]  ;;  %v7418_v9 = vld [vmem:[%s9290_s1 + $0x108] sm:$0xff]  ;;  %v7359_v11 = vld [vmem:[%s9290_s1 + $0x80] sm:$0xff] }
  0x3e   : > { %7778 = vmatpush.bf16.msra.mxu1 %v7304_v28  ;;  %7779 = vmatpush.bf16.msra.mxu2 %v7304_v28  ;;  %v7283_v8 = vld [vmem:[#allocation2 + $0x18] sm:$0xff]  ;;  %v7389_v10 = vld [vmem:[%s9290_s1 + $0xc8] sm:$0xff]  ;;  %v7388_v12 = vld [vmem:[%s9290_s1 + $0xc0] sm:$0xff] }
  0x3f   : > { %621 = vmatpush.bf16.msra.mxu0 %v7304_v28  ;;  %7780 = vmatpush.bf16.msra.mxu3 %v7304_v28  ;;  %v7330_v13 = vld [vmem:[%s9290_s1 + $0x40] sm:$0xff]  ;;  %v6503_v14 = vld [vmem:[#allocation2 + $0x8] sm:$0xe]  ;;  %v7367_v15 = vld [vmem:[#allocation2 + $0x8] sm:$0xf0] }
  0x40   : > { %v7368_v16 = vld [vmem:[#allocation2 + $0x10] sm:$0xff]  ;;  %v7417_v17 = vld [vmem:[%s9290_s1 + $0x100] sm:$0xff]  ;;  %v6504_v18 = vor.u32 %v7367_v15, %v6503_v14  ;;  %v7482_v25 = vld [vmem:[%s9290_s1 + $0x1b8] sm:$0xff] }
  0x41   : > { %v2197_v19 = vrot.slane %v7368_v16, 1  ;;  %v7290_v22 = vld [vmem:[#allocation2 + $0x50] sm:$0xff]  ;;  %v7296_v23 = vld [vmem:[#allocation2 + $0x80] sm:$0xff]  ;;  %v7511_v26 = vld [vmem:[%s9290_s1 + $0x1f8] sm:$0xff] }
  0x42   : > { %7781 = vmatpush.bf16.msra.mxu1 %v7303_v29  ;;  %7782 = vmatpush.bf16.msra.mxu2 %v7303_v29  ;;  %v2196_v20 = vrot.slane %v6504_v18, 1  ;;  %v7284_v24 = vld [vmem:[#allocation2 + $0x20] sm:$0xff]  ;;  %v7453_v27 = vld [vmem:[%s9290_s1 + $0x178] sm:$0xff]  ;;  %v7481_v15 = vld [vmem:[%s9290_s1 + $0x1b0] sm:$0xff] }
  0x43   : > { %622 = vmatpush.bf16.msra.mxu0 %v7303_v29  ;;  %7783 = vmatpush.bf16.msra.mxu3 %v7303_v29  ;;  %v7369_v28 = vld [vmem:[#allocation2 + $0x18] sm:$0xff] }
  0x44   : > { %v2198_v21 = vsel %vm1675_vm0, %v2196_v20, %v2197_v19  ;;  %v7540_v29 = vld [vmem:[%s9290_s1 + $0x238] sm:$0xff] }
  0x46   : > { %7784 = vmatpush.bf16.msra.mxu1 %v7302_v30  ;;  %7785 = vmatpush.bf16.msra.mxu2 %v7302_v30 }
  0x47   : > { %623 = vmatpush.bf16.msra.mxu0 %v7302_v30  ;;  %7786 = vmatpush.bf16.msra.mxu3 %v7302_v30  ;;  %v2199_v30 = vrot.slane %v7369_v28, 1  ;;  %v7312_v28 = vld [vmem:[#allocation2 + $0x18] sm:$0xff] }
  0x4a   : > { %7787 = vmatpush.bf16.msra.mxu1 %v7301_v31  ;;  %7788 = vmatpush.bf16.msra.mxu2 %v7301_v31 }
  0x4b   : > { %624 = vmatpush.bf16.msra.mxu0 %v7301_v31  ;;  %7789 = vmatpush.bf16.msra.mxu3 %v7301_v31  ;;  %v2200_v31 = vsel %vm1675_vm0, %v2197_v19, %v2199_v30 }
  0x4d   : > { %655 = vmatmul.bf16.vlgmr.msra.gmra.mxu1 %v7286_v35  ;;  %685 = vmatmul.bf16.vlgmr.msra.gmra.mxu2 %v7292_v36  ;;  %v7297_v35 = vld [vmem:[#allocation2 + $0x88] sm:$0xff] }
  0x4e   : > { %1788 = vmatpush.bf16.msrb.mxu2 %v7366_v32  ;;  %1267 = vmatpush.bf16.msrb.mxu1 %v7337_v33  ;;  %v6635_v32 = vld [vmem:[#allocation2 + $0x8] sm:$0xe]  ;;  %v7396_v33 = vld [vmem:[#allocation2 + $0x8] sm:$0xf0] }
  0x4f   : > { %2983 = vmatpush.bf16.msrb.mxu0 %v7424_v34  ;;  %715 = vmatmul.bf16.vlgmr.msra.gmra.mxu3 %v7298_v42  ;;  %v7291_v34 = vld [vmem:[#allocation2 + $0x58] sm:$0xff]  ;;  %v7285_v36 = vld [vmem:[#allocation2 + $0x28] sm:$0xff]  ;;  %v6371_v42 = vld [vmem:[#allocation2] sm:$0xe] }
  0x50   : > { %625 = vmatmul.bf16.vlgmr.msra.gmra.mxu0 %v7280_v37  ;;  %2308 = vmatpush.bf16.msrb.mxu3 %v7395_v52  ;;  %v7309_v37 = vld [vmem:[#allocation2] sm:$0xff] }
  0x52   : > { %1789 = vmatpush.bf16.msrb.mxu2 %v7365_v38  ;;  %1268 = vmatpush.bf16.msrb.mxu1 %v7336_v39  ;;  %v7397_v38 = vld [vmem:[#allocation2 + $0x10] sm:$0xff]  ;;  %v6636_v39 = vor.u32 %v7396_v33, %v6635_v32  ;;  %v1050_v33 = vshll.u32 %v7312_v28, 16 }
  0x53   : > { %2984 = vmatpush.bf16.msrb.mxu0 %v7423_v40  ;;  %v7310_v40 = vld [vmem:[#allocation2 + $0x8] sm:$0xff] }
  0x54   : > { %2309 = vmatpush.bf16.msrb.mxu3 %v7394_v57  ;;  %v1034_v52 = vshll.u32 %v7310_v40, 16 }
  0x56   : > { %1790 = vmatpush.bf16.msrb.mxu2 %v7364_v41  ;;  %1269 = vmatpush.bf16.msrb.mxu1 %v7335_v43  ;;  %v1029_v41 = vshll.u32 %v7309_v37, 16  ;;  %v7370_v43 = vld [vmem:[#allocation2 + $0x20] sm:$0xff] }
  0x57   : > { %2985 = vmatpush.bf16.msrb.mxu0 %v7422_v44  ;;  %v7338_v44 = vld [vmem:[#allocation2] sm:$0xf0] }
  0x58   : > { %2310 = vmatpush.bf16.msrb.mxu3 %v7393_v58 }
  0x5a   : > { %1791 = vmatpush.bf16.msrb.mxu2 %v7363_v45  ;;  %1270 = vmatpush.bf16.msrb.mxu1 %v7334_v46  ;;  %v2718_v45 = vshrl.u32 %v6636_v39, 16  ;;  %v2721_v46 = vshll.u32 %v6636_v39, 16 }
  0x5b   : > { %2986 = vmatpush.bf16.msrb.mxu0 %v7421_v47  ;;  %v2726_v47 = vshrl.u32 %v7397_v38, 16 }
  0x5c   : > { %2311 = vmatpush.bf16.msrb.mxu3 %v7392_v63 }
  0x5d   : > { %660 = vmatmul.bf16.gmra.mxu1 %v7287_v48  ;;  %690 = vmatmul.bf16.gmra.mxu2 %v7293_v49  ;;  %v2729_v48 = vshll.u32 %v7397_v38, 16  ;;  %v2201_v49 = vrot.slane %v7370_v43, 1  ;;  %v2728_v57 = vrot.slane %v2726_v47, 1 }
  0x5e   : > { %1792 = vmatpush.bf16.msrb.mxu2 %v7362_v51  ;;  %1271 = vmatpush.bf16.msrb.mxu1 %v7333_v53  ;;  %v1031_v51 = vrot.slane %v1029_v41, 1  ;;  %v7339_v53 = vld [vmem:[#allocation2 + $0x8] sm:$0xff] }
  0x5f   : > { %720 = vmatmul.bf16.gmra.mxu3 %v7299_v54  ;;  %2987 = vmatpush.bf16.msrb.mxu0 %v7420_v55  ;;  %v6372_v54 = vor.u32 %v7338_v44, %v6371_v42  ;;  %v2720_v55 = vrot.slane %v2718_v45, 1  ;;  %v2731_v58 = vrot.slane %v2729_v48, 2  ;;  %v1677_v63 = vrot.slane %v7339_v53, 1 }
  0x60   : > { %630 = vmatmul.bf16.gmra.mxu0 %v7281_v50  ;;  %2312 = vmatpush.bf16.msrb.mxu3 %v7391_v4  ;;  %v1027_v50 = vshrl.u32 %v7309_v37, 16 }
  0x62   : > { %1793 = vmatpush.bf16.msrb.mxu2 %v7361_v56  ;;  %1272 = vmatpush.bf16.msrb.mxu1 %v7332_v62  ;;  %v2723_v56 = vrot.slane %v2721_v46, 2  ;;  %v1676_v62 = vrot.slane %v6372_v54, 1 }
  0x63   : > { %2988 = vmatpush.bf16.msrb.mxu0 %v7419_v0 }
  0x64   : > { %2313 = vmatpush.bf16.msrb.mxu3 %v7390_v5  ;;  %v2724_v0 = vor.u32 %v2723_v56, %v2720_v55  ;;  %v7398_v5 = vld [vmem:[#allocation2 + $0x18] sm:$0xff]  ;;  %v1054_v55 = vshrl.u32 %v7312_v28, 16 }
  0x66   : > { %1794 = vmatpush.bf16.msrb.mxu2 %v7360_v1  ;;  %1273 = vmatpush.bf16.msrb.mxu1 %v7331_v3  ;;  %v2732_v1 = vor.u32 %v2731_v58, %v2728_v57  ;;  %v1678_v3 = vsel %vm1675_vm0, %v1676_v62, %v1677_v63  ;;  %v7342_v57 = vld [vmem:[#allocation2 + $0x20] sm:$0xff]  ;;  %v7373_v58 = vld [vmem:[#allocation2 + $0x38] sm:$0xff] }
  0x67   : > { %2989 = vmatpush.bf16.msrb.mxu0 %v7418_v9  ;;  %v1038_v9 = vshrl.u32 %v7310_v40, 16  ;;  %v1052_v40 = vrot.slane %v1050_v33, 1  ;;  %v2207_v62 = vrot.slane %v7373_v58, 1 }
  0x68   : > { %2314 = vmatpush.bf16.msrb.mxu3 %v7389_v10  ;;  %v2733_v4 = vsel %vm2716_vm2, %v2724_v0, %v2732_v1 }
  0x6a   : > { %1795 = vmatpush.bf16.msrb.mxu2 %v7359_v11  ;;  %1274 = vmatpush.bf16.msrb.mxu1 %v7330_v13  ;;  %v7340_v11 = vld [vmem:[#allocation2 + $0x10] sm:$0xff] }
  0x6b   : > { %2990 = vmatpush.bf16.msrb.mxu0 %v7417_v17  ;;  %v1679_v19 = vrot.slane %v7340_v11, 1  ;;  %v7401_v11 = vld [vmem:[#allocation2 + $0x30] sm:$0xff] }
  0x6c   : > { %2315 = vmatpush.bf16.msrb.mxu3 %v7388_v12  ;;  %v7371_v12 = vld [vmem:[#allocation2 + $0x28] sm:$0xff] }
  0x6d   : > { %665 = vmatmul.bf16.gmra.mxu1 %v7288_v59  ;;  %695 = vmatmul.bf16.gmra.mxu2 %v7294_v60  ;;  %v2202_v59 = vsel %vm1675_vm0, %v2199_v30, %v2201_v49  ;;  %v1032_v60 = vor.u32 %v1031_v51, %v1027_v50  ;;  %v2203_v16 = vrot.slane %v7371_v12, 1  ;;  %v7313_v50 = vld [vmem:[#allocation2 + $0x20] sm:$0xff]  ;;  %v7314_v12 = vld [vmem:[#allocation2 + $0x28] sm:$0xff] }
  0x6e   : > { %4024 = vmatpush.bf16.msra.mxu2 %v7482_v25  ;;  %3504 = vmatpush.bf16.msra.mxu1 %v7453_v27  ;;  %v7452_v25 = vld [vmem:[%s9290_s1 + $0x170] sm:$0xff]  ;;  %v7399_v27 = vld [vmem:[#allocation2 + $0x20] sm:$0xff]  ;;  %v1058_v56 = vshll.u32 %v7313_v50, 16 }
  0x6f   : > { %725 = vmatmul.bf16.gmra.mxu3 %v7300_v2  ;;  %5220 = vmatpush.bf16.msra.mxu0 %v7540_v29  ;;  %v2204_v20 = vsel %vm1675_vm0, %v2201_v49, %v2203_v16  ;;  %v2744_v29 = vshrl.u32 %v7399_v27, 16  ;;  %v2747_v30 = vshll.u32 %v7399_v27, 16  ;;  %v7400_v49 = vld [vmem:[#allocation2 + $0x28] sm:$0xff] }
  0x70   : > { %635 = vmatmul.bf16.gmra.mxu0 %v7282_v61  ;;  %4699 = vmatpush.bf16.msra.mxu3 %v7511_v26  ;;  %v1036_v61 = vrot.slane %v1034_v52, 1  ;;  %v2753_v51 = vshrl.u32 %v7400_v49, 16  ;;  %v2756_v52 = vshll.u32 %v7400_v49, 16  ;;  %v1060_v0 = vrot.slane %v1058_v56, 1  ;;  %v7451_v27 = vld [vmem:[%s9290_s1 + $0x168] sm:$0xff] }
  0x71   : > { %v2749_v37 = vrot.slane %v2747_v30, 2  ;;  %v7375_v56 = vld [vmem:[#allocation2 + $0x48] sm:$0xff] }
  0x72   : > { %v1037_v2 = vsel %vm1025_vm1, %v1032_v60, %v1036_v61  ;;  %4025 = vmatpush.bf16.msra.mxu2 %v7481_v15  ;;  %v1040_v17 = vor.u32 %v1038_v9, %v1036_v61  ;;  %3505 = vmatpush.bf16.msra.mxu1 %v7452_v25  ;;  %v2755_v60 = vrot.slane %v2753_v51, 1  ;;  %v2758_v61 = vrot.slane %v2756_v52, 2  ;;  %v7344_v52 = vld [vmem:[#allocation2 + $0x30] sm:$0xff] }
  0x76   : > { %3506 = vmatpush.bf16.msra.mxu1 %v7451_v27 }
  0x7d   : > { %670 = vmatmul.bf16.gmra.mxu1 %v7289_v6  ;;  %700 = vmatmul.bf16.gmra.mxu2 %v7295_v7  ;;  %v7311_v6 = vld [vmem:[#allocation2 + $0x10] sm:$0xff]  ;;  %v2735_v7 = vshrl.u32 %v7398_v5, 16 }
  0x7e   : > { %v1042_v10 = vshll.u32 %v7311_v6, 16  ;;  %v1046_v32 = vshrl.u32 %v7311_v6, 16 }
  0x7f   : > { %2316 = vmatmul.bf16.vlgmr.msrb.gmra.mxu3 %v2198_v21  ;;  %v2737_v13 = vrot.slane %v2735_v7, 1 }
  0x80   : > { %640 = vmatmul.bf16.gmra.mxu0 %v7283_v8  ;;  %v2738_v8 = vshll.u32 %v7398_v5, 16  ;;  %v1044_v18 = vrot.slane %v1042_v10, 1 }
  0x82   : > { %v2740_v14 = vrot.slane %v2738_v8, 2  ;;  %v1048_v39 = vor.u32 %v1046_v32, %v1044_v18 }
  0x84   : > { %v2741_v21 = vor.u32 %v2740_v14, %v2737_v13  ;;  %v1053_v45 = vsel %vm1025_vm1, %v1048_v39, %v1052_v40  ;;  %v2762_v13 = vshrl.u32 %v7401_v11, 16  ;;  %v2765_v14 = vshll.u32 %v7401_v11, 16  ;;  %v7538_v39 = vld [vmem:[%s9290_s1 + $0x228] sm:$0xff] }
  0x86   : > { %v2742_v26 = vsel %vm2716_vm2, %v2732_v1, %v2741_v21  ;;  %v1683_v1 = vrot.slane %v7342_v57, 1  ;;  %v2764_v25 = vrot.slane %v2762_v13, 1 }
  0x8d   : > { %675 = vmatmul.bf16.gmra.mxu1 %v7290_v22  ;;  %705 = vmatmul.bf16.gmra.mxu2 %v7296_v23  ;;  %v7510_v22 = vld [vmem:[%s9290_s1 + $0x1f0] sm:$0xff]  ;;  %v1045_v23 = vsel %vm1025_vm1, %v1040_v17, %v1044_v18  ;;  %v1062_v18 = vshrl.u32 %v7313_v50, 16  ;;  %v1070_v50 = vshrl.u32 %v7314_v12, 16 }
  0x8e   : > { %4700 = vmatpush.bf16.msra.mxu3 %v7510_v22  ;;  %v7509_v22 = vld [vmem:[%s9290_s1 + $0x1e8] sm:$0xff] }
  0x8f   : > { %2321 = vmatmul.bf16.gmra.mxu3 %v2200_v31  ;;  %v7539_v31 = vld [vmem:[%s9290_s1 + $0x230] sm:$0xff] }
  0x90   : > { %645 = vmatmul.bf16.gmra.mxu0 %v7284_v24  ;;  %v1680_v24 = vsel %vm1675_vm0, %v1677_v63, %v1679_v19  ;;  %v1056_v63 = vor.u32 %v1054_v55, %v1052_v40 }
  0x91   : > { %5221 = vmatpush.bf16.msra.mxu0 %v7539_v31 }
  0x92   : > { %v1061_v6 = vsel %vm1025_vm1, %v1056_v63, %v1060_v0  ;;  %4701 = vmatpush.bf16.msra.mxu3 %v7509_v22 }
  0x95   : > { %5222 = vmatpush.bf16.msra.mxu0 %v7538_v39 }
  0x9d   : > { %680 = vmatmul.bf16.gmra.mxu1 %v7291_v34  ;;  %710 = vmatmul.bf16.gmra.mxu2 %v7297_v35  ;;  %v7341_v34 = vld [vmem:[#allocation2 + $0x18] sm:$0xff]  ;;  %v7372_v35 = vld [vmem:[#allocation2 + $0x30] sm:$0xff] }
  0x9e   : > { %v2205_v38 = vrot.slane %v7372_v35, 1  ;;  %v1681_v41 = vrot.slane %v7341_v34, 1 }
  0x9f   : > { %2326 = vmatmul.bf16.gmra.mxu3 %v2202_v59 }
  0xa0   : > { %650 = vmatmul.bf16.gmra.mxu0 %v7285_v36  ;;  %v2746_v36 = vrot.slane %v2744_v29, 1  ;;  %v2206_v42 = vsel %vm1675_vm0, %v2203_v16, %v2205_v38  ;;  %v1682_v46 = vsel %vm1675_vm0, %v1679_v19, %v1681_v41  ;;  %v1684_v7 = vsel %vm1675_vm0, %v1681_v41, %v1683_v1  ;;  %v7480_v16 = vld [vmem:[%s9290_s1 + $0x1a8] sm:$0xff] }
  0xa1   : > { %v1066_v19 = vshll.u32 %v7314_v12, 16  ;;  %4026 = vmatpush.bf16.msra.mxu2 %v7480_v16  ;;  %v1064_v29 = vor.u32 %v1062_v18, %v1060_v0  ;;  %v1687_v0 = vrot.slane %v7344_v52, 1  ;;  %v7316_v16 = vld [vmem:[#allocation2 + $0x38] sm:$0xff] }
  0xa2   : > { %v2750_v43 = vor.u32 %v2749_v37, %v2746_v36 }
  0xa3   : > { %v1068_v30 = vrot.slane %v1066_v19, 1 }
  0xa4   : > { %v2751_v48 = vsel %vm2716_vm2, %v2741_v21, %v2750_v43 }
  0xa5   : > { %v1069_v36 = vsel %vm1025_vm1, %v1064_v29, %v1068_v30 }
  0xad   : > { %1275 = vmatmul.bf16.vlgmr.msrb.gmra.mxu1 %v1037_v2  ;;  %1796 = vmatmul.bf16.vlgmr.msrb.gmra.mxu2 %v1678_v3  ;;  %v2208_v2 = vsel %vm1675_vm0, %v2205_v38, %v2207_v62  ;;  %v2759_v3 = vor.u32 %v2758_v61, %v2755_v60  ;;  %v2211_v61 = vrot.slane %v7375_v56, 1  ;;  %v7404_v56 = vld [vmem:[#allocation2 + $0x48] sm:$0xff] }
  0xaf   : > { %2331 = vmatmul.bf16.gmra.mxu3 %v2204_v20  ;;  %v2760_v10 = vsel %vm2716_vm2, %v2750_v43, %v2759_v3  ;;  %v7343_v20 = vld [vmem:[#allocation2 + $0x28] sm:$0xff]  ;;  %v7315_v43 = vld [vmem:[#allocation2 + $0x30] sm:$0xff] }
  0xb0   : > { %2991 = vmatmul.bf16.vlgmr.msrb.gmra.mxu0 %v2733_v4  ;;  %v1685_v31 = vrot.slane %v7343_v20, 1  ;;  %v1074_v51 = vshll.u32 %v7315_v43, 16 }
  0xb2   : > { %v1686_v37 = vsel %vm1675_vm0, %v1683_v1, %v1685_v31  ;;  %v1076_v63 = vrot.slane %v1074_v51, 1 }
  0xbd   : > { %1280 = vmatmul.bf16.gmra.mxu1 %v1045_v23  ;;  %1801 = vmatmul.bf16.gmra.mxu2 %v1680_v24  ;;  %v7374_v23 = vld [vmem:[#allocation2 + $0x40] sm:$0xff] }
  0xbe   : > { %v2209_v28 = vrot.slane %v7374_v23, 1  ;;  %v1078_v23 = vshrl.u32 %v7315_v43, 16 }
  0xbf   : > { %2336 = vmatmul.bf16.gmra.mxu3 %v2206_v42  ;;  %v7402_v42 = vld [vmem:[#allocation2 + $0x38] sm:$0xff] }
  0xc0   : > { %2996 = vmatmul.bf16.gmra.mxu0 %v2742_v26  ;;  %v2767_v26 = vrot.slane %v2765_v14, 2  ;;  %v2210_v32 = vsel %vm1675_vm0, %v2207_v62, %v2209_v28  ;;  %v1072_v62 = vor.u32 %v1070_v50, %v1068_v30  ;;  %v2212_v1 = vsel %vm1675_vm0, %v2209_v28, %v2211_v61  ;;  %v7403_v14 = vld [vmem:[#allocation2 + $0x40] sm:$0xff]  ;;  %v7376_v28 = vld [vmem:[#allocation2 + $0x50] sm:$0xff] }
  0xc1   : > { %v2780_v18 = vshrl.u32 %v7403_v14, 16  ;;  %v2783_v19 = vshll.u32 %v7403_v14, 16 }
  0xc2   : > { %v2768_v33 = vor.u32 %v2767_v26, %v2764_v25  ;;  %v1082_v25 = vshll.u32 %v7316_v16, 16  ;;  %v7345_v26 = vld [vmem:[#allocation2 + $0x38] sm:$0xff] }
  0xc3   : > { %v2782_v30 = vrot.slane %v2780_v18, 1  ;;  %v7377_v18 = vld [vmem:[#allocation2 + $0x58] sm:$0xff] }
  0xc4   : > { %v2769_v41 = vsel %vm2716_vm2, %v2759_v3, %v2768_v33 }
  0xca   : > { %v8076_v44 = vpop.f32.mrf.mxu1 }
  0xcd   : > { %v8080_v47 = vpop.f32.mrf.mxu0  ;;  %1285 = vmatmul.bf16.gmra.mxu1 %v1053_v45  ;;  %1806 = vmatmul.bf16.gmra.mxu2 %v1682_v46  ;;  %v2771_v45 = vshrl.u32 %v7402_v42, 16  ;;  %v2774_v46 = vshll.u32 %v7402_v42, 16 }
  0xcf   : > { %2341 = vmatmul.bf16.gmra.mxu3 %v2208_v2  ;;  %v2773_v58 = vrot.slane %v2771_v45, 1  ;;  %v2776_v60 = vrot.slane %v2774_v46, 2 }
  0xd0   : > { %3001 = vmatmul.bf16.gmra.mxu0 %v2751_v48  ;;  %v8083_v53 = vpop.f32.mrf.mxu2 }
  0xd1   : > { %v2777_v2 = vor.u32 %v2776_v60, %v2773_v58  ;;  %v7479_v58 = vld [vmem:[%s9290_s1 + $0x1a0] sm:$0xff] }
  0xd2   : > { %v8085_v54 = vpop.f32.mrf.mxu1  ;;  %v8096_v8 = vpop.f32.mrf.mxu3  ;;  %v7508_v60 = vld [vmem:[%s9290_s1 + $0x1e0] sm:$0xff]  ;;  %4027 = vmatpush.bf16.msra.mxu2 %v7479_v58 }
  0xd3   : > { %9296 = vst [vmem:[#allocation7_spill] sm:$0xff] %v8096_v8  ;;  %v2778_v13 = vsel %vm2716_vm2, %v2768_v33, %v2777_v2  ;;  %v1080_v33 = vor.u32 %v1078_v23, %v1076_v63  ;;  %4702 = vmatpush.bf16.msra.mxu3 %v7508_v60 }
  0xd5   : > { %v8087_v59 = vpop.f32.mrf.mxu0 }
  0xd8   : > { %v8090_v4 = vpop.f32.mrf.mxu2 }
  0xda   : > { %v8092_v5 = vpop.f32.mrf.mxu1  ;;  %v8108_v21 = vpop.f32.mrf.mxu3 }
  0xdb   : > { %9297 = vst [vmem:[#allocation8_spill] sm:$0xff] %v8108_v21 }
  0xdd   : > { %v8098_v9 = vpop.f32.mrf.mxu0  ;;  %1290 = vmatmul.bf16.gmra.mxu1 %v1061_v6  ;;  %1811 = vmatmul.bf16.gmra.mxu2 %v1684_v7  ;;  %v1077_v7 = vsel %vm1025_vm1, %v1072_v62, %v1076_v63  ;;  %v7450_v62 = vld [vmem:[%s9290_s1 + $0x160] sm:$0xff]  ;;  %v2789_v63 = vshrl.u32 %v7404_v56, 16 }
  0xde   : > { %3507 = vmatpush.bf16.msra.mxu1 %v7450_v62  ;;  %v7405_v62 = vld [vmem:[#allocation2 + $0x50] sm:$0xff] }
  0xdf   : > { %2346 = vmatmul.bf16.gmra.mxu3 %v2210_v32  ;;  %v2213_v32 = vrot.slane %v7376_v28, 1  ;;  %v2791_v23 = vrot.slane %v2789_v63, 1  ;;  %v2215_v28 = vrot.slane %v7377_v18, 1  ;;  %v2798_v63 = vshrl.u32 %v7405_v62, 16 }
  0xe0   : > { %3006 = vmatmul.bf16.gmra.mxu0 %v2760_v10  ;;  %v8101_v15 = vpop.f32.mrf.mxu2  ;;  %v1688_v10 = vsel %vm1675_vm0, %v1685_v31, %v1687_v0  ;;  %v2785_v31 = vrot.slane %v2783_v19, 2 }
  0xe1   : > { %v2214_v39 = vsel %vm1675_vm0, %v2211_v61, %v2213_v32  ;;  %v7317_v61 = vld [vmem:[#allocation2 + $0x40] sm:$0xff] }
  0xe2   : > { %v8106_v17 = vpop.f32.mrf.mxu1  ;;  %v8125_v38 = vpop.f32.mrf.mxu3 }
  0xe3   : > { %9298 = vst [vmem:[#allocation9_spill] sm:$0xff] %v8125_v38 }
  0xe5   : > { %v8113_v24 = vpop.f32.mrf.mxu0 }
  0xe8   : > { %v8119_v34 = vpop.f32.mrf.mxu2 }
  0xea   : > { %v8121_v35 = vpop.f32.mrf.mxu1  ;;  %v8137_v55 = vpop.f32.mrf.mxu3 }
  0xeb   : > { %9299 = vst [vmem:[#allocation10_spill] sm:$0xff] %v8137_v55 }
  0xed   : > { %v8130_v40 = vpop.f32.mrf.mxu0  ;;  %1295 = vmatmul.bf16.gmra.mxu1 %v1069_v36  ;;  %1816 = vmatmul.bf16.gmra.mxu2 %v1686_v37  ;;  %v1084_v36 = vrot.slane %v1082_v25, 1  ;;  %v1689_v37 = vrot.slane %v7345_v26, 1  ;;  %v7537_v26 = vld [vmem:[%s9290_s1 + $0x220] sm:$0xff] }
  0xee   : > { %5223 = vmatpush.bf16.msra.mxu0 %v7537_v26 }
  0xef   : > { %2351 = vmatmul.bf16.gmra.mxu3 %v2212_v1  ;;  %v1085_v45 = vsel %vm1025_vm1, %v1080_v33, %v1084_v36  ;;  %v1690_v46 = vsel %vm1675_vm0, %v1687_v0, %v1689_v37  ;;  %v2792_v0 = vshll.u32 %v7404_v56, 16 }
  0xf0   : > { %3011 = vmatmul.bf16.gmra.mxu0 %v2769_v41  ;;  %v8133_v48 = vpop.f32.mrf.mxu2  ;;  %v2786_v41 = vor.u32 %v2785_v31, %v2782_v30 }
  0xf1   : > { %v2794_v25 = vrot.slane %v2792_v0, 2  ;;  %v2801_v0 = vshll.u32 %v7405_v62, 16 }
  0xf2   : > { %v8135_v49 = vpop.f32.mrf.mxu1  ;;  %v8148_v11 = vpop.f32.mrf.mxu3  ;;  %v2787_v52 = vsel %vm2716_vm2, %v2777_v2, %v2786_v41 }
  0xf3   : > { %9300 = vst [vmem:[#allocation11_spill] sm:$0xff] %v8148_v11 }
  0xf5   : > { %v8139_v57 = vpop.f32.mrf.mxu0 }
  0xf8   : > { %v8142_v3 = vpop.f32.mrf.mxu2 }
  0xfa   : > { %v8144_v6 = vpop.f32.mrf.mxu1  ;;  %v8157_v27 = vpop.f32.mrf.mxu3 }
  0xfb   : > { %9301 = vst [vmem:[#allocation12_spill] sm:$0xff] %v8157_v27 }
  0xfd   : > { %v8150_v12 = vpop.f32.mrf.mxu0  ;;  %1300 = vmatmul.bf16.gmra.mxu1 %v1077_v7  ;;  %1821 = vmatmul.bf16.gmra.mxu2 %v1688_v10  ;;  %v1086_v7 = vshrl.u32 %v7316_v16, 16  ;;  %v1090_v10 = vshll.u32 %v7317_v61, 16  ;;  %v2216_v16 = vsel %vm1675_vm0, %v2213_v32, %v2215_v28  ;;  %v7318_v32 = vld [vmem:[#allocation2 + $0x48] sm:$0xff] }
  0xfe   : > { %v1098_v18 = vshll.u32 %v7318_v32, 16 }
  0xff   : > { %2356 = vmatmul.bf16.gmra.mxu3 %v2214_v39  ;;  %v1088_v30 = vor.u32 %v1086_v7, %v1084_v36  ;;  %v1092_v31 = vrot.slane %v1090_v10, 1  ;;  %v2795_v39 = vor.u32 %v2794_v25, %v2791_v23  ;;  %v7378_v25 = vld [vmem:[#allocation2 + $0x60] sm:$0xff] }
 0x100   : > { %3016 = vmatmul.bf16.gmra.mxu0 %v2778_v13  ;;  %v8153_v20 = vpop.f32.mrf.mxu2  ;;  %v7346_v13 = vld [vmem:[#allocation2 + $0x40] sm:$0xff] }
 0x101   : > { %v1691_v33 = vrot.slane %v7346_v13, 1  ;;  %v2796_v36 = vsel %vm2716_vm2, %v2786_v41, %v2795_v39  ;;  %v1094_v13 = vshrl.u32 %v7317_v61, 16  ;;  %v2800_v41 = vrot.slane %v2798_v63, 1 }
 0x102   : > { %v8155_v22 = vpop.f32.mrf.mxu1  ;;  %v8168_v50 = vpop.f32.mrf.mxu3 }
 0x103   : > { %v1692_v56 = vsel %vm1675_vm0, %v1689_v37, %v1691_v33  ;;  %v7347_v37 = vld [vmem:[#allocation2 + $0x48] sm:$0xff] }
 0x105   : > { %v8159_v29 = vpop.f32.mrf.mxu0 }
 0x108   : > { %v8162_v42 = vpop.f32.mrf.mxu2 }
 0x109   : > { %9302 = vst [vmem:[#allocation13_spill] sm:$0xff] %v8162_v42 }
 0x10a   : > { %v8164_v43 = vpop.f32.mrf.mxu1  ;;  %v8186_v14 = vpop.f32.mrf.mxu3 }
 0x10d   : > { %v8170_v51 = vpop.f32.mrf.mxu0  ;;  %1305 = vmatmul.bf16.gmra.mxu1 %v1085_v45  ;;  %1826 = vmatmul.bf16.gmra.mxu2 %v1690_v46 }
 0x10f   : > { %2361 = vmatmul.bf16.gmra.mxu3 %v2216_v16  ;;  %v2217_v16 = vrot.slane %v7378_v25, 1 }
 0x110   : > { %3021 = vmatmul.bf16.gmra.mxu0 %v2787_v52  ;;  %v8182_v1 = vpop.f32.mrf.mxu2  ;;  %v1093_v52 = vsel %vm1025_vm1, %v1088_v30, %v1092_v31  ;;  %v2803_v30 = vrot.slane %v2801_v0, 2  ;;  %v7406_v0 = vld [vmem:[#allocation2 + $0x58] sm:$0xff] }
 0x111   : > { %9303 = vst [vmem:[#allocation14_spill] sm:$0xff] %v8182_v1  ;;  %v2218_v62 = vsel %vm1675_vm0, %v2215_v28, %v2217_v16 }
 0x112   : > { %v8184_v2 = vpop.f32.mrf.mxu1  ;;  %v8200_v58 = vpop.f32.mrf.mxu3  ;;  %v2804_v27 = vor.u32 %v2803_v30, %v2800_v41  ;;  %v1102_v30 = vshrl.u32 %v7318_v32, 16  ;;  %v7507_v32 = vld [vmem:[%s9290_s1 + $0x1d8] sm:$0xff] }
 0x113   : > { %4703 = vmatpush.bf16.msra.mxu3 %v7507_v32  ;;  %v7380_v32 = vld [vmem:[#allocation2 + $0x70] sm:$0xff] }
 0x114   : > { %v2805_v63 = vsel %vm2716_vm2, %v2795_v39, %v2804_v27  ;;  %v7379_v39 = vld [vmem:[#allocation2 + $0x68] sm:$0xff] }
 0x115   : > { %v8188_v19 = vpop.f32.mrf.mxu0 }
 0x118   : > { %v8194_v45 = vpop.f32.mrf.mxu2 }
 0x119   : > { %9304 = vst [vmem:[#allocation15_spill] sm:$0xff] %v8194_v45 }
 0x11a   : > { %v8196_v46 = vpop.f32.mrf.mxu1  ;;  %v8209_v23 = vpop.f32.mrf.mxu3 }
 0x11d   : > { %v8202_v60 = vpop.f32.mrf.mxu0  ;;  %1310 = vmatmul.bf16.gmra.mxu1 %v1093_v52  ;;  %1831 = vmatmul.bf16.gmra.mxu2 %v1692_v56  ;;  %v1096_v52 = vor.u32 %v1094_v13, %v1092_v31  ;;  %v1100_v56 = vrot.slane %v1098_v18, 1  ;;  %v8221_v31 = vld [vmem:[#allocation2 + $0x50] sm:$0xff]  ;;  %v2807_v13 = vshrl.u32 %v7406_v0, 16  ;;  %v2810_v18 = vshll.u32 %v7406_v0, 16 }
 0x11f   : > { %2366 = vmatmul.bf16.gmra.mxu3 %v2218_v62  ;;  %v1101_v55 = vsel %vm1025_vm1, %v1096_v52, %v1100_v56  ;;  %v8225_v52 = vld [vmem:[#allocation2 + $0x50] sm:$0xff] }
 0x120   : > { %3026 = vmatmul.bf16.gmra.mxu0 %v2796_v36  ;;  %v8205_v7 = vpop.f32.mrf.mxu2  ;;  %v1693_v36 = vrot.slane %v7347_v37, 1 }
 0x121   : > { %9305 = vst [vmem:[#allocation16_spill] sm:$0xff] %v8205_v7 }
 0x122   : > { %v8207_v10 = vpop.f32.mrf.mxu1  ;;  %v1694_v38 = vsel %vm1675_vm0, %v1691_v33, %v1693_v36  ;;  %v8218_v21 = vpop.f32.mrf.mxu3  ;;  %v1106_v33 = vshll.u32 %v8221_v31, 16 }
 0x125   : > { %v8211_v26 = vpop.f32.mrf.mxu0 }
 0x128   : > { %v8214_v11 = vpop.f32.mrf.mxu2 }
 0x129   : > { %9306 = vst [vmem:[#allocation17_spill] sm:$0xff] %v8214_v11  ;;  %v2812_v11 = vrot.slane %v2810_v18, 2 }
 0x12a   : > { %v1276_v61 = vpop.f32.mrf.mxu1  ;;  %v8227_v62 = vpop.f32.mrf.mxu3 }
 0x12b   : > { %v1381_v28 = vadd.f32 %v1276_v61, %v8080_v47  ;;  %v7478_v47 = vld [vmem:[%s9290_s1 + $0x198] sm:$0xff]  ;;  %v2219_v61 = vrot.slane %v7379_v39, 1 }
 0x12c   : > { %4028 = vmatpush.bf16.msra.mxu2 %v7478_v47 }
 0x12d   : > { %v2992_v8 = vpop.f32.mrf.mxu0  ;;  %1315 = vmatmul.bf16.gmra.mxu1 %v1101_v55  ;;  %1836 = vmatmul.bf16.gmra.mxu2 %v1694_v38 }
 0x130   : > { %3031 = vmatmul.bf16.gmra.mxu0 %v2805_v63  ;;  %v1797_v37 = vpop.f32.mrf.mxu2  ;;  %v2809_v63 = vrot.slane %v2807_v13, 1  ;;  %v2220_v13 = vsel %vm1675_vm0, %v2217_v16, %v2219_v61  ;;  %v7536_v16 = vld [vmem:[%s9290_s1 + $0x218] sm:$0xff] }
 0x131   : > { %v1902_v25 = vadd.f32 %v1797_v37, %v1381_v28  ;;  %v1104_v28 = vor.u32 %v1102_v30, %v1100_v56  ;;  %v1108_v37 = vrot.slane %v1106_v33, 1  ;;  %2371 = vmatmul.bf16.gmra.mxu3 %v2220_v13  ;;  %v7407_v33 = vld [vmem:[#allocation2 + $0x60] sm:$0xff]  ;;  %5224 = vmatpush.bf16.msra.mxu0 %v7536_v16 }
 0x132   : > { %v1278_v41 = vpop.f32.mrf.mxu1  ;;  %v8243_v47 = vpop.f32.mrf.mxu3 }
 0x133   : > { %v2422_v38 = vadd.f32 %v8168_v50, %v1902_v25  ;;  %v1695_v50 = vrot.slane %v8225_v52, 1  ;;  %v1382_v18 = vadd.f32 %v1278_v41, %v8087_v59  ;;  %v2813_v25 = vor.u32 %v2812_v11, %v2809_v63  ;;  %v7449_v59 = vld [vmem:[%s9290_s1 + $0x158] sm:$0xff] }
 0x134   : > { %v1109_v42 = vsel %vm1025_vm1, %v1104_v28, %v1108_v37  ;;  %3508 = vmatpush.bf16.msra.mxu1 %v7449_v59 }
 0x135   : > { %v2994_v55 = vpop.f32.mrf.mxu0  ;;  %v8236_v0 = vadd.f32 %v2992_v8, %v2422_v38  ;;  %v1696_v39 = vsel %vm1675_vm0, %v1693_v36, %v1695_v50  ;;  %v2814_v30 = vsel %vm2716_vm2, %v2804_v27, %v2813_v25  ;;  %v2819_v27 = vshll.u32 %v7407_v33, 16 }
 0x138   : > { %v1799_v7 = vpop.f32.mrf.mxu2 }
 0x139   : > { %v1903_v45 = vadd.f32 %v1799_v7, %v1382_v18  ;;  %v7320_v7 = vld [vmem:[#allocation2 + $0x58] sm:$0xff] }
 0x13a   : > { %v1281_v1 = vpop.f32.mrf.mxu1  ;;  %v1114_v38 = vshll.u32 %v7320_v7, 16  ;;  %v8257_v63 = vpop.f32.mrf.mxu3 }
 0x13b   : > { %v2423_v8 = vadd.f32 %v8186_v14, %v1903_v45  ;;  %v1383_v14 = vadd.f32 %v1281_v1, %v8098_v9  ;;  %v2816_v45 = vshrl.u32 %v7407_v33, 16 }
 0x13d   : > { %v2997_v56 = vpop.f32.mrf.mxu0  ;;  %1320 = vmatmul.bf16.gmra.mxu1 %v1109_v42  ;;  %1841 = vmatmul.bf16.gmra.mxu2 %v1696_v39  ;;  %v8250_v11 = vadd.f32 %v2994_v55, %v2423_v8  ;;  %v1110_v42 = vshrl.u32 %v8221_v31, 16  ;;  %v7349_v55 = vld [vmem:[#allocation2 + $0x58] sm:$0xff]  ;;  %v2818_v18 = vrot.slane %v2816_v45, 1  ;;  %v2821_v39 = vrot.slane %v2819_v27, 2 }
 0x13e   : > { %v2221_v8 = vrot.slane %v7380_v32, 1  ;;  %v1697_v33 = vrot.slane %v7349_v55, 1 }
 0x13f   : > { %9307 = vst [vmem:[#allocation18_spill] sm:$0xff] %v8250_v11  ;;  %v1112_v1 = vor.u32 %v1110_v42, %v1108_v37  ;;  %v2822_v16 = vor.u32 %v2821_v39, %v2818_v18  ;;  %v7408_v42 = vld [vmem:[#allocation2 + $0x68] sm:$0xff]  ;;  %v1118_v18 = vshrl.u32 %v7320_v7, 16  ;;  %v8276_v39 = vld [vmem:[#allocation2 + $0x60] sm:$0xff] }
 0x140   : > { %3036 = vmatmul.bf16.gmra.mxu0 %v2814_v30  ;;  %v1802_v36 = vpop.f32.mrf.mxu2  ;;  %v1116_v30 = vrot.slane %v1114_v38, 1  ;;  %v2222_v59 = vsel %vm1675_vm0, %v2219_v61, %v2221_v8  ;;  %v1698_v45 = vsel %vm1675_vm0, %v1695_v50, %v1697_v33  ;;  %v8272_v61 = vld [vmem:[#allocation2 + $0x60] sm:$0xff]  ;;  %v2825_v38 = vshrl.u32 %v7408_v42, 16 }
 0x141   : > { %v1904_v41 = vadd.f32 %v1802_v36, %v1383_v14  ;;  %2376 = vmatmul.bf16.gmra.mxu3 %v2222_v59  ;;  %v2828_v55 = vshll.u32 %v7408_v42, 16 }
 0x142   : > { %v1283_v52 = vpop.f32.mrf.mxu1  ;;  %v8266_v27 = vpop.f32.mrf.mxu3 }
 0x143   : > { %v2424_v28 = vadd.f32 %v8200_v58, %v1904_v41  ;;  %v1384_v31 = vadd.f32 %v1283_v52, %v8113_v24  ;;  %v1117_v58 = vsel %vm1025_vm1, %v1112_v1, %v1116_v30  ;;  %v2823_v41 = vsel %vm2716_vm2, %v2813_v25, %v2822_v16  ;;  %v7381_v1 = vld [vmem:[#allocation2 + $0x78] sm:$0xff] }
 0x145   : > { %v2999_v13 = vpop.f32.mrf.mxu0  ;;  %v8260_v9 = vadd.f32 %v2997_v56, %v2424_v28 }
 0x148   : > { %v1804_v14 = vpop.f32.mrf.mxu2 }
 0x149   : > { %v1905_v36 = vadd.f32 %v1804_v14, %v1384_v31  ;;  %v2827_v31 = vrot.slane %v2825_v38, 1  ;;  %v2830_v14 = vrot.slane %v2828_v55, 2 }
 0x14a   : > { %v1286_v11 = vpop.f32.mrf.mxu1  ;;  %v8278_v25 = vpop.f32.mrf.mxu3 }
 0x14b   : > { %v2425_v56 = vadd.f32 %v8209_v23, %v1905_v36  ;;  %v1385_v52 = vadd.f32 %v1286_v11, %v8130_v40  ;;  %v1122_v23 = vshll.u32 %v8272_v61, 16  ;;  %v2223_v36 = vrot.slane %v7381_v1, 1 }
 0x14c   : > { %v1120_v11 = vor.u32 %v1118_v18, %v1116_v30  ;;  %v7409_v18 = vld [vmem:[#allocation2 + $0x70] sm:$0xff] }
 0x14d   : > { %v3002_v37 = vpop.f32.mrf.mxu0  ;;  %1325 = vmatmul.bf16.gmra.mxu1 %v1117_v58  ;;  %1846 = vmatmul.bf16.gmra.mxu2 %v1698_v45  ;;  %v8270_v24 = vadd.f32 %v2999_v13, %v2425_v56  ;;  %v1124_v58 = vrot.slane %v1122_v23, 1  ;;  %v1699_v45 = vrot.slane %v8276_v39, 1  ;;  %v2224_v7 = vsel %vm1675_vm0, %v2221_v8, %v2223_v36  ;;  %v8294_v8 = vld [vmem:[#allocation2 + $0x68] sm:$0xff] }
 0x14e   : > { %v2834_v23 = vshrl.u32 %v7409_v18, 16  ;;  %v2837_v39 = vshll.u32 %v7409_v18, 16 }
 0x14f   : > { %v1700_v38 = vsel %vm1675_vm0, %v1697_v33, %v1699_v45 }
 0x150   : > { %3041 = vmatmul.bf16.gmra.mxu0 %v2823_v41  ;;  %v1807_v50 = vpop.f32.mrf.mxu2  ;;  %v2831_v41 = vor.u32 %v2830_v14, %v2827_v31  ;;  %v8302_v31 = vld [vmem:[#allocation2 + $0x68] sm:$0xff] }
 0x151   : > { %v1906_v32 = vadd.f32 %v1807_v50, %v1385_v52  ;;  %2381 = vmatmul.bf16.gmra.mxu3 %v2224_v7 }
 0x152   : > { %v1288_v28 = vpop.f32.mrf.mxu1  ;;  %v8288_v55 = vpop.f32.mrf.mxu3 }
 0x153   : > { %v2426_v13 = vadd.f32 %v8218_v21, %v1906_v32  ;;  %v1386_v56 = vadd.f32 %v1288_v28, %v8139_v57  ;;  %v1125_v21 = vsel %vm1025_vm1, %v1120_v11, %v1124_v58  ;;  %v2832_v32 = vsel %vm2716_vm2, %v2822_v16, %v2831_v41  ;;  %v7477_v28 = vld [vmem:[%s9290_s1 + $0x190] sm:$0xff]  ;;  %v7382_v11 = vld [vmem:[#allocation2 + $0x80] sm:$0xff] }
 0x154   : > { %4029 = vmatpush.bf16.msra.mxu2 %v7477_v28 }
 0x155   : > { %v3004_v59 = vpop.f32.mrf.mxu0  ;;  %v8281_v40 = vadd.f32 %v3002_v37, %v2426_v13  ;;  %v1126_v13 = vshrl.u32 %v8272_v61, 16  ;;  %v7448_v61 = vld [vmem:[%s9290_s1 + $0x150] sm:$0xff] }
 0x156   : > { %3509 = vmatpush.bf16.msra.mxu1 %v7448_v61  ;;  %v7352_v61 = vld [vmem:[#allocation2 + $0x70] sm:$0xff] }
 0x158   : > { %v1809_v42 = vpop.f32.mrf.mxu2 }
 0x159   : > { %v1907_v52 = vadd.f32 %v1809_v42, %v1386_v56  ;;  %v2836_v42 = vrot.slane %v2834_v23, 1 }
 0x15a   : > { %v1291_v50 = vpop.f32.mrf.mxu1  ;;  %v8304_v14 = vpop.f32.mrf.mxu3 }
 0x15b   : > { %v2427_v30 = vadd.f32 %v8227_v62, %v1907_v52  ;;  %v1387_v33 = vadd.f32 %v1291_v50, %v8150_v12  ;;  %v2839_v12 = vrot.slane %v2837_v39, 2  ;;  %v7506_v52 = vld [vmem:[%s9290_s1 + $0x1d0] sm:$0xff]  ;;  %v2225_v50 = vrot.slane %v7382_v11, 1 }
 0x15c   : > { %4704 = vmatpush.bf16.msra.mxu3 %v7506_v52 }
 0x15d   : > { %v3007_v37 = vpop.f32.mrf.mxu0  ;;  %1330 = vmatmul.bf16.gmra.mxu1 %v1125_v21  ;;  %1851 = vmatmul.bf16.gmra.mxu2 %v1700_v38  ;;  %v8292_v57 = vadd.f32 %v3004_v59, %v2427_v30  ;;  %v1130_v59 = vshll.u32 %v8294_v8, 16  ;;  %v1128_v38 = vor.u32 %v1126_v13, %v1124_v58  ;;  %v2840_v28 = vor.u32 %v2839_v12, %v2836_v42 }
 0x15f   : > { %v1132_v30 = vrot.slane %v1130_v59, 1  ;;  %v2841_v13 = vsel %vm2716_vm2, %v2831_v41, %v2840_v28  ;;  %v7410_v59 = vld [vmem:[#allocation2 + $0x78] sm:$0xff]  ;;  %v1134_v41 = vshrl.u32 %v8294_v8, 16 }
 0x160   : > { %3046 = vmatmul.bf16.gmra.mxu0 %v2832_v32  ;;  %v1812_v62 = vpop.f32.mrf.mxu2  ;;  %v2226_v32 = vsel %vm1675_vm0, %v2223_v36, %v2225_v50 }
 0x161   : > { %v1908_v1 = vadd.f32 %v1812_v62, %v1387_v33  ;;  %2386 = vmatmul.bf16.gmra.mxu3 %v2226_v32  ;;  %v1133_v62 = vsel %vm1025_vm1, %v1128_v38, %v1132_v30  ;;  %v7383_v32 = vld [vmem:[#allocation2 + $0x88] sm:$0xff] }
 0x162   : > { %v1293_v16 = vpop.f32.mrf.mxu1  ;;  %v8320_v11 = vpop.f32.mrf.mxu3 }
 0x163   : > { %v2428_v7 = vadd.f32 %v8243_v47, %v1908_v1  ;;  %v1701_v47 = vrot.slane %v8302_v31, 1  ;;  %v1388_v18 = vadd.f32 %v1293_v16, %v8159_v29  ;;  %v7535_v29 = vld [vmem:[%s9290_s1 + $0x210] sm:$0xff]  ;;  %v2843_v31 = vshrl.u32 %v7410_v59, 16 }
 0x164   : > { %v7323_v16 = vld [vmem:[#allocation2 + $0x70] sm:$0xff]  ;;  %5225 = vmatpush.bf16.msra.mxu0 %v7535_v29 }
 0x165   : > { %v3009_v56 = vpop.f32.mrf.mxu0  ;;  %v8313_v21 = vadd.f32 %v3007_v37, %v2428_v7  ;;  %v1702_v1 = vsel %vm1675_vm0, %v1699_v45, %v1701_v47  ;;  %v2846_v7 = vshll.u32 %v7410_v59, 16  ;;  %v1138_v52 = vshll.u32 %v7323_v16, 16 }
 0x168   : > { %v1814_v33 = vpop.f32.mrf.mxu2 }
 0x169   : > { %v1909_v23 = vadd.f32 %v1814_v33, %v1388_v18  ;;  %v2845_v33 = vrot.slane %v2843_v31, 1 }
 0x16a   : > { %v1296_v39 = vpop.f32.mrf.mxu1  ;;  %v8331_v38 = vpop.f32.mrf.mxu3 }
 0x16b   : > { %v2429_v58 = vadd.f32 %v8257_v63, %v1909_v23  ;;  %v1389_v45 = vadd.f32 %v1296_v39, %v8170_v51  ;;  %v2848_v23 = vrot.slane %v2846_v7, 2  ;;  %v1136_v39 = vor.u32 %v1134_v41, %v1132_v30  ;;  %v7411_v41 = vld [vmem:[#allocation2 + $0x80] sm:$0xff] }
 0x16d   : > { %v3012_v37 = vpop.f32.mrf.mxu0  ;;  %1335 = vmatmul.bf16.gmra.mxu1 %v1133_v62  ;;  %1856 = vmatmul.bf16.gmra.mxu2 %v1702_v1  ;;  %v8327_v36 = vadd.f32 %v3009_v56, %v2429_v58  ;;  %v2227_v62 = vrot.slane %v7383_v32, 1  ;;  %v1140_v1 = vrot.slane %v1138_v52, 1  ;;  %v1703_v58 = vrot.slane %v7352_v61, 1 }
 0x16e   : > { %v2849_v59 = vor.u32 %v2848_v23, %v2845_v33  ;;  %v2852_v52 = vshrl.u32 %v7411_v41, 16  ;;  %v2855_v61 = vshll.u32 %v7411_v41, 16  ;;  %v1142_v33 = vshrl.u32 %v7323_v16, 16  ;;  %v8350_v23 = vld [vmem:[#allocation2 + $0x78] sm:$0xff] }
 0x16f   : > { %v1704_v31 = vsel %vm1675_vm0, %v1701_v47, %v1703_v58 }
 0x170   : > { %3051 = vmatmul.bf16.gmra.mxu0 %v2841_v13  ;;  %v1817_v63 = vpop.f32.mrf.mxu2  ;;  %v2228_v13 = vsel %vm1675_vm0, %v2225_v50, %v2227_v62  ;;  %v8346_v50 = vld [vmem:[#allocation2 + $0x78] sm:$0xff] }
 0x171   : > { %v1910_v42 = vadd.f32 %v1817_v63, %v1389_v45  ;;  %2391 = vmatmul.bf16.gmra.mxu3 %v2228_v13 }
 0x172   : > { %v1298_v12 = vpop.f32.mrf.mxu1  ;;  %v8340_v7 = vpop.f32.mrf.mxu3 }
 0x173   : > { %v2430_v56 = vadd.f32 %v8266_v27, %v1910_v42  ;;  %v1390_v8 = vadd.f32 %v1298_v12, %v8188_v19  ;;  %v1141_v27 = vsel %vm1025_vm1, %v1136_v39, %v1140_v1  ;;  %v2850_v42 = vsel %vm2716_vm2, %v2840_v28, %v2849_v59  ;;  %v7384_v39 = vld [vmem:[#allocation2 + $0x90] sm:$0xff] }
 0x175   : > { %v3014_v18 = vpop.f32.mrf.mxu0  ;;  %v8334_v51 = vadd.f32 %v3012_v37, %v2430_v56 }
 0x178   : > { %v1819_v29 = vpop.f32.mrf.mxu2 }
 0x179   : > { %v1911_v45 = vadd.f32 %v1819_v29, %v1390_v8  ;;  %v2854_v8 = vrot.slane %v2852_v52, 1  ;;  %v2857_v29 = vrot.slane %v2855_v61, 2 }
 0x17a   : > { %v1301_v63 = vpop.f32.mrf.mxu1  ;;  %v8352_v28 = vpop.f32.mrf.mxu3 }
 0x17b   : > { %v2431_v37 = vadd.f32 %v8278_v25, %v1911_v45  ;;  %v1391_v12 = vadd.f32 %v1301_v63, %v8202_v60  ;;  %v1146_v25 = vshll.u32 %v8346_v50, 16  ;;  %v2229_v45 = vrot.slane %v7384_v39, 1 }
 0x17c   : > { %v1144_v63 = vor.u32 %v1142_v33, %v1140_v1  ;;  %v7412_v33 = vld [vmem:[#allocation2 + $0x88] sm:$0xff] }
 0x17d   : > { %v3017_v30 = vpop.f32.mrf.mxu0  ;;  %1340 = vmatmul.bf16.gmra.mxu1 %v1141_v27  ;;  %1861 = vmatmul.bf16.gmra.mxu2 %v1704_v31  ;;  %v8344_v19 = vadd.f32 %v3014_v18, %v2431_v37  ;;  %v1148_v27 = vrot.slane %v1146_v25, 1  ;;  %v1705_v31 = vrot.slane %v8350_v23, 1  ;;  %v2230_v16 = vsel %vm1675_vm0, %v2227_v62, %v2229_v45  ;;  %v7505_v62 = vld [vmem:[%s9290_s1 + $0x1c8] sm:$0xff] }
 0x17e   : > { %v2861_v25 = vshrl.u32 %v7412_v33, 16  ;;  %v2864_v23 = vshll.u32 %v7412_v33, 16  ;;  %4705 = vmatpush.bf16.msra.mxu3 %v7505_v62 }
 0x17f   : > { %v1706_v52 = vsel %vm1675_vm0, %v1703_v58, %v1705_v31  ;;  %v7447_v58 = vld [vmem:[%s9290_s1 + $0x148] sm:$0xff] }
 0x180   : > { %3056 = vmatmul.bf16.gmra.mxu0 %v2850_v42  ;;  %v1822_v47 = vpop.f32.mrf.mxu2  ;;  %v2858_v42 = vor.u32 %v2857_v29, %v2854_v8  ;;  %3510 = vmatpush.bf16.msra.mxu1 %v7447_v58  ;;  %v1150_v29 = vshrl.u32 %v8346_v50, 16 }
 0x181   : > { %v1912_v32 = vadd.f32 %v1822_v47, %v1391_v12  ;;  %2396 = vmatmul.bf16.gmra.mxu3 %v2230_v16  ;;  %v8382_v16 = vld [vmem:[#allocation2 + $0x80] sm:$0xff] }
 0x182   : > { %v1303_v56 = vpop.f32.mrf.mxu1  ;;  %v8362_v61 = vpop.f32.mrf.mxu3  ;;  %v1152_v50 = vor.u32 %v1150_v29, %v1148_v27  ;;  %v1707_v33 = vrot.slane %v8382_v16, 1 }
 0x183   : > { %v2432_v18 = vadd.f32 %v8288_v55, %v1912_v32  ;;  %v1392_v37 = vadd.f32 %v1303_v56, %v8211_v26  ;;  %v1149_v55 = vsel %vm1025_vm1, %v1144_v63, %v1148_v27  ;;  %v2859_v32 = vsel %vm2716_vm2, %v2849_v59, %v2858_v42  ;;  %v7476_v26 = vld [vmem:[%s9290_s1 + $0x188] sm:$0xff] }
 0x184   : > { %4030 = vmatpush.bf16.msra.mxu2 %v7476_v26 }
 0x185   : > { %v3019_v13 = vpop.f32.mrf.mxu0  ;;  %v8355_v60 = vadd.f32 %v3017_v30, %v2432_v18 }
 0x188   : > { %v1824_v41 = vpop.f32.mrf.mxu2 }
 0x189   : > { %v1913_v12 = vadd.f32 %v1824_v41, %v1392_v37  ;;  %v7385_v37 = vld [vmem:[#allocation2 + $0x98] sm:$0xff] }
 0x18a   : > { %v1306_v47 = vpop.f32.mrf.mxu1 }
 0x18b   : > { %v2433_v1 = vadd.f32 %v8304_v14, %v1913_v12  ;;  %v8377_v14 = vld [vmem:[#allocation2 + $0x80] sm:$0xff]  ;;  %v1393_v59 = vadd.f32 %v1306_v47, %v8076_v44  ;;  %v2863_v44 = vrot.slane %v2861_v25, 1  ;;  %v2866_v47 = vrot.slane %v2864_v23, 2 }
 0x18c   : > { %v1154_v63 = vshll.u32 %v8377_v14, 16 }
 0x18d   : > { %v3022_v30 = vpop.f32.mrf.mxu0  ;;  %1345 = vmatmul.bf16.gmra.mxu1 %v1149_v55  ;;  %1866 = vmatmul.bf16.gmra.mxu2 %v1706_v52  ;;  %v8375_v56 = vadd.f32 %v3019_v13, %v2433_v1  ;;  %v8384_v13 = vpop.f32.mrf.mxu3  ;;  %v7534_v55 = vld [vmem:[%s9290_s1 + $0x208] sm:$0xff]  ;;  %v2231_v52 = vrot.slane %v7385_v37, 1 }
 0x18e   : > { %5226 = vmatpush.bf16.msra.mxu0 %v7534_v55 }
 0x18f   : > { %v2232_v26 = vsel %vm1675_vm0, %v2229_v45, %v2231_v52  ;;  %v8403_v45 = vld [vmem:[#allocation2 + $0x88] sm:$0xff] }
 0x190   : > { %3061 = vmatmul.bf16.gmra.mxu0 %v2859_v32  ;;  %v1827_v39 = vpop.f32.mrf.mxu2  ;;  %v1156_v32 = vrot.slane %v1154_v63, 1  ;;  %v7413_v63 = vld [vmem:[#allocation2 + $0x90] sm:$0xff] }
 0x191   : > { %v1914_v18 = vadd.f32 %v1827_v39, %v1393_v59  ;;  %2401 = vmatmul.bf16.gmra.mxu3 %v2232_v26  ;;  %v1708_v39 = vsel %vm1675_vm0, %v1705_v31, %v1707_v33  ;;  %v2870_v16 = vshrl.u32 %v7413_v63, 16  ;;  %v2873_v37 = vshll.u32 %v7413_v63, 16 }
 0x192   : > { %v1308_v8 = vpop.f32.mrf.mxu1  ;;  %v1157_v23 = vsel %vm1025_vm1, %v1152_v50, %v1156_v32 }
 0x193   : > { %v2434_v41 = vadd.f32 %v8320_v11, %v1914_v18  ;;  %v1394_v62 = vadd.f32 %v1308_v8, %v8085_v54  ;;  %v2867_v11 = vor.u32 %v2866_v47, %v2863_v44  ;;  %v1162_v47 = vshll.u32 %v8403_v45, 16 }
 0x195   : > { %v3024_v12 = vpop.f32.mrf.mxu0  ;;  %v8390_v1 = vadd.f32 %v3022_v30, %v2434_v41  ;;  %v8397_v18 = vpop.f32.mrf.mxu3  ;;  %v2868_v29 = vsel %vm2716_vm2, %v2858_v42, %v2867_v11  ;;  %v8408_v42 = vld [vmem:[#allocation2 + $0x88] sm:$0xff] }
 0x198   : > { %v1829_v58 = vpop.f32.mrf.mxu2 }
 0x199   : > { %v1915_v59 = vadd.f32 %v1829_v58, %v1394_v62  ;;  %v2872_v62 = vrot.slane %v2870_v16, 1  ;;  %v2875_v58 = vrot.slane %v2873_v37, 2 }
 0x19a   : > { %v1311_v25 = vpop.f32.mrf.mxu1 }
 0x19b   : > { %v2435_v27 = vadd.f32 %v8331_v38, %v1915_v59  ;;  %v1395_v8 = vadd.f32 %v1311_v25, %v8092_v5  ;;  %v1158_v38 = vshrl.u32 %v8377_v14, 16 }
 0x19d   : > { %v3027_v30 = vpop.f32.mrf.mxu0  ;;  %1350 = vmatmul.bf16.gmra.mxu1 %v1157_v23  ;;  %1871 = vmatmul.bf16.gmra.mxu2 %v1708_v39  ;;  %v8401_v54 = vadd.f32 %v3024_v12, %v2435_v27  ;;  %v8410_v55 = vpop.f32.mrf.mxu3  ;;  %v7386_v12 = vld [vmem:[#allocation2 + $0xa0] sm:$0xff]  ;;  %v1160_v25 = vor.u32 %v1158_v38, %v1156_v32  ;;  %v1164_v23 = vrot.slane %v1162_v47, 1  ;;  %v1709_v39 = vrot.slane %v8408_v42, 1  ;;  %v7414_v38 = vld [vmem:[#allocation2 + $0x98] sm:$0xff] }
 0x19e   : > { %v2233_v5 = vrot.slane %v7386_v12, 1  ;;  %v2879_v47 = vshrl.u32 %v7414_v38, 16  ;;  %v2882_v42 = vshll.u32 %v7414_v38, 16 }
 0x19f   : > { %v1710_v16 = vsel %vm1675_vm0, %v1707_v33, %v1709_v39 }
 0x1a0   : > { %3066 = vmatmul.bf16.gmra.mxu0 %v2868_v29  ;;  %v1832_v31 = vpop.f32.mrf.mxu2  ;;  %v2234_v14 = vsel %vm1675_vm0, %v2231_v52, %v2233_v5  ;;  %v2876_v29 = vor.u32 %v2875_v58, %v2872_v62  ;;  %v8426_v52 = vld [vmem:[#allocation2 + $0x90] sm:$0xff] }
 0x1a1   : > { %v1916_v41 = vadd.f32 %v1832_v31, %v1395_v8  ;;  %2406 = vmatmul.bf16.gmra.mxu3 %v2234_v14  ;;  %v1170_v62 = vshll.u32 %v8426_v52, 16 }
 0x1a2   : > { %v1313_v44 = vpop.f32.mrf.mxu1 }
 0x1a3   : > { %v2436_v50 = vadd.f32 %v8340_v7, %v1916_v41  ;;  %v1396_v27 = vadd.f32 %v1313_v44, %v8106_v17  ;;  %v1165_v7 = vsel %vm1025_vm1, %v1160_v25, %v1164_v23  ;;  %v2877_v41 = vsel %vm2716_vm2, %v2867_v11, %v2876_v29  ;;  %v8431_v11 = vld [vmem:[#allocation2 + $0x90] sm:$0xff] }
 0x1a5   : > { %v3029_v26 = vpop.f32.mrf.mxu0  ;;  %v8413_v59 = vadd.f32 %v3027_v30, %v2436_v50  ;;  %v8420_v37 = vpop.f32.mrf.mxu3 }
 0x1a8   : > { %v1834_v63 = vpop.f32.mrf.mxu2 }
 0x1a9   : > { %v1917_v8 = vadd.f32 %v1834_v63, %v1396_v27  ;;  %v2881_v27 = vrot.slane %v2879_v47, 1  ;;  %v2884_v63 = vrot.slane %v2882_v42, 2 }
 0x1aa   : > { %v1316_v31 = vpop.f32.mrf.mxu1 }
 0x1ab   : > { %v2437_v32 = vadd.f32 %v8352_v28, %v1917_v8  ;;  %v1397_v44 = vadd.f32 %v1316_v31, %v8121_v35  ;;  %v1166_v28 = vshrl.u32 %v8403_v45, 16  ;;  %v7475_v35 = vld [vmem:[%s9290_s1 + $0x180] sm:$0xff] }
 0x1ac   : > { %v7504_v45 = vld [vmem:[%s9290_s1 + $0x1c0] sm:$0xff]  ;;  %4031 = vmatpush.bf16.msra.mxu2 %v7475_v35 }
 0x1ad   : > { %v3032_v30 = vpop.f32.mrf.mxu0  ;;  %1355 = vmatmul.bf16.gmra.mxu1 %v1165_v7  ;;  %1876 = vmatmul.bf16.gmra.mxu2 %v1710_v16  ;;  %v8424_v17 = vadd.f32 %v3029_v26, %v2437_v32  ;;  %v8433_v58 = vpop.f32.mrf.mxu3  ;;  %v7387_v26 = vld [vmem:[#allocation2 + $0xa8] sm:$0xff]  ;;  %v7446_v8 = vld [vmem:[%s9290_s1 + $0x140] sm:$0xff]  ;;  %v1172_v16 = vrot.slane %v1170_v62, 1  ;;  %v1711_v32 = vrot.slane %v8431_v11, 1  ;;  %v8461_v11 = vld [vmem:[#allocation2 + $0x98] sm:$0xff] }
 0x1ae   : > { %v2235_v31 = vrot.slane %v7387_v26, 1  ;;  %4706 = vmatpush.bf16.msra.mxu3 %v7504_v45  ;;  %3511 = vmatpush.bf16.msra.mxu1 %v7446_v8  ;;  %v1174_v8 = vshrl.u32 %v8426_v52, 16 }
 0x1af   : > { %v1712_v26 = vsel %vm1675_vm0, %v1709_v39, %v1711_v32 }
 0x1b0   : > { %3071 = vmatmul.bf16.gmra.mxu0 %v2877_v41  ;;  %v1837_v33 = vpop.f32.mrf.mxu2  ;;  %v2236_v41 = vsel %vm1675_vm0, %v2233_v5, %v2235_v31  ;;  %v7415_v5 = vld [vmem:[#allocation2 + $0xa0] sm:$0xff] }
 0x1b1   : > { %v1918_v12 = vadd.f32 %v1837_v33, %v1397_v44  ;;  %v2885_v44 = vor.u32 %v2884_v63, %v2881_v27  ;;  %2411 = vmatmul.bf16.gmra.mxu3 %v2236_v41  ;;  %v2891_v27 = vshll.u32 %v7415_v5, 16  ;;  %v8466_v41 = vld [vmem:[#allocation2 + $0x98] sm:$0xff] }
 0x1b2   : > { %v1318_v50 = vpop.f32.mrf.mxu1 }
 0x1b3   : > { %v2438_v25 = vadd.f32 %v8362_v61, %v1918_v12  ;;  %v1168_v61 = vor.u32 %v1166_v28, %v1164_v23  ;;  %v1398_v38 = vadd.f32 %v1318_v50, %v8135_v49  ;;  %v2886_v62 = vsel %vm2716_vm2, %v2876_v29, %v2885_v44  ;;  %v7533_v49 = vld [vmem:[%s9290_s1 + $0x200] sm:$0xff] }
 0x1b4   : > { %5227 = vmatpush.bf16.msra.mxu0 %v7533_v49 }
 0x1b5   : > { %v3034_v14 = vpop.f32.mrf.mxu0  ;;  %v8445_v7 = vadd.f32 %v3032_v30, %v2438_v25  ;;  %v1173_v12 = vsel %vm1025_vm1, %v1168_v61, %v1172_v16  ;;  %v8452_v30 = vpop.f32.mrf.mxu3  ;;  %v2888_v25 = vshrl.u32 %v7415_v5, 16  ;;  %v1178_v61 = vshll.u32 %v8461_v11, 16 }
 0x1b6   : > { %v9294_v5 = vrot.slane %v8466_v41, 1 }
 0x1b8   : > { %v1839_v47 = vpop.f32.mrf.mxu2 }
 0x1b9   : > { %v1919_v42 = vadd.f32 %v1839_v47, %v1398_v38 }
 0x1ba   : > { %v1321_v33 = vpop.f32.mrf.mxu1 }
 0x1bb   : > { %v2439_v23 = vadd.f32 %v8384_v13, %v1919_v42  ;;  %v1399_v39 = vadd.f32 %v1321_v33, %v8144_v6  ;;  %v2070_v13 = vld [vmem:[#allocation2 + $0xb0] sm:$0x1]  ;;  %v2890_v42 = vrot.slane %v2888_v25, 1  ;;  %v2893_v33 = vrot.slane %v2891_v27, 2 }
 0x1bc   : > { %v2173_v29 = vunpack.c.l.b16 %v2070_v13 }
 0x1bd   : > { %v3037_v28 = vpop.f32.mrf.mxu0  ;;  %1360 = vmatmul.bf16.gmra.mxu1 %v1173_v12  ;;  %1881 = vmatmul.bf16.gmra.mxu2 %v1712_v26  ;;  %v8459_v50 = vadd.f32 %v3034_v14, %v2439_v23  ;;  %v8468_v14 = vpop.f32.mrf.mxu3  ;;  %v1176_v23 = vor.u32 %v1174_v8, %v1172_v16  ;;  %v7483_v8 = vld [vmem:[#allocation2 + $0x10] sm:$0xf0] }
 0x1be   : > { %v2195_v38 = vpack.c.b16 %v2173_v29, %v2173_v29 }
 0x1c0   : > { %3076 = vmatmul.bf16.gmra.mxu0 %v2886_v62  ;;  %v1842_v63 = vpop.f32.mrf.mxu2  ;;  %v2237_v12 = vrot.slane %v2195_v38, 1  ;;  %v1180_v62 = vrot.slane %v1178_v61, 1  ;;  %v7484_v38 = vld [vmem:[#allocation2 + $0x18] sm:$0xff] }
 0x1c1   : > { %v1920_v35 = vadd.f32 %v1842_v63, %v1399_v39  ;;  %v8476_v39 = vor.u32 %v2893_v33, %v2890_v42 }
 0x1c2   : > { %v1323_v45 = vpop.f32.mrf.mxu1  ;;  %v2238_v52 = vsel %vm1675_vm0, %v2235_v31, %v2237_v12  ;;  %v1181_v25 = vsel %vm1025_vm1, %v1176_v23, %v1180_v62  ;;  %v7416_v31 = vld [vmem:[#allocation2 + $0xa8] sm:$0xff] }
 0x1c3   : > { %v2440_v47 = vadd.f32 %v8397_v18, %v1920_v35  ;;  %v1400_v49 = vadd.f32 %v1323_v45, %v8155_v22  ;;  %2416 = vmatmul.bf16.gmra.mxu3 %v2238_v52  ;;  %v2895_v22 = vsel %vm2716_vm2, %v2885_v44, %v8476_v39  ;;  %v8487_v35 = vld [vmem:[#allocation2 + $0xa0] sm:$0xff]  ;;  %v7031_v45 = vld [vmem:[#allocation2 + $0x10] sm:$0xc]  ;;  %v2897_v42 = vshrl.u32 %v7416_v31, 16 }
 0x1c4   : > { %v4442_v44 = vshrl.u32 %v7484_v38, 16  ;;  %v4445_v52 = vshll.u32 %v7484_v38, 16  ;;  %v2590_v38 = vld [vmem:[#allocation2 + $0xb0] sm:$0x3] }
 0x1c5   : > { %v3039_v6 = vpop.f32.mrf.mxu0  ;;  %v8471_v26 = vadd.f32 %v3037_v28, %v2440_v47  ;;  %v1714_v28 = vsel %vm1675_vm0, %v1711_v32, %v9294_v5  ;;  %v8482_v16 = vpop.f32.mrf.mxu3  ;;  %v7032_v32 = vor.u32 %v7483_v8, %v7031_v45  ;;  %v2899_v8 = vrot.slane %v2897_v42, 1 }
 0x1c7   : > { %9308 = vst [vmem:[#allocation19_spill] sm:$0xff] %v8471_v26  ;;  %v4434_v12 = vshrl.u32 %v7032_v32, 16  ;;  %v4437_v23 = vshll.u32 %v7032_v32, 16 }
 0x1c8   : > { %v1844_v13 = vpop.f32.mrf.mxu2 }
 0x1c9   : > { %v1921_v63 = vadd.f32 %v1844_v13, %v1400_v49  ;;  %v1182_v13 = vshrl.u32 %v8461_v11, 16 }
 0x1ca   : > { %v1326_v18 = vpop.f32.mrf.mxu1 }
 0x1cb   : > { %v2441_v27 = vadd.f32 %v8410_v55, %v1921_v63  ;;  %v1401_v47 = vadd.f32 %v1326_v18, %v8164_v43  ;;  %v2900_v55 = vshll.u32 %v7416_v31, 16  ;;  %v1186_v63 = vshll.u32 %v8487_v35, 16 }
 0x1cc   : > { %v4444_v43 = vrot.slane %v4442_v44, 2  ;;  %v4447_v18 = vrot.slane %v4445_v52, 3  ;;  %v1184_v5 = vor.u32 %v1182_v13, %v1180_v62  ;;  %v899_v52 = vld [vmem:[#allocation2 + $0xa8] sm:$0x1] }
 0x1cd   : > { %v3042_v29 = vpop.f32.mrf.mxu0  ;;  %1365 = vmatmul.bf16.gmra.mxu1 %v1181_v25  ;;  %1886 = vmatmul.bf16.gmra.mxu2 %v1714_v28  ;;  %v8489_v61 = vadd.f32 %v3039_v6, %v2441_v27  ;;  %v8494_v6 = vld [vmem:[#allocation2 + $0xa0] sm:$0xff]  ;;  %v8496_v28 = vpop.f32.mrf.mxu3  ;;  %v4436_v27 = vrot.slane %v4434_v12, 2  ;;  %v2902_v32 = vrot.slane %v2900_v55, 2  ;;  %v1002_v13 = vunpack.c.l.b16 %v899_v52 }
 0x1ce   : > { %v4448_v11 = vor.u32 %v4447_v18, %v4444_v43  ;;  %v1715_v26 = vrot.slane %v8494_v6, 1 }
 0x1cf   : > { %9309 = vst [vmem:[#allocation20_spill] sm:$0xff] %v8489_v61  ;;  %v1188_v61 = vrot.slane %v1186_v63, 1  ;;  %v2903_v44 = vor.u32 %v2902_v32, %v2899_v8 }
 0x1d0   : > { %3081 = vmatmul.bf16.gmra.mxu0 %v2895_v22  ;;  %v1847_v33 = vpop.f32.mrf.mxu2  ;;  %v4439_v22 = vrot.slane %v4437_v23, 3 }
 0x1d1   : > { %v1922_v49 = vadd.f32 %v1847_v33, %v1401_v47 }
 0x1d2   : > { %v1328_v25 = vpop.f32.mrf.mxu1  ;;  %v4440_v47 = vor.u32 %v4439_v22, %v4436_v27  ;;  %v1189_v27 = vsel %vm1025_vm1, %v1184_v5, %v1188_v61  ;;  %v1024_v5 = vpack.c.b16 %v1002_v13, %v1002_v13 }
 0x1d3   : > { %v2442_v31 = vadd.f32 %v8420_v37, %v1922_v49  ;;  %v1402_v23 = vadd.f32 %v1328_v25, %v8184_v2  ;;  %v2693_v37 = vunpack.c.l.b16 %v2590_v38  ;;  %v2904_v2 = vsel %vm2716_vm2, %v8476_v39, %v2903_v44  ;;  %v1549_v25 = vld [vmem:[#allocation2 + $0xa8] sm:$0x1] }
 0x1d4   : > { %v4449_v12 = vsel %vm4432_vm3, %v4440_v47, %v4448_v11  ;;  %v1190_v39 = vshrl.u32 %v8487_v35, 16 }
 0x1d5   : > { %v3044_v45 = vpop.f32.mrf.mxu0  ;;  %v8499_v33 = vadd.f32 %v3042_v29, %v2442_v31  ;;  %4707 = vmatmul.bf16.vlgmr.msra.gmra.mxu3 %v4449_v12  ;;  %v9310_v29 = vrot.slane %v8466_v41, 1  ;;  %v8508_v63 = vpop.f32.mrf.mxu3  ;;  %v2715_v43 = vpack.c.b16 %v2693_v37, %v2693_v37  ;;  %v1652_v41 = vunpack.c.l.b16 %v1549_v25  ;;  %v7485_v31 = vld [vmem:[#allocation2 + $0x20] sm:$0xff] }
 0x1d6   : > { %v4454_v12 = vshll.u32 %v7485_v31, 16  ;;  %v1194_v37 = vshll.u32 %v1024_v5, 16 }
 0x1d7   : > { %v1716_v62 = vsel %vm1675_vm0, %v9310_v29, %v1715_v26  ;;  %v2906_v32 = vshrl.u32 %v2715_v43, 16  ;;  %v2909_v38 = vshll.u32 %v2715_v43, 16 }
 0x1d8   : > { %v1849_v42 = vpop.f32.mrf.mxu2  ;;  %v1196_v25 = vrot.slane %v1194_v37, 1  ;;  %v7454_v37 = vld [vmem:[#allocation2 + $0x10] sm:$0xf0] }
 0x1d9   : > { %v1923_v55 = vadd.f32 %v1849_v42, %v1402_v23  ;;  %v1674_v42 = vpack.c.b16 %v1652_v41, %v1652_v41  ;;  %v2908_v13 = vrot.slane %v2906_v32, 1 }
 0x1da   : > { %v1331_v49 = vpop.f32.mrf.mxu1 }
 0x1db   : > { %v2443_v6 = vadd.f32 %v8433_v58, %v1923_v55  ;;  %v1403_v8 = vadd.f32 %v1331_v49, %v8196_v46  ;;  %v4451_v58 = vshrl.u32 %v7485_v31, 16  ;;  %v2911_v46 = vrot.slane %v2909_v38, 2 }
 0x1dc   : > { %v1717_v43 = vrot.slane %v1674_v42, 1  ;;  %v7163_v42 = vld [vmem:[#allocation2 + $0x10] sm:$0x8] }
 0x1dd   : > { %v3047_v22 = vpop.f32.mrf.mxu0  ;;  %1370 = vmatmul.bf16.gmra.mxu1 %v1189_v27  ;;  %1891 = vmatmul.bf16.gmra.mxu2 %v1716_v62  ;;  %v8513_v18 = vadd.f32 %v3044_v45, %v2443_v6  ;;  %v8517_v55 = vpop.f32.mrf.mxu3  ;;  %v4453_v45 = vrot.slane %v4451_v58, 2  ;;  %v4456_v27 = vrot.slane %v4454_v12, 3  ;;  %v2912_v41 = vor.u32 %v2911_v46, %v2908_v13  ;;  %v7425_v12 = vld [vmem:[#allocation2 + $0x8] sm:$0xf0]  ;;  %v8533_v46 = vld [vmem:[#allocation2 + $0x10] sm:$0xff] }
 0x1de   : > { %v1718_v32 = vsel %vm1675_vm0, %v1715_v26, %v1717_v43 }
 0x1df   : > { %v4457_v49 = vor.u32 %v4456_v27, %v4453_v45  ;;  %v2913_v58 = vsel %vm2716_vm2, %v2903_v44, %v2912_v41  ;;  %v7512_v45 = vld [vmem:[#allocation2 + $0x10] sm:$0xf0]  ;;  %v7513_v41 = vld [vmem:[#allocation2 + $0x18] sm:$0xff] }
 0x1e0   : > { %3086 = vmatmul.bf16.gmra.mxu0 %v2904_v2  ;;  %v1852_v47 = vpop.f32.mrf.mxu2  ;;  %v1192_v2 = vor.u32 %v1190_v39, %v1188_v61 }
 0x1e1   : > { %v1924_v23 = vadd.f32 %v1852_v47, %v1403_v8  ;;  %v4458_v35 = vsel %vm4432_vm3, %v4448_v11, %v4457_v49 }
 0x1e2   : > { %v1333_v52 = vpop.f32.mrf.mxu1 }
 0x1e3   : > { %v2444_v29 = vadd.f32 %v8452_v30, %v1924_v23  ;;  %v1404_v5 = vadd.f32 %v1333_v52, %v8207_v10  ;;  %v1197_v30 = vsel %vm1025_vm1, %v1192_v2, %v1196_v25  ;;  %v6767_v10 = vld [vmem:[#allocation2 + $0x8] sm:$0xc]  ;;  %v6899_v52 = vld [vmem:[#allocation2 + $0x10] sm:$0xc] }
 0x1e4   : > { %v7486_v23 = vld [vmem:[#allocation2 + $0x28] sm:$0xff]  ;;  %v6768_v13 = vor.u32 %v7425_v12, %v6767_v10  ;;  %v6900_v2 = vor.u32 %v7454_v37, %v6899_v52 }
 0x1e5   : > { %v3049_v62 = vpop.f32.mrf.mxu0  ;;  %v8520_v6 = vadd.f32 %v3047_v22, %v2444_v29  ;;  %4712 = vmatmul.bf16.gmra.mxu3 %v4458_v35  ;;  %v8526_v38 = vpop.f32.mrf.mxu3  ;;  %v4460_v27 = vshrl.u32 %v7486_v23, 16 }
 0x1e7   : > { %v4462_v43 = vrot.slane %v4460_v27, 2 }
 0x1e8   : > { %v1854_v31 = vpop.f32.mrf.mxu2 }
 0x1e9   : > { %v1925_v8 = vadd.f32 %v1854_v31, %v1404_v5  ;;  %v7164_v31 = vor.u32 %v7512_v45, %v7163_v42 }
 0x1ea   : > { %v1336_v47 = vpop.f32.mrf.mxu1 }
 0x1eb   : > { %v2445_v22 = vadd.f32 %v8468_v14, %v1925_v8  ;;  %v1405_v39 = vadd.f32 %v1336_v47, %v8083_v53  ;;  %v4463_v14 = vshll.u32 %v7486_v23, 16  ;;  %v3392_v47 = vrot.slane %v6768_v13, 2 }
 0x1ec   : > { %v5108_v23 = vrot.slane %v7164_v31, 3 }
 0x1ed   : > { %v3052_v61 = vpop.f32.mrf.mxu0  ;;  %1375 = vmatmul.bf16.gmra.mxu1 %v1197_v30  ;;  %1896 = vmatmul.bf16.gmra.mxu2 %v1718_v32  ;;  %v8530_v11 = vadd.f32 %v3049_v62, %v2445_v22  ;;  %v8535_v62 = vld [vmem:[#allocation2 + $0x18] sm:$0xff]  ;;  %v8537_v25 = vpop.f32.mrf.mxu3  ;;  %v4465_v35 = vrot.slane %v4463_v14, 3  ;;  %v3393_v32 = vrot.slane %v8533_v46, 2  ;;  %v3912_v22 = vrot.slane %v6900_v2, 2  ;;  %v7487_v14 = vld [vmem:[#allocation2 + $0x30] sm:$0xff] }
 0x1ee   : > { %v4472_v46 = vshll.u32 %v7487_v14, 16 }
 0x1ef   : > { %v4466_v8 = vor.u32 %v4465_v35, %v4462_v43  ;;  %v7427_v43 = vld [vmem:[#allocation2 + $0x18] sm:$0xff]  ;;  %v7456_v35 = vld [vmem:[#allocation2 + $0x20] sm:$0xff] }
 0x1f0   : > { %3091 = vmatmul.bf16.gmra.mxu0 %v2913_v58  ;;  %v1857_v26 = vpop.f32.mrf.mxu2  ;;  %v3913_v58 = vrot.slane %v8535_v62, 2 }
 0x1f1   : > { %v1926_v29 = vadd.f32 %v1857_v26, %v1405_v39  ;;  %v4467_v10 = vsel %vm4432_vm3, %v4457_v49, %v4466_v8  ;;  %v5109_v39 = vrot.slane %v7513_v41, 3  ;;  %v4474_v41 = vrot.slane %v4472_v46, 3 }
 0x1f2   : > { %v1338_v44 = vpop.f32.mrf.mxu1  ;;  %v3914_v26 = vsel %vm3391_vm4, %v3912_v22, %v3913_v58 }
 0x1f3   : > { %v2446_v53 = vadd.f32 %v8482_v16, %v1926_v29  ;;  %v1406_v12 = vadd.f32 %v1338_v44, %v8090_v4  ;;  %v5110_v49 = vsel %vm5107_vm5, %v5108_v23, %v5109_v39  ;;  %v4469_v44 = vshrl.u32 %v7487_v14, 16 }
 0x1f5   : > { %v3054_v5 = vpop.f32.mrf.mxu0  ;;  %v8540_v30 = vadd.f32 %v3052_v61, %v2446_v53  ;;  %4717 = vmatmul.bf16.gmra.mxu3 %v4467_v10  ;;  %v3394_v61 = vsel %vm3391_vm4, %v3392_v47, %v3393_v32  ;;  %v8548_v42 = vpop.f32.mrf.mxu3 }
 0x1f8   : > { %v1859_v16 = vpop.f32.mrf.mxu2 }
 0x1f9   : > { %v1927_v52 = vadd.f32 %v1859_v16, %v1406_v12  ;;  %v3395_v12 = vrot.slane %v7427_v43, 2  ;;  %v7457_v43 = vld [vmem:[#allocation2 + $0x28] sm:$0xff] }
 0x1fa   : > { %v1341_v37 = vpop.f32.mrf.mxu1 }
 0x1fb   : > { %v2447_v45 = vadd.f32 %v8496_v28, %v1927_v52  ;;  %v1407_v29 = vadd.f32 %v1341_v37, %v8101_v15  ;;  %v4471_v28 = vrot.slane %v4469_v44, 2  ;;  %v3915_v15 = vrot.slane %v7456_v35, 2 }
 0x1fd   : > { %v3057_v27 = vpop.f32.mrf.mxu0  ;;  %3512 = vmatmul.bf16.vlgmr.msra.gmra.mxu1 %v3394_v61  ;;  %4032 = vmatmul.bf16.vlgmr.msra.gmra.mxu2 %v3914_v26  ;;  %v8552_v4 = vadd.f32 %v3054_v5, %v2447_v45  ;;  %v8555_v53 = vpop.f32.mrf.mxu3  ;;  %v7514_v5 = vld [vmem:[#allocation2 + $0x20] sm:$0xff]  ;;  %v4475_v22 = vor.u32 %v4474_v41, %v4471_v28  ;;  %v3396_v45 = vsel %vm3391_vm4, %v3393_v32, %v3395_v12 }
 0x1fe   : > { %v5111_v52 = vrot.slane %v7514_v5, 3 }
 0x1ff   : > { %v4476_v23 = vsel %vm4432_vm3, %v4466_v8, %v4475_v22 }
 0x200   : > { %5228 = vmatmul.bf16.vlgmr.msra.gmra.mxu0 %v5110_v49  ;;  %v1862_v13 = vpop.f32.mrf.mxu2 }
 0x201   : > { %v1928_v62 = vadd.f32 %v1862_v13, %v1407_v29  ;;  %v5112_v29 = vsel %vm5107_vm5, %v5109_v39, %v5111_v52 }
 0x202   : > { %v1343_v2 = vpop.f32.mrf.mxu1 }
 0x203   : > { %v2448_v31 = vadd.f32 %v8508_v63, %v1928_v62  ;;  %v1408_v16 = vadd.f32 %v1343_v2, %v8119_v34  ;;  %v3916_v63 = vsel %vm3391_vm4, %v3913_v58, %v3915_v15  ;;  %v7488_v34 = vld [vmem:[#allocation2 + $0x38] sm:$0xff]  ;;  %v7428_v2 = vld [vmem:[#allocation2 + $0x20] sm:$0xff] }
 0x204   : > { %v4478_v46 = vshrl.u32 %v7488_v34, 16  ;;  %v4481_v32 = vshll.u32 %v7488_v34, 16 }
 0x205   : > { %v3059_v47 = vpop.f32.mrf.mxu0  ;;  %v8558_v10 = vadd.f32 %v3057_v27, %v2448_v31  ;;  %4722 = vmatmul.bf16.gmra.mxu3 %v4476_v23  ;;  %v8564_v49 = vpop.f32.mrf.mxu3  ;;  %v7515_v31 = vld [vmem:[#allocation2 + $0x28] sm:$0xff]  ;;  %v3397_v23 = vrot.slane %v7428_v2, 2  ;;  %v7458_v2 = vld [vmem:[#allocation2 + $0x30] sm:$0xff] }
 0x206   : > { %v4483_v28 = vrot.slane %v4481_v32, 3 }
 0x208   : > { %v1864_v37 = vpop.f32.mrf.mxu2 }
 0x209   : > { %v1929_v61 = vadd.f32 %v1864_v37, %v1408_v16 }
 0x20a   : > { %v1346_v26 = vpop.f32.mrf.mxu1 }
 0x20b   : > { %v2449_v27 = vadd.f32 %v8517_v55, %v1929_v61  ;;  %v1409_v13 = vadd.f32 %v1346_v26, %v8133_v48  ;;  %v4480_v55 = vrot.slane %v4478_v46, 2  ;;  %v3917_v48 = vrot.slane %v7457_v43, 2 }
 0x20c   : > { %v5113_v61 = vrot.slane %v7515_v31, 3 }
 0x20d   : > { %v3062_v14 = vpop.f32.mrf.mxu0  ;;  %3517 = vmatmul.bf16.gmra.mxu1 %v3396_v45  ;;  %4037 = vmatmul.bf16.gmra.mxu2 %v3916_v63  ;;  %v8568_v8 = vadd.f32 %v3059_v47, %v2449_v27  ;;  %v8571_v35 = vpop.f32.mrf.mxu3  ;;  %v4484_v47 = vor.u32 %v4483_v28, %v4480_v55  ;;  %v3398_v27 = vsel %vm3391_vm4, %v3395_v12, %v3397_v23 }
 0x20f   : > { %v4485_v16 = vsel %vm4432_vm3, %v4475_v22, %v4484_v47 }
 0x210   : > { %5233 = vmatmul.bf16.gmra.mxu0 %v5112_v29  ;;  %v1867_v44 = vpop.f32.mrf.mxu2 }
 0x211   : > { %v1930_v62 = vadd.f32 %v1867_v44, %v1409_v13  ;;  %v5114_v13 = vsel %vm5107_vm5, %v5111_v52, %v5113_v61 }
 0x212   : > { %v1348_v58 = vpop.f32.mrf.mxu1 }
 0x213   : > { %v2450_v39 = vadd.f32 %v8526_v38, %v1930_v62  ;;  %v1410_v37 = vadd.f32 %v1348_v58, %v8142_v3  ;;  %v3918_v38 = vsel %vm3391_vm4, %v3915_v15, %v3917_v48  ;;  %v7489_v3 = vld [vmem:[#allocation2 + $0x40] sm:$0xff]  ;;  %v7429_v58 = vld [vmem:[#allocation2 + $0x28] sm:$0xff] }
 0x214   : > { %v4487_v32 = vshrl.u32 %v7489_v3, 16  ;;  %v4490_v12 = vshll.u32 %v7489_v3, 16 }
 0x215   : > { %v3064_v41 = vpop.f32.mrf.mxu0  ;;  %v8574_v5 = vadd.f32 %v3062_v14, %v2450_v39  ;;  %4727 = vmatmul.bf16.gmra.mxu3 %v4485_v16  ;;  %v8580_v29 = vpop.f32.mrf.mxu3  ;;  %v7516_v39 = vld [vmem:[#allocation2 + $0x30] sm:$0xff]  ;;  %v3399_v16 = vrot.slane %v7429_v58, 2 }
 0x216   : > { %v4492_v55 = vrot.slane %v4490_v12, 3  ;;  %v9312_v12 = vld [vmem:[#allocation14_spill] sm:$0xff] }
 0x218   : > { %v1869_v26 = vpop.f32.mrf.mxu2 }
 0x219   : > { %v1931_v45 = vadd.f32 %v1869_v26, %v1410_v37  ;;  %v9311_v26 = vld [vmem:[#allocation13_spill] sm:$0xff] }
 0x21a   : > { %v1351_v63 = vpop.f32.mrf.mxu1 }
 0x21b   : > { %v2451_v14 = vadd.f32 %v8537_v25, %v1931_v45  ;;  %v1411_v44 = vadd.f32 %v1351_v63, %v8153_v20  ;;  %v4489_v25 = vrot.slane %v4487_v32, 2  ;;  %v3919_v20 = vrot.slane %v7458_v2, 2  ;;  %v7490_v32 = vld [vmem:[#allocation2 + $0x48] sm:$0xff] }
 0x21c   : > { %v5115_v63 = vrot.slane %v7516_v39, 3  ;;  %v4496_v58 = vshrl.u32 %v7490_v32, 16 }
 0x21d   : > { %v3067_v34 = vpop.f32.mrf.mxu0  ;;  %3522 = vmatmul.bf16.gmra.mxu1 %v3398_v27  ;;  %4042 = vmatmul.bf16.gmra.mxu2 %v3918_v38  ;;  %v8584_v22 = vadd.f32 %v3064_v41, %v2451_v14  ;;  %v8587_v43 = vpop.f32.mrf.mxu3  ;;  %v4493_v41 = vor.u32 %v4492_v55, %v4489_v25  ;;  %v7430_v25 = vld [vmem:[#allocation2 + $0x30] sm:$0xff]  ;;  %v7459_v55 = vld [vmem:[#allocation2 + $0x38] sm:$0xff] }
 0x21f   : > { %v4494_v37 = vsel %vm4432_vm3, %v4484_v47, %v4493_v41 }
 0x220   : > { %5238 = vmatmul.bf16.gmra.mxu0 %v5114_v13  ;;  %v1872_v46 = vpop.f32.mrf.mxu2  ;;  %v3400_v13 = vsel %vm3391_vm4, %v3397_v23, %v3399_v16  ;;  %v4499_v23 = vshll.u32 %v7490_v32, 16 }
 0x221   : > { %v1932_v62 = vadd.f32 %v1872_v46, %v1411_v44  ;;  %v5116_v46 = vsel %vm5107_vm5, %v5113_v61, %v5115_v63 }
 0x222   : > { %v1353_v15 = vpop.f32.mrf.mxu1  ;;  %v4501_v39 = vrot.slane %v4499_v23, 3 }
 0x223   : > { %v2452_v52 = vadd.f32 %v8548_v42, %v1932_v62  ;;  %v1412_v45 = vadd.f32 %v1353_v15, %v9311_v26  ;;  %v3920_v42 = vsel %vm3391_vm4, %v3917_v48, %v3919_v20 }
 0x225   : > { %v3069_v28 = vpop.f32.mrf.mxu0  ;;  %v8590_v31 = vadd.f32 %v3067_v34, %v2452_v52  ;;  %4732 = vmatmul.bf16.gmra.mxu3 %v4494_v37  ;;  %v8596_v3 = vpop.f32.mrf.mxu3 }
 0x228   : > { %v1874_v27 = vpop.f32.mrf.mxu2 }
 0x229   : > { %v1933_v38 = vadd.f32 %v1874_v27, %v1412_v45  ;;  %v3401_v27 = vrot.slane %v7430_v25, 2 }
 0x22a   : > { %v1356_v14 = vpop.f32.mrf.mxu1 }
 0x22b   : > { %v2453_v34 = vadd.f32 %v8555_v53, %v1933_v38  ;;  %v1413_v62 = vadd.f32 %v1356_v14, %v9312_v12  ;;  %v4498_v53 = vrot.slane %v4496_v58, 2  ;;  %v3921_v38 = vrot.slane %v7459_v55, 2 }
 0x22d   : > { %v3072_v44 = vpop.f32.mrf.mxu0  ;;  %3527 = vmatmul.bf16.gmra.mxu1 %v3400_v13  ;;  %4047 = vmatmul.bf16.gmra.mxu2 %v3920_v42  ;;  %v8600_v47 = vadd.f32 %v3069_v28, %v2453_v34  ;;  %v8603_v52 = vpop.f32.mrf.mxu3  ;;  %v7517_v28 = vld [vmem:[#allocation2 + $0x38] sm:$0xff]  ;;  %v4502_v26 = vor.u32 %v4501_v39, %v4498_v53 }
 0x22e   : > { %v9314_v13 = vld [vmem:[#allocation15_spill] sm:$0xff]  ;;  %v5117_v34 = vrot.slane %v7517_v28, 3 }
 0x22f   : > { %v4503_v14 = vsel %vm4432_vm3, %v4493_v41, %v4502_v26  ;;  %v7460_v28 = vld [vmem:[#allocation2 + $0x40] sm:$0xff] }
 0x230   : > { %5243 = vmatmul.bf16.gmra.mxu0 %v5116_v46  ;;  %v1877_v15 = vpop.f32.mrf.mxu2  ;;  %v5118_v23 = vsel %vm5107_vm5, %v5115_v63, %v5117_v34 }
 0x231   : > { %v1934_v2 = vadd.f32 %v1877_v15, %v1413_v62  ;;  %v3402_v62 = vsel %vm3391_vm4, %v3399_v16, %v3401_v27 }
 0x232   : > { %v1358_v48 = vpop.f32.mrf.mxu1 }
 0x233   : > { %v2454_v61 = vadd.f32 %v8564_v49, %v1934_v2  ;;  %v1414_v42 = vadd.f32 %v1358_v48, %v9314_v13  ;;  %v3922_v49 = vsel %vm3391_vm4, %v3919_v20, %v3921_v38  ;;  %v7491_v2 = vld [vmem:[#allocation2 + $0x50] sm:$0xff]  ;;  %v9316_v48 = vld [vmem:[#allocation16_spill] sm:$0xff] }
 0x234   : > { %v4505_v53 = vshrl.u32 %v7491_v2, 16  ;;  %v4508_v16 = vshll.u32 %v7491_v2, 16 }
 0x235   : > { %v3074_v37 = vpop.f32.mrf.mxu0  ;;  %v8606_v45 = vadd.f32 %v3072_v44, %v2454_v61  ;;  %4737 = vmatmul.bf16.gmra.mxu3 %v4503_v14  ;;  %v8612_v15 = vpop.f32.mrf.mxu3  ;;  %v7431_v61 = vld [vmem:[#allocation2 + $0x38] sm:$0xff] }
 0x236   : > { %v4510_v13 = vrot.slane %v4508_v16, 3 }
 0x237   : > { %9313 = vst [vmem:[#allocation13_spill] sm:$0xff] %v8606_v45 }
 0x238   : > { %v1879_v46 = vpop.f32.mrf.mxu2 }
 0x239   : > { %v1935_v32 = vadd.f32 %v1879_v46, %v1414_v42 }
 0x23a   : > { %v1361_v12 = vpop.f32.mrf.mxu1 }
 0x23b   : > { %v2455_v44 = vadd.f32 %v8571_v35, %v1935_v32  ;;  %v1415_v25 = vadd.f32 %v1361_v12, %v9316_v48  ;;  %v4507_v35 = vrot.slane %v4505_v53, 2  ;;  %v3923_v12 = vrot.slane %v7460_v28, 2  ;;  %v9320_v28 = vld [vmem:[#allocation7_spill] sm:$0xff] }
 0x23d   : > { %v3077_v58 = vpop.f32.mrf.mxu0  ;;  %3532 = vmatmul.bf16.gmra.mxu1 %v3402_v62  ;;  %4052 = vmatmul.bf16.gmra.mxu2 %v3922_v49  ;;  %v8616_v41 = vadd.f32 %v3074_v37, %v2455_v44  ;;  %v8619_v14 = vpop.f32.mrf.mxu3  ;;  %v7518_v37 = vld [vmem:[#allocation2 + $0x40] sm:$0xff]  ;;  %v4511_v46 = vor.u32 %v4510_v13, %v4507_v35  ;;  %v3403_v62 = vrot.slane %v7431_v61, 2  ;;  %v9318_v44 = vld [vmem:[#allocation17_spill] sm:$0xff] }
 0x23e   : > { %v5119_v2 = vrot.slane %v7518_v37, 3 }
 0x23f   : > { %9315 = vst [vmem:[#allocation14_spill] sm:$0xff] %v8616_v41  ;;  %v4512_v49 = vsel %vm4432_vm3, %v4502_v26, %v4511_v46  ;;  %v3404_v53 = vsel %vm3391_vm4, %v3401_v27, %v3403_v62 }
 0x240   : > { %5248 = vmatmul.bf16.gmra.mxu0 %v5118_v23  ;;  %v1882_v55 = vpop.f32.mrf.mxu2  ;;  %v5120_v61 = vsel %vm5107_vm5, %v5117_v34, %v5119_v2 }
 0x241   : > { %v1936_v39 = vadd.f32 %v1882_v55, %v1415_v25 }
 0x242   : > { %v1363_v20 = vpop.f32.mrf.mxu1 }
 0x243   : > { %v2456_v63 = vadd.f32 %v8580_v29, %v1936_v39  ;;  %v1416_v23 = vadd.f32 %v1363_v20, %v9318_v44  ;;  %v3924_v29 = vsel %vm3391_vm4, %v3921_v38, %v3923_v12  ;;  %v7492_v20 = vld [vmem:[#allocation2 + $0x58] sm:$0xff]  ;;  %v7461_v44 = vld [vmem:[#allocation2 + $0x48] sm:$0xff] }
 0x244   : > { %v4517_v27 = vshll.u32 %v7492_v20, 16 }
 0x245   : > { %v3079_v42 = vpop.f32.mrf.mxu0  ;;  %v8622_v32 = vadd.f32 %v3077_v58, %v2456_v63  ;;  %4742 = vmatmul.bf16.gmra.mxu3 %v4512_v49  ;;  %v4514_v63 = vshrl.u32 %v7492_v20, 16  ;;  %v7432_v49 = vld [vmem:[#allocation2 + $0x40] sm:$0xff] }
 0x246   : > { %v8628_v16 = vpop.f32.mrf.mxu3  ;;  %v9322_v20 = vld [vmem:[#allocation8_spill] sm:$0xff] }
 0x247   : > { %9317 = vst [vmem:[#allocation15_spill] sm:$0xff] %v8622_v32 }
 0x248   : > { %v1884_v48 = vpop.f32.mrf.mxu2 }
 0x249   : > { %v1937_v25 = vadd.f32 %v1884_v48, %v1416_v23  ;;  %v4519_v48 = vrot.slane %v4517_v27, 3 }
 0x24a   : > { %v1366_v55 = vpop.f32.mrf.mxu1 }
 0x24b   : > { %v2457_v58 = vadd.f32 %v8587_v43, %v1937_v25  ;;  %v1417_v35 = vadd.f32 %v1366_v55, %v9320_v28  ;;  %v4516_v43 = vrot.slane %v4514_v63, 2  ;;  %v3925_v55 = vrot.slane %v7461_v44, 2  ;;  %v9324_v44 = vld [vmem:[#allocation9_spill] sm:$0xff] }
 0x24d   : > { %v3082_v39 = vpop.f32.mrf.mxu0  ;;  %3537 = vmatmul.bf16.gmra.mxu1 %v3404_v53  ;;  %4057 = vmatmul.bf16.gmra.mxu2 %v3924_v29  ;;  %v8632_v26 = vadd.f32 %v3079_v42, %v2457_v58  ;;  %v7519_v42 = vld [vmem:[#allocation2 + $0x48] sm:$0xff]  ;;  %v4520_v53 = vor.u32 %v4519_v48, %v4516_v43  ;;  %v3405_v58 = vrot.slane %v7432_v49, 2 }
 0x24e   : > { %v8635_v23 = vpop.f32.mrf.mxu3 }
 0x24f   : > { %9319 = vst [vmem:[#allocation16_spill] sm:$0xff] %v8632_v26  ;;  %v3406_v63 = vsel %vm3391_vm4, %v3403_v62, %v3405_v58 }
 0x250   : > { %5253 = vmatmul.bf16.gmra.mxu0 %v5120_v61  ;;  %v1887_v13 = vpop.f32.mrf.mxu2  ;;  %v4521_v61 = vsel %vm4432_vm3, %v4511_v46, %v4520_v53 }
 0x251   : > { %v1938_v37 = vadd.f32 %v1887_v13, %v1417_v35  ;;  %v5121_v35 = vrot.slane %v7519_v42, 3 }
 0x252   : > { %v1368_v38 = vpop.f32.mrf.mxu1 }
 0x253   : > { %v2458_v34 = vadd.f32 %v8596_v3, %v1938_v37  ;;  %v1418_v28 = vadd.f32 %v1368_v38, %v9322_v20  ;;  %v3926_v3 = vsel %vm3391_vm4, %v3923_v12, %v3925_v55  ;;  %v5122_v49 = vsel %vm5107_vm5, %v5119_v2, %v5121_v35  ;;  %v7493_v38 = vld [vmem:[#allocation2 + $0x60] sm:$0xff]  ;;  %v7462_v20 = vld [vmem:[#allocation2 + $0x50] sm:$0xff] }
 0x254   : > { %v4526_v62 = vshll.u32 %v7493_v38, 16 }
 0x255   : > { %v3084_v25 = vpop.f32.mrf.mxu0  ;;  %v8638_v29 = vadd.f32 %v3082_v39, %v2458_v34  ;;  %4747 = vmatmul.bf16.gmra.mxu3 %v4521_v61  ;;  %v4523_v34 = vshrl.u32 %v7493_v38, 16  ;;  %v7433_v61 = vld [vmem:[#allocation2 + $0x48] sm:$0xff]  ;;  %v9326_v38 = vld [vmem:[#allocation10_spill] sm:$0xff] }
 0x257   : > { %9321 = vst [vmem:[#allocation17_spill] sm:$0xff] %v8638_v29 }
 0x258   : > { %v1889_v13 = vpop.f32.mrf.mxu2  ;;  %v8644_v27 = vpop.f32.mrf.mxu3 }
 0x259   : > { %v1939_v26 = vadd.f32 %v1889_v13, %v1418_v28 }
 0x25a   : > { %v1371_v32 = vpop.f32.mrf.mxu1 }
 0x25b   : > { %v2459_v39 = vadd.f32 %v8603_v52, %v1939_v26  ;;  %v1419_v43 = vadd.f32 %v1371_v32, %v9324_v44  ;;  %v4525_v52 = vrot.slane %v4523_v34, 2  ;;  %v4528_v26 = vrot.slane %v4526_v62, 3 }
 0x25c   : > { %v3927_v32 = vrot.slane %v7462_v20, 2  ;;  %v9328_v20 = vld [vmem:[#allocation11_spill] sm:$0xff] }
 0x25d   : > { %v3087_v37 = vpop.f32.mrf.mxu0  ;;  %3542 = vmatmul.bf16.gmra.mxu1 %v3406_v63  ;;  %4062 = vmatmul.bf16.gmra.mxu2 %v3926_v3  ;;  %v8648_v46 = vadd.f32 %v3084_v25, %v2459_v39  ;;  %v7520_v25 = vld [vmem:[#allocation2 + $0x50] sm:$0xff]  ;;  %v4529_v63 = vor.u32 %v4528_v26, %v4525_v52  ;;  %v3407_v39 = vrot.slane %v7433_v61, 2 }
 0x25f   : > { %9323 = vst [vmem:[#allocation7_spill] sm:$0xff] %v8648_v46  ;;  %v3408_v34 = vsel %vm3391_vm4, %v3405_v58, %v3407_v39 }
 0x260   : > { %5258 = vmatmul.bf16.gmra.mxu0 %v5122_v49  ;;  %v1892_v48 = vpop.f32.mrf.mxu2  ;;  %v8651_v28 = vpop.f32.mrf.mxu3  ;;  %v4530_v49 = vsel %vm4432_vm3, %v4520_v53, %v4529_v63 }
 0x261   : > { %v1940_v42 = vadd.f32 %v1892_v48, %v1419_v43  ;;  %v5123_v43 = vrot.slane %v7520_v25, 3 }
 0x262   : > { %v1373_v12 = vpop.f32.mrf.mxu1 }
 0x263   : > { %v2460_v2 = vadd.f32 %v8612_v15, %v1940_v42  ;;  %v1420_v44 = vadd.f32 %v1373_v12, %v9326_v38  ;;  %v3928_v15 = vsel %vm3391_vm4, %v3925_v55, %v3927_v32  ;;  %v5124_v61 = vsel %vm5107_vm5, %v5121_v35, %v5123_v43  ;;  %v7494_v12 = vld [vmem:[#allocation2 + $0x68] sm:$0xff]  ;;  %v8669_v38 = vld [vmem:[#allocation2 + $0x58] sm:$0xff] }
 0x264   : > { %v4535_v58 = vshll.u32 %v7494_v12, 16 }
 0x265   : > { %v3089_v13 = vpop.f32.mrf.mxu0  ;;  %v8654_v3 = vadd.f32 %v3087_v37, %v2460_v2  ;;  %4752 = vmatmul.bf16.gmra.mxu3 %v4530_v49  ;;  %v4532_v2 = vshrl.u32 %v7494_v12, 16  ;;  %v8667_v49 = vld [vmem:[#allocation2 + $0x50] sm:$0xff]  ;;  %v9330_v12 = vld [vmem:[#allocation12_spill] sm:$0xff] }
 0x267   : > { %9325 = vst [vmem:[#allocation8_spill] sm:$0xff] %v8654_v3  ;;  %v4534_v35 = vrot.slane %v4532_v2, 2 }
 0x268   : > { %v1894_v48 = vpop.f32.mrf.mxu2  ;;  %v8660_v62 = vpop.f32.mrf.mxu3 }
 0x269   : > { %v1941_v46 = vadd.f32 %v1894_v48, %v1420_v44  ;;  %v8674_v48 = vld [vmem:[#allocation2 + $0x58] sm:$0xff] }
 0x26a   : > { %v1376_v29 = vpop.f32.mrf.mxu1 }
 0x26b   : > { %v2461_v37 = vadd.f32 %v8619_v14, %v1941_v46  ;;  %v1421_v52 = vadd.f32 %v1376_v29, %v9328_v20  ;;  %v4537_v46 = vrot.slane %v4535_v58, 3 }
 0x26d   : > { %v3092_v42 = vpop.f32.mrf.mxu0  ;;  %3547 = vmatmul.bf16.gmra.mxu1 %v3408_v34  ;;  %4067 = vmatmul.bf16.gmra.mxu2 %v3928_v15  ;;  %v8664_v53 = vadd.f32 %v3089_v13, %v2461_v37  ;;  %v4538_v34 = vor.u32 %v4537_v46, %v4534_v35  ;;  %v3409_v15 = vrot.slane %v8667_v49, 2  ;;  %v3929_v37 = vrot.slane %v8669_v38, 2 }
 0x26f   : > { %9327 = vst [vmem:[#allocation9_spill] sm:$0xff] %v8664_v53  ;;  %v3410_v58 = vsel %vm3391_vm4, %v3407_v39, %v3409_v15 }
 0x270   : > { %5263 = vmatmul.bf16.gmra.mxu0 %v5124_v61  ;;  %v1897_v26 = vpop.f32.mrf.mxu2  ;;  %v8671_v14 = vpop.f32.mrf.mxu3  ;;  %v4539_v61 = vsel %vm4432_vm3, %v4529_v63, %v4538_v34 }
 0x271   : > { %v1942_v25 = vadd.f32 %v1897_v26, %v1421_v52  ;;  %v5125_v52 = vrot.slane %v8674_v48, 3 }
 0x272   : > { %v1378_v55 = vpop.f32.mrf.mxu1 }
 0x273   : > { %v2462_v13 = vadd.f32 %v8628_v16, %v1942_v25  ;;  %v1422_v20 = vadd.f32 %v1378_v55, %v9330_v12  ;;  %v3930_v25 = vsel %vm3391_vm4, %v3927_v32, %v3929_v37  ;;  %v5126_v38 = vsel %vm5107_vm5, %v5123_v43, %v5125_v52  ;;  %v7495_v55 = vld [vmem:[#allocation2 + $0x70] sm:$0xff]  ;;  %v5552_v32 = vld [vmem:[#allocation2 + $0x8] sm:$0xe] }
 0x274   : > { %v4541_v48 = vshrl.u32 %v7495_v55, 16  ;;  %v4544_v39 = vshll.u32 %v7495_v55, 16  ;;  %v5595_v55 = vunpack.c.l.bf16 %v5552_v32  ;;  %v8718_v32 = vld [vmem:[%s9292_s3] ss:$0 sm:$0xff] }
 0x275   : > { %v3094_v44 = vpop.f32.mrf.mxu0  ;;  %v8676_v29 = vadd.f32 %v3092_v42, %v2462_v13  ;;  %4757 = vmatmul.bf16.gmra.mxu3 %v4539_v61 }
 0x276   : > { %v4543_v43 = vrot.slane %v4541_v48, 2  ;;  %v5682_v48 = vrot.slane %v5595_v55, 3 }
 0x277   : > { %9329 = vst [vmem:[#allocation10_spill] sm:$0xff] %v8676_v29 }
 0x278   : > { %v1899_v26 = vpop.f32.mrf.mxu2  ;;  %v8685_v42 = vpop.f32.mrf.mxu3 }
 0x279   : > { %v1943_v2 = vadd.f32 %v1899_v26, %v1422_v20  ;;  %v8692_v20 = vld [vmem:[#allocation2 + $0x58] sm:$0xff] }
 0x27a   : > { %v3513_v16 = vpop.f32.mrf.mxu1 }
 0x27b   : > { %v2463_v49 = vadd.f32 %v8635_v23, %v1943_v2  ;;  %v3618_v46 = vadd.f32 %v3513_v16, %v8236_v0  ;;  %v8694_v23 = vld [vmem:[#allocation2 + $0x60] sm:$0xff]  ;;  %v4546_v2 = vrot.slane %v4544_v39, 3 }
 0x27d   : > { %v5229_v35 = vpop.f32.mrf.mxu0  ;;  %3552 = vmatmul.bf16.gmra.mxu1 %v3410_v58  ;;  %4072 = vmatmul.bf16.gmra.mxu2 %v3930_v25  ;;  %v8689_v63 = vadd.f32 %v3094_v44, %v2463_v49  ;;  %v5553_v58 = vld [vmem:[#allocation2 + $0xc] sm:$0xf]  ;;  %v8699_v49 = vld [vmem:[#allocation2 + $0x60] sm:$0xff]  ;;  %v4547_v0 = vor.u32 %v4546_v2, %v4543_v43 }
 0x27e   : > { %v9335_v3 = vrot.slane %v8699_v49, 3 }
 0x27f   : > { %9331 = vst [vmem:[#allocation11_spill] sm:$0xff] %v8689_v63 }
 0x280   : > { %5268 = vmatmul.bf16.gmra.mxu0 %v5126_v38  ;;  %v4033_v13 = vpop.f32.mrf.mxu2  ;;  %v8696_v26 = vpop.f32.mrf.mxu3  ;;  %v8704_v38 = vld [vmem:[%s9291_s2] ss:$0 sm:$0xff] }
 0x281   : > { %v4138_v61 = vadd.f32 %v4033_v13, %v3618_v46  ;;  %v8706_v46 = vld [vmem:[#allocation2 + $0x10] sm:$0xff]   ;;  %v5596_v13 = vunpack.c.l.bf16 %v5553_v58 }
 0x282   : > { %v3515_v12 = vpop.f32.mrf.mxu1  ;;  %v7543_v2 = vunpack.c.l.bf16 %v8706_v46 }
 0x283   : > { %v4813_v44 = vadd.f32 %v8644_v27, %v4138_v61  ;;  %v4548_v27 = vsel %vm4432_vm3, %v4538_v34, %v4547_v0  ;;  %v9332_v61 = vld [vmem:[#allocation18_spill] sm:$0xff]  ;;  %v5683_v39 = vrot.slane %v5596_v13, 3  ;;  %v9333_v34 = vrot.slane %v8692_v20, 2 }
 0x284   : > { %v3619_v63 = vadd.f32 %v3515_v12, %v9332_v61  ;;  %v5685_v55 = vrot.slane %v7543_v2, 3 }
 0x285   : > { %v5231_v25 = vpop.f32.mrf.mxu0  ;;  %v5334_v16 = vadd.f32 %v5229_v35, %v4813_v44  ;;  %4762 = vmatmul.bf16.gmra.mxu3 %v4548_v27  ;;  %v3412_v12 = vsel %vm3391_vm4, %v3409_v15, %v9333_v34  ;;  %v9334_v27 = vrot.slane %v8694_v23, 2  ;;  %v5684_v15 = vsel %vm5107_vm5, %v5682_v48, %v5683_v39  ;;  %v7496_v34 = vld [vmem:[#allocation2 + $0x78] sm:$0xff] }
 0x286   : > { %v4550_v41 = vshrl.u32 %v7496_v34, 16  ;;  %v4553_v45 = vshll.u32 %v7496_v34, 16 }
 0x287   : > { %v5464_v44 = vmul.f32 %v8704_v38, %v5334_v16  ;;  %v3932_v61 = vsel %vm3391_vm4, %v3929_v37, %v9334_v27 }
 0x288   : > { %v4035_v35 = vpop.f32.mrf.mxu2  ;;  %v8726_v43 = vpop.f32.mrf.mxu3 }
 0x289   : > { %v4139_v58 = vadd.f32 %v4035_v35, %v3619_v63  ;;  %v5128_v63 = vsel %vm5107_vm5, %v5125_v52, %v9335_v3  ;;  %v5510_v13 = vadd.f32 %v8718_v32, %v5464_v44  ;;  %v8738_v44 = vld [vmem:[#allocation2 + $0x60] sm:$0xff] }
 0x28a   : > { %v3518_v29 = vpop.f32.mrf.mxu1 }
 0x28b   : > { %v4814_v16 = vadd.f32 %v8651_v28, %v4139_v58  ;;  %v3620_v27 = vadd.f32 %v3518_v29, %v8260_v9  ;;  %v5686_v28 = vsel %vm5107_vm5, %v5683_v39, %v5685_v55  ;;  %v5809_v3 = vadd.f32 %v5684_v15, %v5510_v13  ;;  %v8745_v39 = vld [vmem:[#allocation2 + $0x68] sm:$0xff] }
 0x28d   : > { %v5234_v53 = vpop.f32.mrf.mxu0  ;;  %v5335_v35 = vadd.f32 %v5231_v25, %v4814_v16  ;;  %3557 = vmatmul.bf16.gmra.mxu1 %v3412_v12  ;;  %4077 = vmatmul.bf16.gmra.mxu2 %v3932_v61  ;;  %v8740_v12 = vld [vmem:[#allocation2 + $0x68] sm:$0xff]  ;;  %v4552_v61 = vrot.slane %v4550_v41, 2  ;;  %v4555_v16 = vrot.slane %v4553_v45, 3 }
 0x28e   : > { %v3933_v41 = vrot.slane %v8740_v12, 2 }
 0x28f   : > { %v5465_v37 = vmul.f32 %v8704_v38, %v5335_v35  ;;  %v4556_v13 = vor.u32 %v4555_v16, %v4552_v61  ;;  %v5851_v35 = vmax.f32 %v5809_v3, 0.0 }
 0x290   : > { %5273 = vmatmul.bf16.gmra.mxu0 %v5128_v63  ;;  %v4038_v58 = vpop.f32.mrf.mxu2  ;;  %v8742_v48 = vpop.f32.mrf.mxu3 }
 0x291   : > { %v5511_v52 = vadd.f32 %v8718_v32, %v5465_v37  ;;  %v4140_v2 = vadd.f32 %v4038_v58, %v3620_v27  ;;  %v8747_v37 = vld [vmem:[#allocation2 + $0x18] sm:$0xff]   ;;  %v7544_v27 = vunpack.c.h.bf16 %v8706_v46  ;;  %v3413_v58 = vrot.slane %v8738_v44, 2 }
 0x292   : > { %v3520_v25 = vpop.f32.mrf.mxu1  ;;  %v4557_v45 = vsel %vm4432_vm3, %v4547_v0, %v4556_v13  ;;  %v7547_v3 = vunpack.c.l.bf16 %v8747_v37 }
 0x293   : > { %v5810_v63 = vadd.f32 %v5686_v28, %v5511_v52  ;;  %v4815_v9 = vadd.f32 %v8660_v62, %v4140_v2  ;;  %v3621_v62 = vadd.f32 %v3520_v25, %v8270_v24  ;;  %v9295_v52 = vrot.slane %v8745_v39, 3 }
 0x294   : > { %v5687_v46 = vrot.slane %v7544_v27, 3  ;;  %v9337_v24 = vrot.slane %v8694_v23, 2 }
 0x295   : > { %v5236_v29 = vpop.f32.mrf.mxu0  ;;  %v5852_v15 = vmax.f32 %v5810_v63, 0.0  ;;  %v5336_v34 = vadd.f32 %v5234_v53, %v4815_v9  ;;  %4767 = vmatmul.bf16.gmra.mxu3 %v4557_v45  ;;  %v9336_v63 = vrot.slane %v8692_v20, 2  ;;  %v5689_v20 = vrot.slane %v7547_v3, 3 }
 0x296   : > { %v3934_v25 = vsel %vm3391_vm4, %v9337_v24, %v3933_v41  ;;  %v5688_v23 = vsel %vm5107_vm5, %v5685_v55, %v5687_v46 }
 0x297   : > { %v7624_v28 = vpack.c.bf16 %v5852_v15, %v5851_v35  ;;  %v5466_v53 = vmul.f32 %v8704_v38, %v5336_v34  ;;  %v3414_v0 = vsel %vm3391_vm4, %v9336_v63, %v3413_v58  ;;  %v9338_v34 = vrot.slane %v8699_v49, 3 }
 0x298   : > { %v4040_v2 = vpop.f32.mrf.mxu2  ;;  %v8768_v9 = vpop.f32.mrf.mxu3 }
 0x299   : > { %7625 = vst [vmem:[%s7895_s29] sm:$0xff] %v7624_v28   ;;  %v4141_v61 = vadd.f32 %v4040_v2, %v3621_v62  ;;  %v5130_v27 = vsel %vm5107_vm5, %v9338_v34, %v9295_v52  ;;  %v5512_v45 = vadd.f32 %v8718_v32, %v5466_v53  ;;  %v7497_v62 = vld [vmem:[#allocation2 + $0x80] sm:$0xff] }
 0x29a   : > { %v3523_v16 = vpop.f32.mrf.mxu1  ;;  %v4559_v49 = vshrl.u32 %v7497_v62, 16  ;;  %v4562_v24 = vshll.u32 %v7497_v62, 16 }
 0x29b   : > { %v4816_v35 = vadd.f32 %v8671_v14, %v4141_v61  ;;  %v3622_v14 = vadd.f32 %v3523_v16, %v8281_v40  ;;  %v5690_v61 = vsel %vm5107_vm5, %v5687_v46, %v5689_v20  ;;  %v5811_v34 = vadd.f32 %v5688_v23, %v5512_v45  ;;  %v8789_v16 = vld [vmem:[#allocation2 + $0x70] sm:$0xff] }
 0x29d   : > { %v5239_v15 = vpop.f32.mrf.mxu0  ;;  %v5337_v28 = vadd.f32 %v5236_v29, %v4816_v35  ;;  %3562 = vmatmul.bf16.gmra.mxu1 %v3414_v0  ;;  %4082 = vmatmul.bf16.gmra.mxu2 %v3934_v25  ;;  %v8782_v0 = vld [vmem:[#allocation2 + $0x68] sm:$0xff]  ;;  %v8784_v25 = vld [vmem:[#allocation2 + $0x70] sm:$0xff]  ;;  %v4561_v35 = vrot.slane %v4559_v49, 2  ;;  %v5853_v23 = vmax.f32 %v5811_v34, 0.0 }
 0x29e   : > { %v3415_v52 = vrot.slane %v8782_v0, 2  ;;  %v3935_v49 = vrot.slane %v8784_v25, 2 }
 0x29f   : > { %v5467_v2 = vmul.f32 %v8704_v38, %v5337_v28 }
 0x2a0   : > { %5278 = vmatmul.bf16.gmra.mxu0 %v5130_v27  ;;  %v4043_v63 = vpop.f32.mrf.mxu2  ;;  %v8786_v55 = vpop.f32.mrf.mxu3  ;;  %v4564_v27 = vrot.slane %v4562_v24, 3 }
 0x2a1   : > { %v5513_v3 = vadd.f32 %v8718_v32, %v5467_v2  ;;  %v4142_v53 = vadd.f32 %v4043_v63, %v3622_v14  ;;  %v8791_v14 = vld [vmem:[#allocation2 + $0x20] sm:$0xff]   ;;  %v7548_v63 = vunpack.c.h.bf16 %v8747_v37 }
 0x2a2   : > { %v3525_v29 = vpop.f32.mrf.mxu1  ;;  %v4565_v45 = vor.u32 %v4564_v27, %v4561_v35  ;;  %v7551_v34 = vunpack.c.l.bf16 %v8791_v14 }
 0x2a3   : > { %v5812_v28 = vadd.f32 %v5690_v61, %v5513_v3  ;;  %v4817_v40 = vadd.f32 %v8685_v42, %v4142_v53  ;;  %v3623_v42 = vadd.f32 %v3525_v29, %v8292_v57  ;;  %v5131_v3 = vrot.slane %v8789_v16, 3 }
 0x2a4   : > { %v4566_v61 = vsel %vm4432_vm3, %v4556_v13, %v4565_v45  ;;  %v5691_v37 = vrot.slane %v7548_v63, 3  ;;  %v3416_v13 = vsel %vm3391_vm4, %v3413_v58, %v3415_v52  ;;  %v3936_v57 = vsel %vm3391_vm4, %v3933_v41, %v3935_v49  ;;  %v7498_v41 = vld [vmem:[#allocation2 + $0x88] sm:$0xff] }
 0x2a5   : > { %v5241_v46 = vpop.f32.mrf.mxu0  ;;  %v5854_v62 = vmax.f32 %v5812_v28, 0.0  ;;  %v5338_v2 = vadd.f32 %v5239_v15, %v4817_v40  ;;  %4772 = vmatmul.bf16.gmra.mxu3 %v4566_v61  ;;  %v5693_v44 = vrot.slane %v7551_v34, 3 }
 0x2a6   : > { %v5692_v12 = vsel %vm5107_vm5, %v5689_v20, %v5691_v37 }
 0x2a7   : > { %v7629_v24 = vpack.c.bf16 %v5854_v62, %v5853_v23  ;;  %v5468_v15 = vmul.f32 %v8704_v38, %v5338_v2  ;;  %v9339_v23 = vrot.slane %v8745_v39, 3  ;;  %v5694_v61 = vsel %vm5107_vm5, %v5691_v37, %v5693_v44 }
 0x2a8   : > { %v4045_v53 = vpop.f32.mrf.mxu2  ;;  %v8812_v29 = vpop.f32.mrf.mxu3  ;;  %v4568_v39 = vshrl.u32 %v7498_v41, 16 }
 0x2a9   : > { %7746 = vst [vmem:[%s7895_s29 + $0x8] sm:$0xff] %v7629_v24   ;;  %v4143_v35 = vadd.f32 %v4045_v53, %v3623_v42  ;;  %v5132_v62 = vsel %vm5107_vm5, %v9339_v23, %v5131_v3  ;;  %v5514_v58 = vadd.f32 %v8718_v32, %v5468_v15  ;;  %v4571_v42 = vshll.u32 %v7498_v41, 16  ;;  %v8835_v41 = vld [vmem:[#allocation2 + $0x28] sm:$0xff]  }
 0x2aa   : > { %v3528_v27 = vpop.f32.mrf.mxu1 }
 0x2ab   : > { %v4818_v28 = vadd.f32 %v8696_v26, %v4143_v35  ;;  %v3624_v26 = vadd.f32 %v3528_v27, %v8313_v21  ;;  %v5813_v53 = vadd.f32 %v5692_v12, %v5514_v58  ;;  %v8826_v35 = vld [vmem:[#allocation2 + $0x70] sm:$0xff]  ;;  %v8833_v27 = vld [vmem:[#allocation2 + $0x78] sm:$0xff] }
 0x2ad   : > { %v5244_v40 = vpop.f32.mrf.mxu0  ;;  %v5339_v2 = vadd.f32 %v5241_v46, %v4818_v28  ;;  %3567 = vmatmul.bf16.gmra.mxu1 %v3416_v13  ;;  %4087 = vmatmul.bf16.gmra.mxu2 %v3936_v57  ;;  %v8828_v13 = vld [vmem:[#allocation2 + $0x78] sm:$0xff]  ;;  %v4570_v57 = vrot.slane %v4568_v39, 2  ;;  %v4573_v28 = vrot.slane %v4571_v42, 3  ;;  %v5855_v58 = vmax.f32 %v5813_v53, 0.0 }
 0x2ae   : > { %v5133_v42 = vrot.slane %v8833_v27, 3  ;;  %v7555_v53 = vunpack.c.l.bf16 %v8835_v41 }
 0x2af   : > { %v5469_v63 = vmul.f32 %v8704_v38, %v5339_v2 }
 0x2b0   : > { %5283 = vmatmul.bf16.gmra.mxu0 %v5132_v62  ;;  %v4048_v24 = vpop.f32.mrf.mxu2  ;;  %v8830_v20 = vpop.f32.mrf.mxu3  ;;  %v4574_v62 = vor.u32 %v4573_v28, %v4570_v57  ;;  %v5697_v0 = vrot.slane %v7555_v53, 3  ;;  %v8872_v53 = vld [vmem:[#allocation2 + $0x80] sm:$0xff] }
 0x2b1   : > { %v5515_v34 = vadd.f32 %v8718_v32, %v5469_v63  ;;  %v4144_v15 = vadd.f32 %v4048_v24, %v3624_v26  ;;  %v7552_v63 = vunpack.c.h.bf16 %v8791_v14  ;;  %v3417_v26 = vrot.slane %v8826_v35, 2 }
 0x2b2   : > { %v3530_v46 = vpop.f32.mrf.mxu1  ;;  %v3937_v24 = vrot.slane %v8828_v13, 2 }
 0x2b3   : > { %v5814_v23 = vadd.f32 %v5694_v61, %v5515_v34  ;;  %v4819_v21 = vadd.f32 %v8726_v43, %v4144_v15  ;;  %v4575_v61 = vsel %vm4432_vm3, %v4565_v45, %v4574_v62  ;;  %v3625_v43 = vadd.f32 %v3530_v46, %v8327_v36 }
 0x2b4   : > { %v5695_v14 = vrot.slane %v7552_v63, 3  ;;  %v3418_v45 = vsel %vm3391_vm4, %v3415_v52, %v3417_v26  ;;  %v3938_v36 = vsel %vm3391_vm4, %v3935_v49, %v3937_v24  ;;  %v7499_v49 = vld [vmem:[#allocation2 + $0x90] sm:$0xff] }
 0x2b5   : > { %v5246_v37 = vpop.f32.mrf.mxu0  ;;  %v5856_v2 = vmax.f32 %v5814_v23, 0.0  ;;  %v5340_v12 = vadd.f32 %v5244_v40, %v4819_v21  ;;  %4777 = vmatmul.bf16.gmra.mxu3 %v4575_v61  ;;  %v5134_v21 = vsel %vm5107_vm5, %v5131_v3, %v5133_v42  ;;  %v4577_v16 = vshrl.u32 %v7499_v49, 16 }
 0x2b6   : > { %v5696_v25 = vsel %vm5107_vm5, %v5693_v44, %v5695_v14  ;;  %v4580_v61 = vshll.u32 %v7499_v49, 16 }
 0x2b7   : > { %v7634_v39 = vpack.c.bf16 %v5856_v2, %v5855_v58  ;;  %v5470_v40 = vmul.f32 %v8704_v38, %v5340_v12  ;;  %v5698_v12 = vsel %vm5107_vm5, %v5695_v14, %v5697_v0 }
 0x2b8   : > { %v4050_v34 = vpop.f32.mrf.mxu2  ;;  %v8856_v46 = vpop.f32.mrf.mxu3 }
 0x2b9   : > { %7747 = vst [vmem:[%s7895_s29 + $0x10] sm:$0xff] %v7634_v39   ;;  %v4145_v15 = vadd.f32 %v4050_v34, %v3625_v43  ;;  %v5516_v52 = vadd.f32 %v8718_v32, %v5470_v40  ;;  %v8870_v34 = vld [vmem:[#allocation2 + $0x78] sm:$0xff]  ;;  %v4579_v40 = vrot.slane %v4577_v16, 2 }
 0x2ba   : > { %v3533_v57 = vpop.f32.mrf.mxu1  ;;  %v3419_v49 = vrot.slane %v8870_v34, 2 }
 0x2bb   : > { %v4820_v28 = vadd.f32 %v8742_v48, %v4145_v15  ;;  %v3626_v48 = vadd.f32 %v3533_v57, %v8334_v51  ;;  %v5815_v3 = vadd.f32 %v5696_v25, %v5516_v52  ;;  %v4582_v15 = vrot.slane %v4580_v61, 3  ;;  %v8877_v57 = vld [vmem:[#allocation2 + $0x80] sm:$0xff] }
 0x2bc   : > { %v7556_v25 = vunpack.c.h.bf16 %v8835_v41 }
 0x2bd   : > { %v5249_v23 = vpop.f32.mrf.mxu0  ;;  %v5341_v58 = vadd.f32 %v5246_v37, %v4820_v28  ;;  %3572 = vmatmul.bf16.gmra.mxu1 %v3418_v45  ;;  %4092 = vmatmul.bf16.gmra.mxu2 %v3938_v36  ;;  %v4583_v36 = vor.u32 %v4582_v15, %v4579_v40  ;;  %v5857_v28 = vmax.f32 %v5815_v3, 0.0 }
 0x2be   : > { %v5699_v41 = vrot.slane %v7556_v25, 3 }
 0x2bf   : > { %v5471_v2 = vmul.f32 %v8704_v38, %v5341_v58  ;;  %v8879_v58 = vld [vmem:[#allocation2 + $0x30] sm:$0xff]  }
 0x2c0   : > { %5288 = vmatmul.bf16.gmra.mxu0 %v5134_v21  ;;  %v4053_v63 = vpop.f32.mrf.mxu2  ;;  %v8874_v44 = vpop.f32.mrf.mxu3  ;;  %v7559_v61 = vunpack.c.l.bf16 %v8879_v58  ;;  %v5700_v13 = vsel %vm5107_vm5, %v5697_v0, %v5699_v41 }
 0x2c1   : > { %v5517_v39 = vadd.f32 %v8718_v32, %v5471_v2  ;;  %v4146_v43 = vadd.f32 %v4053_v63, %v3626_v48  ;;  %v3939_v2 = vrot.slane %v8872_v53, 2  ;;  %v4584_v48 = vsel %vm4432_vm3, %v4574_v62, %v4583_v36 }
 0x2c2   : > { %v3535_v37 = vpop.f32.mrf.mxu1  ;;  %v5135_v63 = vrot.slane %v8877_v57, 3  ;;  %v3420_v62 = vsel %vm3391_vm4, %v3417_v26, %v3419_v49  ;;  %v5701_v35 = vrot.slane %v7559_v61, 3 }
 0x2c3   : > { %v5816_v45 = vadd.f32 %v5698_v12, %v5517_v39  ;;  %v4821_v51 = vadd.f32 %v8768_v9, %v4146_v43  ;;  %v3627_v9 = vadd.f32 %v3535_v37, %v8344_v19  ;;  %v3940_v19 = vsel %vm3391_vm4, %v3937_v24, %v3939_v2  ;;  %v7500_v24 = vld [vmem:[#allocation2 + $0x98] sm:$0xff] }
 0x2c4   : > { %v5136_v15 = vsel %vm5107_vm5, %v5133_v42, %v5135_v63  ;;  %v4586_v27 = vshrl.u32 %v7500_v24, 16 }
 0x2c5   : > { %v5251_v14 = vpop.f32.mrf.mxu0  ;;  %v5858_v21 = vmax.f32 %v5816_v45, 0.0  ;;  %v5342_v52 = vadd.f32 %v5249_v23, %v4821_v51  ;;  %4782 = vmatmul.bf16.gmra.mxu3 %v4584_v48 }
 0x2c7   : > { %v7639_v12 = vpack.c.bf16 %v5858_v21, %v5857_v28  ;;  %v5472_v23 = vmul.f32 %v8704_v38, %v5342_v52  ;;  %v5702_v28 = vsel %vm5107_vm5, %v5699_v41, %v5701_v35  ;;  %v4589_v52 = vshll.u32 %v7500_v24, 16  ;;  %v8921_v41 = vld [vmem:[#allocation2 + $0x88] sm:$0xff] }
 0x2c8   : > { %v4055_v16 = vpop.f32.mrf.mxu2  ;;  %v8900_v43 = vpop.f32.mrf.mxu3 }
 0x2c9   : > { %7748 = vst [vmem:[%s7895_s29 + $0x18] sm:$0xff] %v7639_v12   ;;  %v4147_v3 = vadd.f32 %v4055_v16, %v3627_v9  ;;  %v5518_v26 = vadd.f32 %v8718_v32, %v5472_v23  ;;  %v8914_v12 = vld [vmem:[#allocation2 + $0x80] sm:$0xff]  ;;  %v8916_v9 = vld [vmem:[#allocation2 + $0x88] sm:$0xff]  ;;  %v4588_v16 = vrot.slane %v4586_v27, 2  ;;  %v4591_v61 = vrot.slane %v4589_v52, 3 }
 0x2ca   : > { %v3538_v39 = vpop.f32.mrf.mxu1 }
 0x2cb   : > { %v4822_v37 = vadd.f32 %v8786_v55, %v4147_v3  ;;  %v3628_v55 = vadd.f32 %v3538_v39, %v8355_v60  ;;  %v5817_v42 = vadd.f32 %v5700_v13, %v5518_v26  ;;  %v4592_v39 = vor.u32 %v4591_v61, %v4588_v16 }
 0x2cc   : > { %v7560_v26 = vunpack.c.h.bf16 %v8879_v58  ;;  %v3941_v13 = vrot.slane %v8916_v9, 2 }
 0x2cd   : > { %v5254_v40 = vpop.f32.mrf.mxu0  ;;  %v5343_v45 = vadd.f32 %v5251_v14, %v4822_v37  ;;  %3577 = vmatmul.bf16.gmra.mxu1 %v3420_v62  ;;  %4097 = vmatmul.bf16.gmra.mxu2 %v3940_v19  ;;  %v5859_v62 = vmax.f32 %v5817_v42, 0.0  ;;  %v4593_v24 = vsel %vm4432_vm3, %v4583_v36, %v4592_v39 }
 0x2ce   : > { %v5703_v58 = vrot.slane %v7560_v26, 3  ;;  %v8958_v26 = vld [vmem:[#allocation2 + $0x88] sm:$0xff] }
 0x2cf   : > { %v5473_v51 = vmul.f32 %v8704_v38, %v5343_v45  ;;  %v3421_v45 = vrot.slane %v8914_v12, 2 }
 0x2d0   : > { %5293 = vmatmul.bf16.gmra.mxu0 %v5136_v15  ;;  %v4058_v21 = vpop.f32.mrf.mxu2  ;;  %v8918_v0 = vpop.f32.mrf.mxu3  ;;  %v8923_v15 = vld [vmem:[#allocation2 + $0x38] sm:$0xff]   ;;  %v5704_v53 = vsel %vm5107_vm5, %v5701_v35, %v5703_v58 }
 0x2d1   : > { %v5519_v25 = vadd.f32 %v8718_v32, %v5473_v51  ;;  %v4148_v48 = vadd.f32 %v4058_v21, %v3628_v55  ;;  %v5137_v55 = vrot.slane %v8921_v41, 3  ;;  %v7563_v21 = vunpack.c.l.bf16 %v8923_v15 }
 0x2d2   : > { %v3540_v14 = vpop.f32.mrf.mxu1  ;;  %v3422_v36 = vsel %vm3391_vm4, %v3419_v49, %v3421_v45 }
 0x2d3   : > { %v5818_v23 = vadd.f32 %v5702_v28, %v5519_v25  ;;  %v4823_v60 = vadd.f32 %v8812_v29, %v4148_v48  ;;  %v3629_v29 = vadd.f32 %v3540_v14, %v8375_v56  ;;  %v3942_v56 = vsel %vm3391_vm4, %v3939_v2, %v3941_v13  ;;  %v7501_v2 = vld [vmem:[#allocation2 + $0xa0] sm:$0xff] }
 0x2d4   : > { %v5138_v14 = vsel %vm5107_vm5, %v5135_v63, %v5137_v55  ;;  %v5705_v34 = vrot.slane %v7563_v21, 3  ;;  %v4595_v57 = vshrl.u32 %v7501_v2, 16 }
 0x2d5   : > { %v5256_v3 = vpop.f32.mrf.mxu0  ;;  %v5860_v19 = vmax.f32 %v5818_v23, 0.0  ;;  %v5344_v37 = vadd.f32 %v5254_v40, %v4823_v60  ;;  %4787 = vmatmul.bf16.gmra.mxu3 %v4593_v24  ;;  %v8960_v24 = vld [vmem:[#allocation2 + $0x90] sm:$0xff] }
 0x2d6   : > { %v5706_v23 = vsel %vm5107_vm5, %v5703_v58, %v5705_v34 }
 0x2d7   : > { %v7644_v51 = vpack.c.bf16 %v5860_v19, %v5859_v62  ;;  %v5474_v40 = vmul.f32 %v8704_v38, %v5344_v37  ;;  %v4598_v62 = vshll.u32 %v7501_v2, 16 }
 0x2d8   : > { %v4060_v28 = vpop.f32.mrf.mxu2  ;;  %v8944_v42 = vpop.f32.mrf.mxu3 }
 0x2d9   : > { %7749 = vst [vmem:[%s7895_s29 + $0x20] sm:$0xff] %v7644_v51   ;;  %v4149_v27 = vadd.f32 %v4060_v28, %v3629_v29  ;;  %v5520_v49 = vadd.f32 %v8718_v32, %v5474_v40  ;;  %v4597_v51 = vrot.slane %v4595_v57, 2  ;;  %v4600_v29 = vrot.slane %v4598_v62, 3  ;;  %v8965_v40 = vld [vmem:[#allocation2 + $0x90] sm:$0xff] }
 0x2da   : > { %v3543_v52 = vpop.f32.mrf.mxu1  ;;  %v5139_v2 = vrot.slane %v8965_v40, 3 }
 0x2db   : > { %v4824_v25 = vadd.f32 %v8830_v20, %v4149_v27  ;;  %v3630_v20 = vadd.f32 %v3543_v52, %v8390_v1  ;;  %v5819_v63 = vadd.f32 %v5704_v53, %v5520_v49  ;;  %v4601_v27 = vor.u32 %v4600_v29, %v4597_v51 }
 0x2dc   : > { %v3943_v49 = vrot.slane %v8960_v24, 2 }
 0x2dd   : > { %v5259_v48 = vpop.f32.mrf.mxu0  ;;  %v5345_v16 = vadd.f32 %v5256_v3, %v4824_v25  ;;  %3582 = vmatmul.bf16.gmra.mxu1 %v3422_v36  ;;  %4102 = vmatmul.bf16.gmra.mxu2 %v3942_v56  ;;  %v5861_v58 = vmax.f32 %v5819_v63, 0.0  ;;  %v8967_v56 = vld [vmem:[#allocation2 + $0x40] sm:$0xff]   ;;  %v7564_v25 = vunpack.c.h.bf16 %v8923_v15 }
 0x2df   : > { %v5475_v61 = vmul.f32 %v8704_v38, %v5345_v16  ;;  %v4602_v16 = vsel %vm4432_vm3, %v4592_v39, %v4601_v27  ;;  %v5707_v15 = vrot.slane %v7564_v25, 3 }
 0x2e0   : > { %5298 = vmatmul.bf16.gmra.mxu0 %v5138_v14  ;;  %v4063_v60 = vpop.f32.mrf.mxu2  ;;  %v8962_v35 = vpop.f32.mrf.mxu3  ;;  %v3423_v14 = vrot.slane %v8958_v26, 2 }
 0x2e1   : > { %v5521_v19 = vadd.f32 %v8718_v32, %v5475_v61  ;;  %v4150_v37 = vadd.f32 %v4063_v60, %v3630_v20  ;;  %v7567_v20 = vunpack.c.l.bf16 %v8967_v56  ;;  %v5708_v9 = vsel %vm5107_vm5, %v5705_v34, %v5707_v15 }
 0x2e2   : > { %v3545_v3 = vpop.f32.mrf.mxu1  ;;  %v3424_v39 = vsel %vm3391_vm4, %v3421_v45, %v3423_v14 }
 0x2e3   : > { %v5820_v28 = vadd.f32 %v5706_v23, %v5521_v19  ;;  %v4825_v1 = vadd.f32 %v8856_v46, %v4150_v37  ;;  %v3631_v46 = vadd.f32 %v3545_v3, %v8401_v54  ;;  %v3944_v54 = vsel %vm3391_vm4, %v3941_v13, %v3943_v49  ;;  %v7502_v13 = vld [vmem:[#allocation2 + $0xa8] sm:$0xff] }
 0x2e4   : > { %v5140_v19 = vsel %vm5107_vm5, %v5137_v55, %v5139_v2  ;;  %v5709_v12 = vrot.slane %v7567_v20, 3  ;;  %v4604_v41 = vshrl.u32 %v7502_v13, 16 }
 0x2e5   : > { %v5261_v21 = vpop.f32.mrf.mxu0  ;;  %v5862_v52 = vmax.f32 %v5820_v28, 0.0  ;;  %v5346_v36 = vadd.f32 %v5259_v48, %v4825_v1  ;;  %4792 = vmatmul.bf16.gmra.mxu3 %v4602_v16  ;;  %v4607_v28 = vshll.u32 %v7502_v13, 16 }
 0x2e6   : > { %v5710_v51 = vsel %vm5107_vm5, %v5707_v15, %v5709_v12  ;;  %v4606_v25 = vrot.slane %v4604_v41, 2 }
 0x2e7   : > { %v7649_v53 = vpack.c.bf16 %v5862_v52, %v5861_v58  ;;  %v5476_v48 = vmul.f32 %v8704_v38, %v5346_v36  ;;  %v9002_v52 = vld [vmem:[#allocation2 + $0x90] sm:$0xff]  ;;  %v9004_v36 = vld [vmem:[#allocation2 + $0x98] sm:$0xff]  ;;  %v4609_v16 = vrot.slane %v4607_v28, 3 }
 0x2e8   : > { %v4065_v61 = vpop.f32.mrf.mxu2  ;;  %v8988_v57 = vpop.f32.mrf.mxu3 }
 0x2e9   : > { %7750 = vst [vmem:[%s7895_s29 + $0x28] sm:$0xff] %v7649_v53   ;;  %v4151_v23 = vadd.f32 %v4065_v61, %v3631_v46  ;;  %v5522_v45 = vadd.f32 %v8718_v32, %v5476_v48  ;;  %v9009_v61 = vld [vmem:[#allocation2 + $0x98] sm:$0xff]  ;;  %v4610_v20 = vor.u32 %v4609_v16, %v4606_v25 }
 0x2ea   : > { %v3548_v60 = vpop.f32.mrf.mxu1 }
 0x2eb   : > { %v4826_v62 = vadd.f32 %v8874_v44, %v4151_v23  ;;  %v3632_v44 = vadd.f32 %v3548_v60, %v8413_v59  ;;  %v5821_v55 = vadd.f32 %v5708_v9, %v5522_v45  ;;  %v9011_v60 = vld [vmem:[#allocation2 + $0x48] sm:$0xff]  }
 0x2ec   : > { %v7571_v13 = vunpack.c.l.bf16 %v9011_v60 }
 0x2ed   : > { %v5264_v63 = vpop.f32.mrf.mxu0  ;;  %v5347_v37 = vadd.f32 %v5261_v21, %v4826_v62  ;;  %3587 = vmatmul.bf16.gmra.mxu1 %v3424_v39  ;;  %4107 = vmatmul.bf16.gmra.mxu2 %v3944_v54  ;;  %v5863_v48 = vmax.f32 %v5821_v55, 0.0  ;;  %v7568_v39 = vunpack.c.h.bf16 %v8967_v56  ;;  %v3425_v54 = vrot.slane %v9002_v52, 2 }
 0x2ee   : > { %v3945_v62 = vrot.slane %v9004_v36, 2  ;;  %v5713_v26 = vrot.slane %v7571_v13, 3 }
 0x2ef   : > { %v5477_v3 = vmul.f32 %v8704_v38, %v5347_v37  ;;  %v5141_v37 = vrot.slane %v9009_v61, 3  ;;  %v5711_v56 = vrot.slane %v7568_v39, 3 }
 0x2f0   : > { %5303 = vmatmul.bf16.gmra.mxu0 %v5140_v19  ;;  %v4068_v29 = vpop.f32.mrf.mxu2  ;;  %v9006_v34 = vpop.f32.mrf.mxu3  ;;  %v4611_v19 = vsel %vm4432_vm3, %v4601_v27, %v4610_v20  ;;  %v3426_v27 = vsel %vm3391_vm4, %v3423_v14, %v3425_v54 }
 0x2f1   : > { %v5523_v1 = vadd.f32 %v8718_v32, %v5477_v3  ;;  %v4152_v58 = vadd.f32 %v4068_v29, %v3632_v44  ;;  %v5142_v28 = vsel %vm5107_vm5, %v5139_v2, %v5141_v37  ;;  %v5712_v24 = vsel %vm5107_vm5, %v5709_v12, %v5711_v56 }
 0x2f2   : > { %v3550_v21 = vpop.f32.mrf.mxu1 }
 0x2f3   : > { %v5822_v53 = vadd.f32 %v5710_v51, %v5523_v1  ;;  %v4827_v59 = vadd.f32 %v8900_v43, %v4152_v58  ;;  %v3633_v43 = vadd.f32 %v3550_v21, %v8424_v17  ;;  %v3946_v17 = vsel %vm3391_vm4, %v3943_v49, %v3945_v62  ;;  %v7503_v49 = vld [vmem:[#allocation2 + $0xb0] sm:$0xff] }
 0x2f4   : > { %v5714_v58 = vsel %vm5107_vm5, %v5711_v56, %v5713_v26  ;;  %v4613_v40 = vshrl.u32 %v7503_v49, 16  ;;  %v4616_v25 = vshll.u32 %v7503_v49, 16  ;;  %v7572_v56 = vunpack.c.h.bf16 %v9011_v60 }
 0x2f5   : > { %v5266_v46 = vpop.f32.mrf.mxu0  ;;  %v5864_v23 = vmax.f32 %v5822_v53, 0.0  ;;  %v5348_v15 = vadd.f32 %v5264_v63, %v4827_v59  ;;  %4797 = vmatmul.bf16.gmra.mxu3 %v4611_v19 }
 0x2f7   : > { %v7654_v45 = vpack.c.bf16 %v5864_v23, %v5863_v48  ;;  %v5478_v63 = vmul.f32 %v8704_v38, %v5348_v15  ;;  %v9048_v48 = vld [vmem:[#allocation2 + $0xa0] sm:$0xff]  ;;  %v4615_v23 = vrot.slane %v4613_v40, 2  ;;  %v4618_v15 = vrot.slane %v4616_v25, 3 }
 0x2f8   : > { %v4070_v9 = vpop.f32.mrf.mxu2  ;;  %v9032_v51 = vpop.f32.mrf.mxu3 }
 0x2f9   : > { %7751 = vst [vmem:[%s7895_s29 + $0x30] sm:$0xff] %v7654_v45   ;;  %v4153_v3 = vadd.f32 %v4070_v9, %v3633_v43  ;;  %v5524_v14 = vadd.f32 %v8718_v32, %v5478_v63  ;;  %v9053_v45 = vld [vmem:[#allocation2 + $0xa0] sm:$0xff]  ;;  %v9055_v43 = vor.u32 %v4618_v15, %v4615_v23 }
 0x2fa   : > { %v3553_v44 = vpop.f32.mrf.mxu1 }
 0x2fb   : > { %v4828_v29 = vadd.f32 %v8918_v0, %v4153_v3  ;;  %v3634_v0 = vadd.f32 %v3553_v44, %v8445_v7  ;;  %v5823_v2 = vadd.f32 %v5712_v24, %v5524_v14  ;;  %v9057_v3 = vld [vmem:[#allocation2 + $0x50] sm:$0xff]   ;;  %v5715_v24 = vrot.slane %v7572_v56, 3 }
 0x2fd   : > { %v5269_v41 = vpop.f32.mrf.mxu0  ;;  %v5349_v55 = vadd.f32 %v5266_v46, %v4828_v29  ;;  %3592 = vmatmul.bf16.gmra.mxu1 %v3426_v27  ;;  %4112 = vmatmul.bf16.gmra.mxu2 %v3946_v17  ;;  %v9046_v46 = vld [vmem:[#allocation2 + $0x98] sm:$0xff]  ;;  %v5865_v9 = vmax.f32 %v5823_v2, 0.0  ;;  %v3947_v27 = vrot.slane %v9048_v48, 2  ;;  %v5716_v36 = vsel %vm5107_vm5, %v5713_v26, %v5715_v24 }
 0x2fe   : > { %v3427_v44 = vrot.slane %v9046_v46, 2 }
 0x2ff   : > { %v5479_v1 = vmul.f32 %v8704_v38, %v5349_v55 }
 0x300   : > { %5308 = vmatmul.bf16.gmra.mxu0 %v5142_v28  ;;  %v4073_v21 = vpop.f32.mrf.mxu2  ;;  %v9050_v12 = vpop.f32.mrf.mxu3  ;;  %v5143_v28 = vrot.slane %v9053_v45, 3 }
 0x301   : > { %v5525_v16 = vadd.f32 %v8718_v32, %v5479_v1  ;;  %v4154_v53 = vadd.f32 %v4073_v21, %v3634_v0  ;;  %v4306_v21 = vld [vmem:[#allocation2 + $0xb8] sm:$0x7] }
 0x302   : > { %v3555_v59 = vpop.f32.mrf.mxu1 }
 0x303   : > { %v5824_v39 = vadd.f32 %v5714_v58, %v5525_v16  ;;  %v4829_v7 = vadd.f32 %v8944_v42, %v4154_v53  ;;  %v4620_v42 = vsel %vm4432_vm3, %v4610_v20, %v9055_v43  ;;  %v3635_v29 = vadd.f32 %v3555_v59, %v8459_v50  ;;  %v9340_v16 = vld [vmem:[#allocation19_spill] sm:$0xff] }
 0x304   : > { %v3428_v20 = vsel %vm3391_vm4, %v3425_v54, %v3427_v44  ;;  %v3948_v50 = vsel %vm3391_vm4, %v3945_v62, %v3947_v27  ;;  %v5144_v58 = vsel %vm5107_vm5, %v5141_v37, %v5143_v28  ;;  %v4409_v54 = vunpack.c.l.b16 %v4306_v21  ;;  %v9341_v21 = vld [vmem:[#allocation20_spill] sm:$0xff] }
 0x305   : > { %v5271_v19 = vpop.f32.mrf.mxu0  ;;  %v5866_v13 = vmax.f32 %v5824_v39, 0.0  ;;  %v5350_v63 = vadd.f32 %v5269_v41, %v4829_v7  ;;  %4802 = vmatmul.bf16.gmra.mxu3 %v4620_v42  ;;  %v7575_v41 = vunpack.c.l.bf16 %v9057_v3 }
 0x307   : > { %v7659_v17 = vpack.c.bf16 %v5866_v13, %v5865_v9  ;;  %v5480_v55 = vmul.f32 %v8704_v38, %v5350_v63  ;;  %v5717_v40 = vrot.slane %v7575_v41, 3  ;;  %v9093_v9 = vld [vmem:[#allocation2 + $0xa0] sm:$0xff]  ;;  %v9095_v13 = vld [vmem:[#allocation2 + $0xa8] sm:$0xff] }
 0x308   : > { %v4075_v14 = vpop.f32.mrf.mxu2  ;;  %v9085_v52 = vpop.f32.mrf.mxu3 }
 0x309   : > { %7752 = vst [vmem:[%s7895_s29 + $0x38] sm:$0xff] %v7659_v17   ;;  %v4155_v60 = vadd.f32 %v4075_v14, %v3635_v29  ;;  %v5526_v25 = vadd.f32 %v8718_v32, %v5480_v55  ;;  %v5718_v37 = vsel %vm5107_vm5, %v5715_v24, %v5717_v40  ;;  %v9098_v29 = vld [vmem:[#allocation2 + $0xa8] sm:$0xff]  ;;  %v7735_v24 = vld [vmem:[#allocation2 + $0x58] sm:$0xff]  }
 0x30a   : > { %v3558_v49 = vpop.f32.mrf.mxu1 }
 0x30b   : > { %v4830_v1 = vadd.f32 %v8962_v35, %v4155_v60  ;;  %v4431_v35 = vpack.c.b16 %v4409_v54, %v4409_v54  ;;  %v3636_v61 = vadd.f32 %v3558_v49, %v9340_v16  ;;  %v5825_v15 = vadd.f32 %v5716_v36, %v5526_v25 }
 0x30c   : > { %v7576_v49 = vunpack.c.h.bf16 %v9057_v3  ;;  %v5145_v25 = vrot.slane %v9098_v29, 3  ;;  %v7580_v29 = vunpack.c.h.bf16 %v7735_v24 }
 0x30d   : > { %v5274_v0 = vpop.f32.mrf.mxu0  ;;  %v5351_v2 = vadd.f32 %v5271_v19, %v4830_v1  ;;  %3597 = vmatmul.bf16.gmra.mxu1 %v3428_v20  ;;  %4117 = vmatmul.bf16.gmra.mxu2 %v3948_v50  ;;  %v4622_v59 = vshrl.u32 %v4431_v35, 16  ;;  %v4625_v23 = vshll.u32 %v4431_v35, 16  ;;  %v5867_v41 = vmax.f32 %v5825_v15, 0.0 }
 0x30e   : > { %v3429_v20 = vrot.slane %v9093_v9, 2  ;;  %v3949_v50 = vrot.slane %v9095_v13, 2  ;;  %v5719_v35 = vrot.slane %v7576_v49, 3  ;;  %v9129_v9 = vld [vmem:[#allocation2 + $0xa8] sm:$0xff]  ;;  %v9131_v13 = vld [vmem:[#allocation2 + $0xb0] sm:$0xff] }
 0x30f   : > { %v5481_v62 = vmul.f32 %v8704_v38, %v5351_v2  ;;  %v4624_v26 = vrot.slane %v4622_v59, 2  ;;  %v4627_v63 = vrot.slane %v4625_v23, 3 }
 0x310   : > { %5313 = vmatmul.bf16.gmra.mxu0 %v5144_v58  ;;  %v4078_v53 = vpop.f32.mrf.mxu2  ;;  %v9103_v1 = vpop.f32.mrf.mxu3  ;;  %v3430_v16 = vsel %vm3391_vm4, %v3427_v44, %v3429_v20  ;;  %v5720_v46 = vsel %vm5107_vm5, %v5717_v40, %v5719_v35 }
 0x311   : > { %v5527_v39 = vadd.f32 %v8718_v32, %v5481_v62  ;;  %v4156_v7 = vadd.f32 %v4078_v53, %v3636_v61  ;;  %v4628_v14 = vor.u32 %v4627_v63, %v4624_v26  ;;  %v5146_v53 = vsel %vm5107_vm5, %v5143_v28, %v5145_v25 }
 0x312   : > { %v3560_v19 = vpop.f32.mrf.mxu1 }
 0x313   : > { %v5826_v56 = vadd.f32 %v5718_v37, %v5527_v39  ;;  %v4831_v42 = vadd.f32 %v8988_v57, %v4156_v7  ;;  %v4629_v57 = vsel %vm4432_vm3, %v9055_v43, %v4628_v14  ;;  %v3637_v54 = vadd.f32 %v3560_v19, %v9341_v21 }
 0x314   : > { %v3950_v43 = vsel %vm3391_vm4, %v3947_v27, %v3949_v50  ;;  %v3951_v14 = vrot.slane %v9131_v13, 2  ;;  %v5723_v21 = vrot.slane %v7580_v29, 3  ;;  %v7737_v29 = vld [vmem:[#allocation2 + $0x68] sm:$0xff]  }
 0x315   : > { %v5276_v17 = vpop.f32.mrf.mxu0  ;;  %v5868_v55 = vmax.f32 %v5826_v56, 0.0  ;;  %v5352_v60 = vadd.f32 %v5274_v0, %v4831_v42  ;;  %4807 = vmatmul.bf16.gmra.mxu3 %v4629_v57  ;;  %v7579_v0 = vunpack.c.l.bf16 %v7735_v24  ;;  %v9147_v57 = vld [vmem:[%s9291_s2] ss:$0 sm:$0xff] }
 0x317   : > { %v7664_v58 = vpack.c.bf16 %v5868_v55, %v5867_v41  ;;  %v5482_v3 = vmul.f32 %v8704_v38, %v5352_v60  ;;  %v5721_v59 = vrot.slane %v7579_v0, 3 }
 0x318   : > { %v4080_v2 = vpop.f32.mrf.mxu2  ;;  %v9126_v39 = vpop.f32.mrf.mxu3 }
 0x319   : > { %7753 = vst [vmem:[%s7895_s29 + $0x40] sm:$0xff] %v7664_v58   ;;  %v4157_v36 = vadd.f32 %v4080_v2, %v3637_v54  ;;  %v5528_v23 = vadd.f32 %v8718_v32, %v5482_v3  ;;  %v3952_v2 = vsel %vm3391_vm4, %v3949_v50, %v3951_v14 }
 0x31a   : > { %v3563_v62 = vpop.f32.mrf.mxu1 }
 0x31b   : > { %v4832_v61 = vadd.f32 %v9006_v34, %v4157_v36  ;;  %v3638_v44 = vadd.f32 %v3563_v62, %v8499_v33  ;;  %v5722_v34 = vsel %vm5107_vm5, %v5719_v35, %v5721_v59  ;;  %v5827_v45 = vadd.f32 %v5720_v46, %v5528_v23  ;;  %v9134_v33 = vld [vmem:[#allocation2 + $0xb0] sm:$0xff] }
 0x31c   : > { %v5147_v60 = vrot.slane %v9134_v33, 3  ;;  %v3265_v62 = vld [vmem:[#allocation2 + $0xb0] sm:$0x3] }
 0x31d   : > { %v5279_v37 = vpop.f32.mrf.mxu0  ;;  %v5353_v15 = vadd.f32 %v5276_v17, %v4832_v61  ;;  %3602 = vmatmul.bf16.gmra.mxu1 %v3430_v16  ;;  %4122 = vmatmul.bf16.gmra.mxu2 %v3950_v43  ;;  %v5869_v63 = vmax.f32 %v5827_v45, 0.0  ;;  %v9136_v17 = vld [vmem:[#allocation2 + $0x60] sm:$0xff]   ;;  %v3786_v16 = vld [vmem:[#allocation2 + $0xb8] sm:$0x3] }
 0x31e   : > { %v5148_v35 = vsel %vm5107_vm5, %v5145_v25, %v5147_v60  ;;  %v4981_v61 = vld [vmem:[#allocation2 + $0xb8] sm:$0x7]  ;;  %v3889_v23 = vunpack.c.l.b16 %v3786_v16 }
 0x31f   : > { %v5483_v48 = vmul.f32 %v8704_v38, %v5353_v15  ;;  %v5084_v46 = vunpack.c.l.b16 %v4981_v61 }
 0x320   : > { %5318 = vmatmul.bf16.gmra.mxu0 %v5146_v53  ;;  %v4083_v27 = vpop.f32.mrf.mxu2  ;;  %v9156_v0 = vpop.f32.mrf.mxu3  ;;  %v3368_v53 = vunpack.c.l.b16 %v3265_v62 }
 0x321   : > { %v5529_v28 = vadd.f32 %v8718_v32, %v5483_v48  ;;  %v4158_v7 = vadd.f32 %v4083_v27, %v3638_v44  ;;  %v3431_v32 = vrot.slane %v9129_v9, 2 }
 0x322   : > { %v3565_v19 = vpop.f32.mrf.mxu1 }
 0x323   : > { %v5828_v40 = vadd.f32 %v5722_v34, %v5529_v28  ;;  %v4833_v38 = vadd.f32 %v9032_v51, %v4158_v7  ;;  %v3639_v55 = vadd.f32 %v3565_v19, %v8513_v18  ;;  %v7583_v51 = vunpack.c.l.bf16 %v9136_v17 }
 0x324   : > { %v3432_v18 = vsel %vm3391_vm4, %v3429_v20, %v3431_v32  ;;  %v9165_v20 = vld [vmem:[%s9292_s3] ss:$0 sm:$0xff]  ;;  %v3390_v7 = vpack.c.b16 %v3368_v53, %v3368_v53  ;;  %v3911_v19 = vpack.c.b16 %v3889_v23, %v3889_v23 }
 0x325   : > { %v5281_v26 = vpop.f32.mrf.mxu0  ;;  %v5870_v56 = vmax.f32 %v5828_v40, 0.0  ;;  %v5354_v42 = vadd.f32 %v5279_v37, %v4833_v38  ;;  %v5725_v43 = vrot.slane %v7583_v51, 3 }
 0x327   : > { %v7669_v41 = vpack.c.bf16 %v5870_v56, %v5869_v63  ;;  %v5484_v24 = vmul.f32 %v9147_v57, %v5354_v42  ;;  %v5726_v48 = vsel %vm5107_vm5, %v5723_v21, %v5725_v43 }
 0x328   : > { %v4085_v49 = vpop.f32.mrf.mxu2  ;;  %v9174_v63 = vpop.f32.mrf.mxu3 }
 0x329   : > { %7754 = vst [vmem:[%s7895_s29 + $0x48] sm:$0xff] %v7669_v41   ;;  %v4159_v58 = vadd.f32 %v4085_v49, %v3639_v55  ;;  %v5530_v50 = vadd.f32 %v9165_v20, %v5484_v24  ;;  %v7584_v41 = vunpack.c.h.bf16 %v9136_v17  ;;  %v3433_v55 = vrot.slane %v3390_v7, 2 }
 0x32a   : > { %v3568_v54 = vpop.f32.mrf.mxu1  ;;  %v3953_v49 = vrot.slane %v3911_v19, 2 }
 0x32b   : > { %v4834_v3 = vadd.f32 %v9050_v12, %v4159_v58  ;;  %v5724_v12 = vsel %vm5107_vm5, %v5721_v59, %v5723_v21  ;;  %v3640_v15 = vadd.f32 %v3568_v54, %v8520_v6  ;;  %v7587_v54 = vunpack.c.l.bf16 %v7737_v29 }
 0x32c   : > { %v5829_v34 = vadd.f32 %v5724_v12, %v5530_v50  ;;  %v3954_v17 = vsel %vm3391_vm4, %v3951_v14, %v3953_v49 }
 0x32d   : > { %v5284_v36 = vpop.f32.mrf.mxu0  ;;  %v5355_v37 = vadd.f32 %v5281_v26, %v4834_v3  ;;  %3607 = vmatmul.bf16.gmra.mxu1 %v3432_v18  ;;  %4127 = vmatmul.bf16.gmra.mxu2 %v3952_v2  ;;  %v5106_v26 = vpack.c.b16 %v5084_v46, %v5084_v46  ;;  %v5727_v2 = vrot.slane %v7584_v41, 3  ;;  %v5729_v16 = vrot.slane %v7587_v54, 3 }
 0x32e   : > { %v5871_v6 = vmax.f32 %v5829_v34, 0.0  ;;  %v7588_v34 = vunpack.c.h.bf16 %v7737_v29 }
 0x32f   : > { %v5485_v25 = vmul.f32 %v9147_v57, %v5355_v37  ;;  %v5149_v58 = vrot.slane %v5106_v26, 3  ;;  %v5728_v9 = vsel %vm5107_vm5, %v5725_v43, %v5727_v2 }
 0x330   : > { %5323 = vmatmul.bf16.gmra.mxu0 %v5148_v35  ;;  %v4088_v44 = vpop.f32.mrf.mxu2 }
 0x331   : > { %v5531_v27 = vadd.f32 %v9165_v20, %v5485_v25  ;;  %v4160_v45 = vadd.f32 %v4088_v44, %v3640_v15  ;;  %v5150_v62 = vsel %vm5107_vm5, %v5147_v60, %v5149_v58  ;;  %v7738_v44 = vld [vmem:[#allocation2 + $0x70] sm:$0xff]  }
 0x332   : > { %v3570_v28 = vpop.f32.mrf.mxu1 }
 0x333   : > { %v5830_v40 = vadd.f32 %v5726_v48, %v5531_v27  ;;  %v4835_v59 = vadd.f32 %v9085_v52, %v4160_v45  ;;  %v3641_v24 = vadd.f32 %v3570_v28, %v8530_v11  ;;  %v7591_v28 = vunpack.c.l.bf16 %v7738_v44 }
 0x335   : > { %v5286_v38 = vpop.f32.mrf.mxu0  ;;  %v5872_v56 = vmax.f32 %v5830_v40, 0.0  ;;  %v5356_v42 = vadd.f32 %v5284_v36, %v4835_v59  ;;  %v3434_v36 = vsel %vm3391_vm4, %v3431_v32, %v3433_v55  ;;  %v4775_v32 = vpop.f32.mrf.mxu3  ;;  %v5731_v59 = vrot.slane %v7588_v34, 3 }
 0x337   : > { %v7674_v51 = vpack.c.bf16 %v5872_v56, %v5871_v6  ;;  %v5486_v52 = vmul.f32 %v9147_v57, %v5356_v42  ;;  %v5733_v6 = vrot.slane %v7591_v28, 3  ;;  %v5732_v29 = vsel %vm5107_vm5, %v5729_v16, %v5731_v59  ;;  %v7740_v28 = vld [vmem:[#allocation2 + $0x80] sm:$0xff]  }
 0x338   : > { %v4090_v21 = vpop.f32.mrf.mxu2 }
 0x339   : > { %7755 = vst [vmem:[%s7895_s29 + $0x50] sm:$0xff] %v7674_v51   ;;  %v4161_v18 = vadd.f32 %v4090_v21, %v3641_v24  ;;  %v5532_v61 = vadd.f32 %v9165_v20, %v5486_v52  ;;  %v5734_v55 = vsel %vm5107_vm5, %v5731_v59, %v5733_v6 }
 0x33a   : > { %v3573_v3 = vpop.f32.mrf.mxu1 }
 0x33b   : > { %v4836_v35 = vadd.f32 %v9103_v1, %v4161_v18  ;;  %v3642_v14 = vadd.f32 %v3573_v3, %v8540_v30  ;;  %v5730_v1 = vsel %vm5107_vm5, %v5727_v2, %v5729_v16  ;;  %v5831_v33 = vadd.f32 %v5728_v9, %v5532_v61 }
 0x33d   : > { %v5289_v11 = vpop.f32.mrf.mxu0  ;;  %v5357_v50 = vadd.f32 %v5286_v38, %v4836_v35  ;;  %3612 = vmatmul.bf16.gmra.mxu1 %v3434_v36  ;;  %4132 = vmatmul.bf16.gmra.mxu2 %v3954_v17  ;;  %v5873_v43 = vmax.f32 %v5831_v33, 0.0  ;;  %v4778_v7 = vpop.f32.mrf.mxu3  ;;  %v7739_v17 = vld [vmem:[#allocation2 + $0x78] sm:$0xff]   ;;  %v7592_v35 = vunpack.c.h.bf16 %v7738_v44 }
 0x33e   : > { %v7595_v16 = vunpack.c.l.bf16 %v7739_v17 }
 0x33f   : > { %v5487_v13 = vmul.f32 %v9147_v57, %v5357_v50  ;;  %v5735_v9 = vrot.slane %v7592_v35, 3 }
 0x340   : > { %5328 = vmatmul.bf16.gmra.mxu0 %v5150_v62  ;;  %v4093_v37 = vpop.f32.mrf.mxu2 }
 0x341   : > { %v5533_v60 = vadd.f32 %v9165_v20, %v5487_v13  ;;  %v4162_v12 = vadd.f32 %v4093_v37, %v3642_v14 }
 0x342   : > { %v3575_v53 = vpop.f32.mrf.mxu1 }
 0x343   : > { %v5832_v23 = vadd.f32 %v5730_v1, %v5533_v60  ;;  %v4837_v25 = vadd.f32 %v9126_v39, %v4162_v12  ;;  %v3643_v30 = vadd.f32 %v3575_v53, %v8552_v4  ;;  %v5736_v12 = vsel %vm5107_vm5, %v5733_v6, %v5735_v9 }
 0x345   : > { %v5291_v15 = vpop.f32.mrf.mxu0  ;;  %v5874_v46 = vmax.f32 %v5832_v23, 0.0  ;;  %v5358_v48 = vadd.f32 %v5289_v11, %v4837_v25  ;;  %v4780_v21 = vpop.f32.mrf.mxu3 }
 0x347   : > { %v7679_v27 = vpack.c.bf16 %v5874_v46, %v5873_v43  ;;  %v5488_v19 = vmul.f32 %v9147_v57, %v5358_v48 }
 0x348   : > { %v4095_v45 = vpop.f32.mrf.mxu2 }
 0x349   : > { %7756 = vst [vmem:[%s7895_s29 + $0x58] sm:$0xff] %v7679_v27   ;;  %v4163_v40 = vadd.f32 %v4095_v45, %v3643_v30  ;;  %v5534_v56 = vadd.f32 %v9165_v20, %v5488_v19  ;;  %v7596_v19 = vunpack.c.h.bf16 %v7739_v17 }
 0x34a   : > { %v3578_v38 = vpop.f32.mrf.mxu1 }
 0x34b   : > { %v4838_v39 = vadd.f32 %v9156_v0, %v4163_v40  ;;  %v3644_v41 = vadd.f32 %v3578_v38, %v8558_v10  ;;  %v5833_v51 = vadd.f32 %v5732_v29, %v5534_v56  ;;  %v5739_v56 = vrot.slane %v7596_v19, 3 }
 0x34d   : > { %v5294_v26 = vpop.f32.mrf.mxu0  ;;  %v5359_v42 = vadd.f32 %v5291_v15, %v4838_v39  ;;  %v5875_v2 = vmax.f32 %v5833_v51, 0.0  ;;  %v4783_v37 = vpop.f32.mrf.mxu3  ;;  %v7599_v39 = vunpack.c.l.bf16 %v7740_v28 }
 0x34f   : > { %v5489_v4 = vmul.f32 %v9147_v57, %v5359_v42 }
 0x350   : > { %v4098_v49 = vpop.f32.mrf.mxu2 }
 0x351   : > { %v5535_v24 = vadd.f32 %v9165_v20, %v5489_v4  ;;  %v4164_v58 = vadd.f32 %v4098_v49, %v3644_v41  ;;  %v5741_v4 = vrot.slane %v7599_v39, 3  ;;  %v9343_v39 = vld [vmem:[#allocation14_spill] sm:$0xff] }
 0x352   : > { %v3580_v0 = vpop.f32.mrf.mxu1 }
 0x353   : > { %v5834_v54 = vadd.f32 %v5734_v55, %v5535_v24  ;;  %v4839_v52 = vadd.f32 %v9174_v63, %v4164_v58  ;;  %v3645_v11 = vadd.f32 %v3580_v0, %v8568_v8  ;;  %v5737_v63 = vrot.slane %v7595_v16, 3 }
 0x354   : > { %v5742_v24 = vsel %vm5107_vm5, %v5739_v56, %v5741_v4 }
 0x355   : > { %v5296_v18 = vpop.f32.mrf.mxu0  ;;  %v5876_v3 = vmax.f32 %v5834_v54, 0.0  ;;  %v5360_v36 = vadd.f32 %v5294_v26, %v4839_v52  ;;  %v5738_v23 = vsel %vm5107_vm5, %v5735_v9, %v5737_v63  ;;  %v4785_v40 = vpop.f32.mrf.mxu3  ;;  %v5740_v49 = vsel %vm5107_vm5, %v5737_v63, %v5739_v56 }
 0x357   : > { %v7684_v10 = vpack.c.bf16 %v5876_v3, %v5875_v2  ;;  %v5490_v61 = vmul.f32 %v9147_v57, %v5360_v36 }
 0x358   : > { %v4100_v62 = vpop.f32.mrf.mxu2 }
 0x359   : > { %7757 = vst [vmem:[%s7895_s29 + $0x60] sm:$0xff] %v7684_v10   ;;  %v4165_v50 = vadd.f32 %v4100_v62, %v3645_v11  ;;  %v5536_v33 = vadd.f32 %v9165_v20, %v5490_v61  ;;  %v7741_v11 = vld [vmem:[#allocation2 + $0x88] sm:$0xff]   ;;  %v7600_v62 = vunpack.c.h.bf16 %v7740_v28 }
 0x35a   : > { %v3583_v13 = vpop.f32.mrf.mxu1 }
 0x35b   : > { %v4840_v14 = vadd.f32 %v4775_v32, %v4165_v50  ;;  %v3646_v8 = vadd.f32 %v3583_v13, %v8574_v5  ;;  %v5835_v15 = vadd.f32 %v5736_v12, %v5536_v33  ;;  %v7603_v50 = vunpack.c.l.bf16 %v7741_v11 }
 0x35d   : > { %v5299_v1 = vpop.f32.mrf.mxu0  ;;  %v5361_v60 = vadd.f32 %v5296_v18, %v4840_v14  ;;  %v5877_v27 = vmax.f32 %v5835_v15, 0.0  ;;  %v4788_v0 = vpop.f32.mrf.mxu3  ;;  %v5743_v14 = vrot.slane %v7600_v62, 3 }
 0x35f   : > { %v5491_v53 = vmul.f32 %v9147_v57, %v5361_v60  ;;  %v5745_v60 = vrot.slane %v7603_v50, 3 }
 0x360   : > { %v4103_v25 = vpop.f32.mrf.mxu2 }
 0x361   : > { %v5537_v43 = vadd.f32 %v9165_v20, %v5491_v53  ;;  %v4166_v32 = vadd.f32 %v4103_v25, %v3646_v8  ;;  %v5744_v8 = vsel %vm5107_vm5, %v5741_v4, %v5743_v14  ;;  %v5746_v15 = vsel %vm5107_vm5, %v5743_v14, %v5745_v60 }
 0x362   : > { %v3585_v46 = vpop.f32.mrf.mxu1 }
 0x363   : > { %v5836_v48 = vadd.f32 %v5738_v23, %v5537_v43  ;;  %v4841_v44 = vadd.f32 %v4778_v7, %v4166_v32  ;;  %v3647_v5 = vadd.f32 %v3585_v46, %v8584_v22 }
 0x365   : > { %v5301_v34 = vpop.f32.mrf.mxu0  ;;  %v5878_v30 = vmax.f32 %v5836_v48, 0.0  ;;  %v5362_v45 = vadd.f32 %v5299_v1, %v4841_v44  ;;  %v4790_v63 = vpop.f32.mrf.mxu3 }
 0x367   : > { %v7689_v59 = vpack.c.bf16 %v5878_v30, %v5877_v27  ;;  %v5492_v26 = vmul.f32 %v9147_v57, %v5362_v45 }
 0x368   : > { %v4105_v38 = vpop.f32.mrf.mxu2 }
 0x369   : > { %7758 = vst [vmem:[%s7895_s29 + $0x68] sm:$0xff] %v7689_v59   ;;  %v4167_v6 = vadd.f32 %v4105_v38, %v3647_v5  ;;  %v5538_v41 = vadd.f32 %v9165_v20, %v5492_v26  ;;  %v7742_v59 = vld [vmem:[#allocation2 + $0x90] sm:$0xff]   ;;  %v7604_v5 = vunpack.c.h.bf16 %v7741_v11 }
 0x36a   : > { %v3588_v42 = vpop.f32.mrf.mxu1  ;;  %v7607_v56 = vunpack.c.l.bf16 %v7742_v59  ;;  %v7608_v50 = vunpack.c.h.bf16 %v7742_v59 }
 0x36b   : > { %v4842_v29 = vadd.f32 %v4780_v21, %v4167_v6  ;;  %v3648_v22 = vadd.f32 %v3588_v42, %v8590_v31  ;;  %v5837_v54 = vadd.f32 %v5740_v49, %v5538_v41 }
 0x36c   : > { %v5749_v49 = vrot.slane %v7607_v56, 3 }
 0x36d   : > { %v5304_v7 = vpop.f32.mrf.mxu0  ;;  %v5363_v55 = vadd.f32 %v5301_v34, %v4842_v29  ;;  %v5879_v17 = vmax.f32 %v5837_v54, 0.0  ;;  %v4793_v45 = vpop.f32.mrf.mxu3  ;;  %v9344_v54 = vld [vmem:[#allocation15_spill] sm:$0xff] }
 0x36f   : > { %v5493_v51 = vmul.f32 %v9147_v57, %v5363_v55 }
 0x370   : > { %v4108_v58 = vpop.f32.mrf.mxu2 }
 0x371   : > { %v5539_v52 = vadd.f32 %v9165_v20, %v5493_v51  ;;  %v4168_v21 = vadd.f32 %v4108_v58, %v3648_v22 }
 0x372   : > { %v3590_v18 = vpop.f32.mrf.mxu1 }
 0x373   : > { %v5838_v2 = vadd.f32 %v5742_v24, %v5539_v52  ;;  %v4843_v3 = vadd.f32 %v4783_v37, %v4168_v21  ;;  %v3649_v31 = vadd.f32 %v3590_v18, %v8600_v47  ;;  %v9342_v47 = vld [vmem:[#allocation13_spill] sm:$0xff] }
 0x375   : > { %v5306_v36 = vpop.f32.mrf.mxu0  ;;  %v5880_v35 = vmax.f32 %v5838_v2, 0.0  ;;  %v5364_v10 = vadd.f32 %v5304_v7, %v4843_v3  ;;  %v5747_v7 = vrot.slane %v7604_v5, 3  ;;  %v4795_v58 = vpop.f32.mrf.mxu3 }
 0x377   : > { %v7694_v16 = vpack.c.bf16 %v5880_v35, %v5879_v17  ;;  %v5494_v9 = vmul.f32 %v9147_v57, %v5364_v10  ;;  %v5748_v24 = vsel %vm5107_vm5, %v5745_v60, %v5747_v7  ;;  %v5750_v21 = vsel %vm5107_vm5, %v5747_v7, %v5749_v49 }
 0x378   : > { %v4110_v61 = vpop.f32.mrf.mxu2 }
 0x379   : > { %7759 = vst [vmem:[%s7895_s29 + $0x70] sm:$0xff] %v7694_v16   ;;  %v4169_v13 = vadd.f32 %v4110_v61, %v3649_v31  ;;  %v5540_v12 = vadd.f32 %v9165_v20, %v5494_v9  ;;  %v7743_v61 = vld [vmem:[#allocation2 + $0x98] sm:$0xff]  }
 0x37a   : > { %v3593_v1 = vpop.f32.mrf.mxu1  ;;  %v7612_v56 = vunpack.c.h.bf16 %v7743_v61 }
 0x37b   : > { %v4844_v33 = vadd.f32 %v4785_v40, %v4169_v13  ;;  %v3650_v25 = vadd.f32 %v3593_v1, %v9342_v47  ;;  %v5839_v32 = vadd.f32 %v5744_v8, %v5540_v12  ;;  %v9345_v13 = vld [vmem:[#allocation16_spill] sm:$0xff]  ;;  %v5751_v12 = vrot.slane %v7608_v50, 3 }
 0x37d   : > { %v5309_v37 = vpop.f32.mrf.mxu0  ;;  %v5365_v53 = vadd.f32 %v5306_v36, %v4844_v33  ;;  %v5881_v28 = vmax.f32 %v5839_v32, 0.0  ;;  %v4798_v33 = vpop.f32.mrf.mxu3 }
 0x37f   : > { %v5495_v23 = vmul.f32 %v9147_v57, %v5365_v53 }
 0x380   : > { %v4113_v43 = vpop.f32.mrf.mxu2 }
 0x381   : > { %v5541_v46 = vadd.f32 %v9165_v20, %v5495_v23  ;;  %v4170_v48 = vadd.f32 %v4113_v43, %v3650_v25  ;;  %v5752_v43 = vsel %vm5107_vm5, %v5749_v49, %v5751_v12 }
 0x382   : > { %v3595_v44 = vpop.f32.mrf.mxu1 }
 0x383   : > { %v5840_v34 = vadd.f32 %v5746_v15, %v5541_v46  ;;  %v4845_v27 = vadd.f32 %v4788_v0, %v4170_v48  ;;  %v3651_v26 = vadd.f32 %v3595_v44, %v9343_v39  ;;  %v9346_v46 = vld [vmem:[#allocation17_spill] sm:$0xff] }
 0x385   : > { %v5311_v30 = vpop.f32.mrf.mxu0  ;;  %v5882_v19 = vmax.f32 %v5840_v34, 0.0  ;;  %v5366_v40 = vadd.f32 %v5309_v37, %v4845_v27 }
 0x387   : > { %v7699_v38 = vpack.c.bf16 %v5882_v19, %v5881_v28  ;;  %v5496_v42 = vmul.f32 %v9147_v57, %v5366_v40  ;;  %v4800_v19 = vpop.f32.mrf.mxu3 }
 0x388   : > { %v4115_v6 = vpop.f32.mrf.mxu2 }
 0x389   : > { %7760 = vst [vmem:[%s7895_s29 + $0x78] sm:$0xff] %v7699_v38   ;;  %v4171_v29 = vadd.f32 %v4115_v6, %v3651_v26  ;;  %v5542_v51 = vadd.f32 %v9165_v20, %v5496_v42  ;;  %v7744_v6 = vld [vmem:[#allocation2 + $0xa0] sm:$0xff]  }
 0x38a   : > { %v3598_v4 = vpop.f32.mrf.mxu1 }
 0x38b   : > { %v4846_v41 = vadd.f32 %v4790_v63, %v4171_v29  ;;  %v3652_v52 = vadd.f32 %v3598_v4, %v9344_v54  ;;  %v5841_v2 = vadd.f32 %v5748_v24, %v5542_v51  ;;  %v7611_v63 = vunpack.c.l.bf16 %v7743_v61  ;;  %v9347_v29 = vld [vmem:[#allocation7_spill] sm:$0xff] }
 0x38c   : > { %v5755_v51 = vrot.slane %v7612_v56, 3 }
 0x38d   : > { %v5314_v55 = vpop.f32.mrf.mxu0  ;;  %v5367_v22 = vadd.f32 %v5311_v30, %v4846_v41  ;;  %v5883_v62 = vmax.f32 %v5841_v2, 0.0  ;;  %v5753_v47 = vrot.slane %v7611_v63, 3  ;;  %v7615_v41 = vunpack.c.l.bf16 %v7744_v6 }
 0x38f   : > { %v5497_v0 = vmul.f32 %v9147_v57, %v5367_v22  ;;  %v5754_v44 = vsel %vm5107_vm5, %v5751_v12, %v5753_v47 }
 0x390   : > { %v4118_v18 = vpop.f32.mrf.mxu2 }
 0x391   : > { %v5543_v3 = vadd.f32 %v9165_v20, %v5497_v0  ;;  %v4172_v36 = vadd.f32 %v4118_v18, %v3652_v52  ;;  %v4803_v0 = vpop.f32.mrf.mxu3 }
 0x392   : > { %v3600_v17 = vpop.f32.mrf.mxu1 }
 0x393   : > { %v5842_v35 = vadd.f32 %v5750_v21, %v5543_v3  ;;  %v4847_v10 = vadd.f32 %v4793_v45, %v4172_v36  ;;  %v3653_v14 = vadd.f32 %v3600_v17, %v9345_v13  ;;  %v5756_v21 = vsel %vm5107_vm5, %v5753_v47, %v5755_v51  ;;  %v9348_v3 = vld [vmem:[#allocation8_spill] sm:$0xff] }
 0x395   : > { %v5316_v11 = vpop.f32.mrf.mxu0  ;;  %v5884_v16 = vmax.f32 %v5842_v35, 0.0  ;;  %v5368_v31 = vadd.f32 %v5314_v55, %v4847_v10 }
 0x397   : > { %v7704_v9 = vpack.c.bf16 %v5884_v16, %v5883_v62  ;;  %v5498_v37 = vmul.f32 %v9147_v57, %v5368_v31 }
 0x398   : > { %v4120_v1 = vpop.f32.mrf.mxu2 }
 0x399   : > { %7761 = vst [vmem:[%s7895_s29 + $0x80] sm:$0xff] %v7704_v9   ;;  %v4173_v60 = vadd.f32 %v4120_v1, %v3653_v14  ;;  %v5544_v25 = vadd.f32 %v9165_v20, %v5498_v37  ;;  %v7745_v14 = vld [vmem:[#allocation2 + $0xa8] sm:$0xff]   ;;  %v7616_v1 = vunpack.c.h.bf16 %v7744_v6  ;;  %v4805_v63 = vpop.f32.mrf.mxu3 }
 0x39a   : > { %v3603_v53 = vpop.f32.mrf.mxu1  ;;  %v9349_v37 = vld [vmem:[#allocation9_spill] sm:$0xff] }
 0x39b   : > { %v4848_v8 = vadd.f32 %v4795_v58, %v4173_v60  ;;  %v3654_v48 = vadd.f32 %v3603_v53, %v9346_v46  ;;  %v5843_v27 = vadd.f32 %v5752_v43, %v5544_v25  ;;  %v5757_v58 = vrot.slane %v7615_v41, 3 }
 0x39c   : > { %v5759_v25 = vrot.slane %v7616_v1, 3 }
 0x39d   : > { %v5319_v23 = vpop.f32.mrf.mxu0  ;;  %v5369_v15 = vadd.f32 %v5316_v11, %v4848_v8  ;;  %v5885_v38 = vmax.f32 %v5843_v27, 0.0  ;;  %v5758_v17 = vsel %vm5107_vm5, %v5755_v51, %v5757_v58  ;;  %v7619_v8 = vunpack.c.l.bf16 %v7745_v14  ;;  %v9350_v27 = vld [vmem:[#allocation10_spill] sm:$0xff] }
 0x39f   : > { %v5499_v32 = vmul.f32 %v9147_v57, %v5369_v15 }
 0x3a0   : > { %v4123_v34 = vpop.f32.mrf.mxu2 }
 0x3a1   : > { %v5545_v30 = vadd.f32 %v9165_v20, %v5499_v32  ;;  %v4174_v45 = vadd.f32 %v4123_v34, %v3654_v48  ;;  %v5761_v32 = vrot.slane %v7619_v8, 3 }
 0x3a2   : > { %v3605_v28 = vpop.f32.mrf.mxu1 }
 0x3a3   : > { %v5844_v40 = vadd.f32 %v5754_v44, %v5545_v30  ;;  %v4849_v59 = vadd.f32 %v4798_v33, %v4174_v45  ;;  %v3655_v7 = vadd.f32 %v3605_v28, %v9347_v29  ;;  %v5760_v44 = vsel %vm5107_vm5, %v5757_v58, %v5759_v25  ;;  %v4808_v28 = vpop.f32.mrf.mxu3 }
 0x3a4   : > { %v5762_v45 = vsel %vm5107_vm5, %v5759_v25, %v5761_v32 }
 0x3a5   : > { %v5321_v5 = vpop.f32.mrf.mxu0  ;;  %v5886_v39 = vmax.f32 %v5844_v40, 0.0  ;;  %v5370_v26 = vadd.f32 %v5319_v23, %v4849_v59 }
 0x3a7   : > { %v7709_v42 = vpack.c.bf16 %v5886_v39, %v5885_v38  ;;  %v5500_v55 = vmul.f32 %v9147_v57, %v5370_v26 }
 0x3a8   : > { %v4125_v4 = vpop.f32.mrf.mxu2 }
 0x3a9   : > { %7762 = vst [vmem:[%s7895_s29 + $0x88] sm:$0xff] %v7709_v42   ;;  %v4175_v49 = vadd.f32 %v4125_v4, %v3655_v7  ;;  %v5546_v54 = vadd.f32 %v9165_v20, %v5500_v55  ;;  %v5594_v7 = vld [vmem:[#allocation2 + $0xb0] sm:$0x3]  ;;  %v7620_v4 = vunpack.c.h.bf16 %v7745_v14  ;;  %v9351_v55 = vld [vmem:[#allocation11_spill] sm:$0xff] }
 0x3aa   : > { %v3608_v22 = vpop.f32.mrf.mxu1 }
 0x3ab   : > { %v4850_v24 = vadd.f32 %v4800_v19, %v4175_v49  ;;  %v3656_v36 = vadd.f32 %v3608_v22, %v9348_v3  ;;  %v5845_v10 = vadd.f32 %v5756_v21, %v5546_v54  ;;  %v5637_v22 = vunpack.c.l.bf16 %v5594_v7  ;;  %v4810_v54 = vpop.f32.mrf.mxu3 }
 0x3ad   : > { %v5371_v52 = vadd.f32 %v5321_v5, %v4850_v24  ;;  %v5324_v18 = vpop.f32.mrf.mxu0  ;;  %v5887_v50 = vmax.f32 %v5845_v10, 0.0 }
 0x3af   : > { %v5501_v2 = vmul.f32 %v9147_v57, %v5371_v52 }
 0x3b0   : > { %v4128_v35 = vpop.f32.mrf.mxu2 }
 0x3b1   : > { %v5547_v11 = vadd.f32 %v9165_v20, %v5501_v2  ;;  %v4176_v62 = vadd.f32 %v4128_v35, %v3656_v36 }
 0x3b2   : > { %v3610_v16 = vpop.f32.mrf.mxu1 }
 0x3b3   : > { %v5846_v31 = vadd.f32 %v5758_v17, %v5547_v11  ;;  %v4851_v61 = vadd.f32 %v4803_v0, %v4176_v62  ;;  %v3657_v60 = vadd.f32 %v3610_v16, %v9349_v37  ;;  %v5763_v0 = vrot.slane %v7620_v4, 3 }
 0x3b5   : > { %v5888_v9 = vmax.f32 %v5846_v31, 0.0  ;;  %v5372_v13 = vadd.f32 %v5324_v18, %v4851_v61  ;;  %v5326_v12 = vpop.f32.mrf.mxu0  ;;  %v5765_v18 = vrot.slane %v5637_v22, 3  ;;  %v5764_v36 = vsel %vm5107_vm5, %v5761_v32, %v5763_v0 }
 0x3b7   : > { %v7714_v33 = vpack.c.bf16 %v5888_v9, %v5887_v50  ;;  %v5502_v23 = vmul.f32 %v9147_v57, %v5372_v13  ;;  %v5766_v35 = vsel %vm5107_vm5, %v5763_v0, %v5765_v18 }
 0x3b8   : > { %v4130_v53 = vpop.f32.mrf.mxu2 }
 0x3b9   : > { %7763 = vst [vmem:[%s7895_s29 + $0x90] sm:$0xff] %v7714_v33   ;;  %v4177_v47 = vadd.f32 %v4130_v53, %v3657_v60  ;;  %v5548_v46 = vadd.f32 %v9165_v20, %v5502_v23 }
 0x3ba   : > { %v3613_v15 = vpop.f32.mrf.mxu1 }
 0x3bb   : > { %v4852_v43 = vadd.f32 %v4805_v63, %v4177_v47  ;;  %v3658_v30 = vadd.f32 %v3613_v15, %v9350_v27  ;;  %v5847_v40 = vadd.f32 %v5760_v44, %v5548_v46 }
 0x3bd   : > { %v5373_v48 = vadd.f32 %v5326_v12, %v4852_v43  ;;  %v5329_v38 = vpop.f32.mrf.mxu0  ;;  %v5889_v56 = vmax.f32 %v5847_v40, 0.0 }
 0x3bf   : > { %v5503_v34 = vmul.f32 %v9147_v57, %v5373_v48 }
 0x3c0   : > { %v4133_v19 = vpop.f32.mrf.mxu2 }
 0x3c1   : > { %v5549_v59 = vadd.f32 %v9165_v20, %v5503_v34  ;;  %v4178_v5 = vadd.f32 %v4133_v19, %v3658_v30 }
 0x3c2   : > { %v3615_v6 = vpop.f32.mrf.mxu1 }
 0x3c3   : > { %v5848_v39 = vadd.f32 %v5762_v45, %v5549_v59  ;;  %v4853_v26 = vadd.f32 %v4808_v28, %v4178_v5  ;;  %v3659_v49 = vadd.f32 %v3615_v6, %v9351_v55 }
 0x3c5   : > { %v5890_v42 = vmax.f32 %v5848_v39, 0.0  ;;  %v5374_v29 = vadd.f32 %v5329_v38, %v4853_v26  ;;  %v5331_v21 = vpop.f32.mrf.mxu0 }
 0x3c7   : > { %v7719_v41 = vpack.c.bf16 %v5890_v42, %v5889_v56  ;;  %v5504_v24 = vmul.f32 %v9147_v57, %v5374_v29 }
 0x3c8   : > { %v4135_v51 = vpop.f32.mrf.mxu2 }
 0x3c9   : > { %7764 = vst [vmem:[%s7895_s29 + $0x98] sm:$0xff] %v7719_v41   ;;  %v4179_v58 = vadd.f32 %v4135_v51, %v3659_v49  ;;  %v5550_v2 = vadd.f32 %v9165_v20, %v5504_v24 }
 0x3cb   : > { %v4854_v52 = vadd.f32 %v4810_v54, %v4179_v58  ;;  %v5849_v10 = vadd.f32 %v5764_v36, %v5550_v2 }
 0x3cd   : > { %v5375_v3 = vadd.f32 %v5331_v21, %v4854_v52  ;;  %v5891_v16 = vmax.f32 %v5849_v10, 0.0 }
 0x3cf   : > { %v5505_v17 = vmul.f32 %v9147_v57, %v5375_v3 }
 0x3d1   : > { %v5551_v11 = vadd.f32 %v9165_v20, %v5505_v17 }
 0x3d3   : > { %v5850_v62 = vadd.f32 %v5766_v35, %v5551_v11 }
 0x3d5   : > { %v5892_v31 = vmax.f32 %v5850_v62, 0.0 }
 0x3d7   : > { %v7724_v61 = vpack.c.bf16 %v5892_v31, %v5891_v16 }
 0x3d9   : > { %7765 = vst [vmem:[%s7895_s29 + $0xa0] sm:$0xff] %v7724_v61  }
 0x3da PF: > { %s14_s17 = sadd.s32 1, %s7842_s17   ;;  %s9352_s15 = smov %s7838_s16 }
 0x3db   : > { %p11_p5 = scmp.ge.s32.totalorder %s14_s17, 4   ;;  %s9353_s16 = smov %s9355_s18 }
 0x3dd   :  { %13 = sbr.rel (!%p11_p5) target bundleno = 2 (0x2), region = 109 }
 0x3e2   :  { %6005 = vsyncmov [#allocation4] }
 0x3e5   :  { %s6006_s27 = vpop.sfrf %6005 }
 0x3e6   :  { %p7279_p6 = scmp.ne.s32.totalorder %s6006_s27, 0 }
 0x3e8   :  { %6010 = shalt.err (%p7279_p6)  }

</bundles_post_ra>
